<compile_context>
chip_gen: v5e
topology: v5e:2x2
jax: 0.10.0
libtpu: 0.0.40
codegen_flags: <defaults>
</compile_context>

<pallas_src>
import functools

import jax
import jax.numpy as jnp
from jax.experimental import pallas as pl
from jax.experimental.pallas import tpu as pltpu


def _pick_tile_h(H, W, max_rows=256):
    """Largest divisor of H with tile_h * W <= max_rows (bounds vreg pressure)."""
    best = 1
    for t in range(1, H + 1):
        if H % t == 0 and t * W <= max_rows:
            best = t
    return best


def _single_conv_kernel(x_ref, w_ref, scale_ref, bias_ref, o_ref, col_ref, *,
                        K, tile_h, Cin):
    # x_ref:     (1, H+K-1, W+K-1, Cin)  spatially padded input (bf16),
    #                                    natural channel count, resident per n
    # w_ref:     (K*K*Cin, Cout)         im2col-ordered weights (bf16)
    # scale_ref: (1, Cout)               folded BN scale (f32)
    # bias_ref:  (1, Cout)               folded BN bias + conv bias (f32)
    # o_ref:     (1, tile_h, W, Cout)    output tile (bf16)
    # col_ref:   (tile_h, W, K*K*Cin)    im2col VMEM scratch (bf16)
    W = o_ref.shape[2]
    Cout = o_ref.shape[3]

    h0 = pl.multiple_of(pl.program_id(1) * tile_h, tile_h)

    # im2col: pack all K*K taps contiguously along the contraction (lane) axis
    # of the VMEM scratch.  Offsets are static; for tiny Cin these are small
    # masked lane stores, for Cin % 128 == 0 they become unmasked automatically.
    for kh in range(K):
        for kw in range(K):
            c0 = (kh * K + kw) * Cin
            col_ref[:, :, c0:c0 + Cin] = x_ref[
                0, pl.ds(h0 + kh, tile_h), pl.ds(kw, W), :]

    # One deep MXU contraction: bf16 operands, f32 accumulation.  Mosaic pads
    # the K*K*Cin depth to the MXU internally; the (tile_h, W, .) <->
    # (tile_h*W, .) reshapes are layout no-ops (W % 8 == 0, asserted).
    cols = col_ref[...].reshape(tile_h * W, K * K * Cin)
    acc = jnp.dot(cols, w_ref[...], preferred_element_type=jnp.float32)

    # Fused inference BatchNorm + conv-bias + ReLU epilogue in f32; cast to
    # bf16 only at the store.
    y = jnp.maximum(acc * scale_ref[0] + bias_ref[0], 0.0)
    o_ref[0] = y.reshape(tile_h, W, Cout).astype(o_ref.dtype)


def single_conv_forward(x_nchw, conv_w, conv_b, bn_gamma, bn_beta,
                        bn_mean, bn_var, *, eps=1e-5, kernel_size=3,
                        tile_h=None, nchw_f32_output=True):
    """SingleConv forward: ReLU(BN(Conv2d(x))).

    x_nchw: (N, Cin, H, W) f32.  Returns (N, Cout, H, W) f32 by default; with
    nchw_f32_output=False returns the kernel-native (N, H, W, Cout) bf16 (TPU
    consumers should take that and stay NHWC end-to-end).
    """
    N, Cin, H, W = x_nchw.shape
    Cout = conv_w.shape[0]
    K = kernel_size
    assert K % 2 == 1, "only odd kernel sizes ('same' padding = K//2) supported"
    assert W % 8 == 0, "W must be a multiple of 8 (sublane-clean reshapes)"
    pad = K // 2

    if tile_h is None:
        tile_h = _pick_tile_h(H, W)
    assert H % tile_h == 0, "tile_h must divide H"

    # --- glue (plain JAX): layout, halo pad, BN folding.  No channel padding
    # in HBM; at natural Cin the halo pad is tiny and fuses with the transpose.
    x_nhwc = jnp.transpose(x_nchw, (0, 2, 3, 1)).astype(jnp.bfloat16)
    x_pad = jnp.pad(x_nhwc, ((0, 0), (pad, pad), (pad, pad), (0, 0)))

    # (Cout, Cin, K, K) -> (K, K, Cin, Cout) -> (K*K*Cin, Cout); row order
    # (kh, kw, c) matches the kernel's packing.  No channel padding.
    w2d = jnp.transpose(conv_w, (2, 3, 1, 0)).reshape(K * K * Cin, Cout)
    w2d = w2d.astype(jnp.bfloat16)

    scale = (bn_gamma / jnp.sqrt(bn_var + eps)).astype(jnp.float32)   # (Cout,)
    bias = ((conv_b - bn_mean) * scale + bn_beta).astype(jnp.float32)
    scale2d = scale.reshape(1, Cout)
    bias2d = bias.reshape(1, Cout)

    Hp, Wp = H + 2 * pad, W + 2 * pad
    grid = (N, H // tile_h)

    # 3/4 of the per-core VMEM (v7x only has 64 MiB/TC; v5e/v6e have 128 MiB).
    try:
        vmem_cap = int(pltpu.get_tpu_info().vmem_capacity_bytes)
    except Exception:
        vmem_cap = 64 * 1024 * 1024
    vmem_limit = max(32 * 1024 * 1024,
                     min((vmem_cap * 3) // 4, 96 * 1024 * 1024))

    out_nhwc = pl.pallas_call(
        functools.partial(_single_conv_kernel, K=K, tile_h=tile_h, Cin=Cin),
        out_shape=jax.ShapeDtypeStruct((N, H, W, Cout), jnp.bfloat16),
        grid_spec=pltpu.PrefetchScalarGridSpec(
            num_scalar_prefetch=0,
            grid=grid,
            in_specs=[
                # Block index depends only on n -> the (spatially padded,
                # natural-channel) image stays resident in VMEM across the
                # h-tile axis; no re-DMA per h step.
                pl.BlockSpec((1, Hp, Wp, Cin), lambda n, h: (n, 0, 0, 0)),
                pl.BlockSpec((K * K * Cin, Cout), lambda n, h: (0, 0)),
                pl.BlockSpec((1, Cout), lambda n, h: (0, 0)),
                pl.BlockSpec((1, Cout), lambda n, h: (0, 0)),
            ],
            out_specs=pl.BlockSpec((1, tile_h, W, Cout),
                                   lambda n, h: (n, h, 0, 0)),
            scratch_shapes=[
                pltpu.VMEM((tile_h, W, K * K * Cin), jnp.bfloat16)],
        ),
        compiler_params=pltpu.CompilerParams(
            # n "parallel": v7x megacore splits over images, each core keeps a
            # private resident x block; h stays sequential within a core.
            dimension_semantics=("parallel", "arbitrary"),
            vmem_limit_bytes=vmem_limit),
    )(x_pad, w2d, scale2d, bias2d)

    if not nchw_f32_output:
        return out_nhwc
    # Single fused pass back to the PyTorch interface (NCHW, f32).
    return jnp.transpose(out_nhwc, (0, 3, 1, 2)).astype(jnp.float32)


def _reference(x, conv_w, conv_b, bn_gamma, bn_beta, bn_mean, bn_var,
               eps=1e-5):
    # Round inputs/weights to bf16 (the kernel's MXU operand dtype) so the
    # comparison isolates kernel correctness; accumulation is f32 in both.
    xb = x.astype(jnp.bfloat16).astype(jnp.float32)
    wb = conv_w.astype(jnp.bfloat16).astype(jnp.float32)
    K = conv_w.shape[-1]
    pad = K // 2
    y = jax.lax.conv_general_dilated(
        xb, wb, window_strides=(1, 1), padding=[(pad, pad), (pad, pad)],
        dimension_numbers=("NCHW", "OIHW", "NCHW"),
        precision=jax.lax.Precision.HIGHEST)
    y = y + conv_b.reshape(1, -1, 1, 1)
    y = (y - bn_mean.reshape(1, -1, 1, 1)) / jnp.sqrt(
        bn_var.reshape(1, -1, 1, 1) + eps)
    y = y * bn_gamma.reshape(1, -1, 1, 1) + bn_beta.reshape(1, -1, 1, 1)
    return jnp.maximum(y, 0.0)


def _run_case(key, N, Cin, Cout, H, W, K, tile_h=None):
    k = jax.random.split(key, 7)
    x = jax.random.normal(k[0], (N, Cin, H, W), jnp.float32)
    conv_w = jax.random.normal(k[1], (Cout, Cin, K, K), jnp.float32) * 0.1
    conv_b = jax.random.normal(k[2], (Cout,), jnp.float32) * 0.1
    bn_gamma = 1.0 + 0.1 * jax.random.normal(k[3], (Cout,), jnp.float32)
    bn_beta = 0.1 * jax.random.normal(k[4], (Cout,), jnp.float32)
    bn_mean = 0.1 * jax.random.normal(k[5], (Cout,), jnp.float32)
    bn_var = jnp.abs(jax.random.normal(k[6], (Cout,), jnp.float32)) + 0.5

    out = single_conv_forward(x, conv_w, conv_b, bn_gamma, bn_beta,
                              bn_mean, bn_var, kernel_size=K, tile_h=tile_h)
    out = jax.block_until_ready(out)

    ref = _reference(x, conv_w, conv_b, bn_gamma, bn_beta, bn_mean, bn_var)
    assert out.shape == (N, Cout, H, W)
    err = float(jnp.max(jnp.abs(out - ref)))
    # Tolerance covers bf16 MXU operands + the bf16 output store.
    assert jnp.allclose(out, ref, atol=2.5e-2, rtol=2.5e-2), \
        f"mismatch vs reference (max abs err {err})"


if __name__ == "__main__":
    key = jax.random.PRNGKey(0)
    k1, k2 = jax.random.split(key)

    # Primary case (matches the module's typical small usage).
    _run_case(k1, N=2, Cin=4, Cout=8, H=16, W=16, K=3)
    # Secondary case: odd channel counts, narrower W, multiple H tiles.
    _run_case(k2, N=1, Cin=3, Cout=5, H=16, W=8, K=3, tile_h=4)

    print("KERNEL_OK")
</pallas_src>

<mosaic_0001>
module attributes {stable_mosaic.version = 11 : i64} {
  func.func @_single_conv_kernel(%arg0: i32, %arg1: i32, %arg2: memref<1x18x18x4xbf16, #tpu.memory_space<vmem>>, %arg3: memref<36x8xbf16, #tpu.memory_space<vmem>>, %arg4: memref<1x8xf32, #tpu.memory_space<vmem>>, %arg5: memref<1x8xf32, #tpu.memory_space<vmem>>, %arg6: memref<1x16x16x8xbf16, #tpu.memory_space<vmem>>, %arg7: memref<16x16x36xbf16, #tpu.memory_space<vmem>>) attributes {dimension_semantics = [#tpu.dimension_semantics<parallel>, #tpu.dimension_semantics<arbitrary>], iteration_bounds = array<i64: 2, 1>, scalar_prefetch = 0 : i64, scratch_operands = 1 : i64, tpu.core_type = #tpu.core_type<tc>, window_params = [{transform_indices = @transform_0, window_bounds = array<i64: 1, 18, 18, 4>}, {pipeline_mode = #tpu.pipeline_mode<synchronous>, transform_indices = @transform_1, window_bounds = array<i64: 36, 8>}, {pipeline_mode = #tpu.pipeline_mode<synchronous>, transform_indices = @transform_2, window_bounds = array<i64: 1, 8>}, {pipeline_mode = #tpu.pipeline_mode<synchronous>, transform_indices = @transform_3, window_bounds = array<i64: 1, 8>}, {transform_indices = @transform_4, window_bounds = array<i64: 1, 16, 16, 8>}]} {
    %c16_i32 = arith.constant 16 : i32
    %0 = arith.muli %arg1, %c16_i32 : i32
    %1 = tpu.assume_multiple %0, 16 : i32
    %c0_i32 = arith.constant 0 : i32
    %2 = arith.addi %1, %c0_i32 : i32
    %c0 = arith.constant 0 : index
    %3 = arith.index_cast %2 : i32 to index
    %c0_0 = arith.constant 0 : index
    %c0_1 = arith.constant 0 : index
    %4 = vector.load %arg2[%c0, %3, %c0_0, %c0_1] : memref<1x18x18x4xbf16, #tpu.memory_space<vmem>>, vector<1x16x16x4xbf16>
    %5 = vector.shape_cast %4 : vector<1x16x16x4xbf16> to vector<16x16x4xbf16>
    %c0_2 = arith.constant 0 : index
    %c0_3 = arith.constant 0 : index
    %c0_4 = arith.constant 0 : index
    %6 = vector.load %arg7[%c0_2, %c0_3, %c0_4] : memref<16x16x36xbf16, #tpu.memory_space<vmem>>, vector<16x16x4xbf16>
    tpu.vector_store %arg7[%c0_2, %c0_3, %c0_4], %5 {strides = array<i32>} : memref<16x16x36xbf16, #tpu.memory_space<vmem>>, vector<16x16x4xbf16>,
    %c0_i32_5 = arith.constant 0 : i32
    %7 = arith.addi %1, %c0_i32_5 : i32
    %c0_6 = arith.constant 0 : index
    %8 = arith.index_cast %7 : i32 to index
    %c1 = arith.constant 1 : index
    %c0_7 = arith.constant 0 : index
    %9 = vector.load %arg2[%c0_6, %8, %c1, %c0_7] : memref<1x18x18x4xbf16, #tpu.memory_space<vmem>>, vector<1x16x16x4xbf16>
    %10 = vector.shape_cast %9 : vector<1x16x16x4xbf16> to vector<16x16x4xbf16>
    %c0_8 = arith.constant 0 : index
    %c0_9 = arith.constant 0 : index
    %c4 = arith.constant 4 : index
    %11 = vector.load %arg7[%c0_8, %c0_9, %c4] : memref<16x16x36xbf16, #tpu.memory_space<vmem>>, vector<16x16x4xbf16>
    tpu.vector_store %arg7[%c0_8, %c0_9, %c4], %10 {strides = array<i32>} : memref<16x16x36xbf16, #tpu.memory_space<vmem>>, vector<16x16x4xbf16>,
    %c0_i32_10 = arith.constant 0 : i32
    %12 = arith.addi %1, %c0_i32_10 : i32
    %c0_11 = arith.constant 0 : index
    %13 = arith.index_cast %12 : i32 to index
    %c2 = arith.constant 2 : index
    %c0_12 = arith.constant 0 : index
    %14 = vector.load %arg2[%c0_11, %13, %c2, %c0_12] : memref<1x18x18x4xbf16, #tpu.memory_space<vmem>>, vector<1x16x16x4xbf16>
    %15 = vector.shape_cast %14 : vector<1x16x16x4xbf16> to vector<16x16x4xbf16>
    %c0_13 = arith.constant 0 : index
    %c0_14 = arith.constant 0 : index
    %c8 = arith.constant 8 : index
    %16 = vector.load %arg7[%c0_13, %c0_14, %c8] : memref<16x16x36xbf16, #tpu.memory_space<vmem>>, vector<16x16x4xbf16>
    tpu.vector_store %arg7[%c0_13, %c0_14, %c8], %15 {strides = array<i32>} : memref<16x16x36xbf16, #tpu.memory_space<vmem>>, vector<16x16x4xbf16>,
    %c1_i32 = arith.constant 1 : i32
    %17 = arith.addi %1, %c1_i32 : i32
    %c0_15 = arith.constant 0 : index
    %18 = arith.index_cast %17 : i32 to index
    %c0_16 = arith.constant 0 : index
    %c0_17 = arith.constant 0 : index
    %19 = vector.load %arg2[%c0_15, %18, %c0_16, %c0_17] : memref<1x18x18x4xbf16, #tpu.memory_space<vmem>>, vector<1x16x16x4xbf16>
    %20 = vector.shape_cast %19 : vector<1x16x16x4xbf16> to vector<16x16x4xbf16>
    %c0_18 = arith.constant 0 : index
    %c0_19 = arith.constant 0 : index
    %c12 = arith.constant 12 : index
    %21 = vector.load %arg7[%c0_18, %c0_19, %c12] : memref<16x16x36xbf16, #tpu.memory_space<vmem>>, vector<16x16x4xbf16>
    tpu.vector_store %arg7[%c0_18, %c0_19, %c12], %20 {strides = array<i32>} : memref<16x16x36xbf16, #tpu.memory_space<vmem>>, vector<16x16x4xbf16>,
    %c1_i32_20 = arith.constant 1 : i32
    %22 = arith.addi %1, %c1_i32_20 : i32
    %c0_21 = arith.constant 0 : index
    %23 = arith.index_cast %22 : i32 to index
    %c1_22 = arith.constant 1 : index
    %c0_23 = arith.constant 0 : index
    %24 = vector.load %arg2[%c0_21, %23, %c1_22, %c0_23] : memref<1x18x18x4xbf16, #tpu.memory_space<vmem>>, vector<1x16x16x4xbf16>
    %25 = vector.shape_cast %24 : vector<1x16x16x4xbf16> to vector<16x16x4xbf16>
    %c0_24 = arith.constant 0 : index
    %c0_25 = arith.constant 0 : index
    %c16 = arith.constant 16 : index
    %26 = vector.load %arg7[%c0_24, %c0_25, %c16] : memref<16x16x36xbf16, #tpu.memory_space<vmem>>, vector<16x16x4xbf16>
    tpu.vector_store %arg7[%c0_24, %c0_25, %c16], %25 {strides = array<i32>} : memref<16x16x36xbf16, #tpu.memory_space<vmem>>, vector<16x16x4xbf16>,
    %c1_i32_26 = arith.constant 1 : i32
    %27 = arith.addi %1, %c1_i32_26 : i32
    %c0_27 = arith.constant 0 : index
    %28 = arith.index_cast %27 : i32 to index
    %c2_28 = arith.constant 2 : index
    %c0_29 = arith.constant 0 : index
    %29 = vector.load %arg2[%c0_27, %28, %c2_28, %c0_29] : memref<1x18x18x4xbf16, #tpu.memory_space<vmem>>, vector<1x16x16x4xbf16>
    %30 = vector.shape_cast %29 : vector<1x16x16x4xbf16> to vector<16x16x4xbf16>
    %c0_30 = arith.constant 0 : index
    %c0_31 = arith.constant 0 : index
    %c20 = arith.constant 20 : index
    %31 = vector.load %arg7[%c0_30, %c0_31, %c20] : memref<16x16x36xbf16, #tpu.memory_space<vmem>>, vector<16x16x4xbf16>
    tpu.vector_store %arg7[%c0_30, %c0_31, %c20], %30 {strides = array<i32>} : memref<16x16x36xbf16, #tpu.memory_space<vmem>>, vector<16x16x4xbf16>,
    %c2_i32 = arith.constant 2 : i32
    %32 = arith.addi %1, %c2_i32 : i32
    %c0_32 = arith.constant 0 : index
    %33 = arith.index_cast %32 : i32 to index
    %c0_33 = arith.constant 0 : index
    %c0_34 = arith.constant 0 : index
    %34 = vector.load %arg2[%c0_32, %33, %c0_33, %c0_34] : memref<1x18x18x4xbf16, #tpu.memory_space<vmem>>, vector<1x16x16x4xbf16>
    %35 = vector.shape_cast %34 : vector<1x16x16x4xbf16> to vector<16x16x4xbf16>
    %c0_35 = arith.constant 0 : index
    %c0_36 = arith.constant 0 : index
    %c24 = arith.constant 24 : index
    %36 = vector.load %arg7[%c0_35, %c0_36, %c24] : memref<16x16x36xbf16, #tpu.memory_space<vmem>>, vector<16x16x4xbf16>
    tpu.vector_store %arg7[%c0_35, %c0_36, %c24], %35 {strides = array<i32>} : memref<16x16x36xbf16, #tpu.memory_space<vmem>>, vector<16x16x4xbf16>,
    %c2_i32_37 = arith.constant 2 : i32
    %37 = arith.addi %1, %c2_i32_37 : i32
    %c0_38 = arith.constant 0 : index
    %38 = arith.index_cast %37 : i32 to index
    %c1_39 = arith.constant 1 : index
    %c0_40 = arith.constant 0 : index
    %39 = vector.load %arg2[%c0_38, %38, %c1_39, %c0_40] : memref<1x18x18x4xbf16, #tpu.memory_space<vmem>>, vector<1x16x16x4xbf16>
    %40 = vector.shape_cast %39 : vector<1x16x16x4xbf16> to vector<16x16x4xbf16>
    %c0_41 = arith.constant 0 : index
    %c0_42 = arith.constant 0 : index
    %c28 = arith.constant 28 : index
    %41 = vector.load %arg7[%c0_41, %c0_42, %c28] : memref<16x16x36xbf16, #tpu.memory_space<vmem>>, vector<16x16x4xbf16>
    tpu.vector_store %arg7[%c0_41, %c0_42, %c28], %40 {strides = array<i32>} : memref<16x16x36xbf16, #tpu.memory_space<vmem>>, vector<16x16x4xbf16>,
    %c2_i32_43 = arith.constant 2 : i32
    %42 = arith.addi %1, %c2_i32_43 : i32
    %c0_44 = arith.constant 0 : index
    %43 = arith.index_cast %42 : i32 to index
    %c2_45 = arith.constant 2 : index
    %c0_46 = arith.constant 0 : index
    %44 = vector.load %arg2[%c0_44, %43, %c2_45, %c0_46] : memref<1x18x18x4xbf16, #tpu.memory_space<vmem>>, vector<1x16x16x4xbf16>
    %45 = vector.shape_cast %44 : vector<1x16x16x4xbf16> to vector<16x16x4xbf16>
    %c0_47 = arith.constant 0 : index
    %c0_48 = arith.constant 0 : index
    %c32 = arith.constant 32 : index
    %46 = vector.load %arg7[%c0_47, %c0_48, %c32] : memref<16x16x36xbf16, #tpu.memory_space<vmem>>, vector<16x16x4xbf16>
    tpu.vector_store %arg7[%c0_47, %c0_48, %c32], %45 {strides = array<i32>} : memref<16x16x36xbf16, #tpu.memory_space<vmem>>, vector<16x16x4xbf16>,
    %c0_49 = arith.constant 0 : index
    %c0_50 = arith.constant 0 : index
    %c0_51 = arith.constant 0 : index
    %47 = vector.load %arg7[%c0_49, %c0_50, %c0_51] : memref<16x16x36xbf16, #tpu.memory_space<vmem>>, vector<16x16x36xbf16>
    %48 = vector.shape_cast %47 : vector<16x16x36xbf16> to vector<256x36xbf16>
    %c0_52 = arith.constant 0 : index
    %c0_53 = arith.constant 0 : index
    %49 = vector.load %arg3[%c0_52, %c0_53] : memref<36x8xbf16, #tpu.memory_space<vmem>>, vector<36x8xbf16>
    %cst = arith.constant dense<0.000000e+00> : vector<256x8xf32>
    %50 = tpu.matmul %48, %49, %cst {dimension_numbers = #tpu.dot_dimension_numbers<[1], [0], [0], [1], [0, 0, 1, 1], [], []>} : vector<256x36xbf16>, vector<36x8xbf16>, vector<256x8xf32> -> vector<256x8xf32>
    %c0_54 = arith.constant 0 : index
    %c0_55 = arith.constant 0 : index
    %51 = vector.load %arg4[%c0_54, %c0_55] : memref<1x8xf32, #tpu.memory_space<vmem>>, vector<1x8xf32>
    %52 = vector.shape_cast %51 : vector<1x8xf32> to vector<8xf32>
    %53 = vector.shape_cast %52 : vector<8xf32> to vector<1x8xf32>
    %54 = vector.broadcast %53 : vector<1x8xf32> to vector<256x8xf32>
    %55 = arith.mulf %50, %54 : vector<256x8xf32>
    %c0_56 = arith.constant 0 : index
    %c0_57 = arith.constant 0 : index
    %56 = vector.load %arg5[%c0_56, %c0_57] : memref<1x8xf32, #tpu.memory_space<vmem>>, vector<1x8xf32>
    %57 = vector.shape_cast %56 : vector<1x8xf32> to vector<8xf32>
    %58 = vector.shape_cast %57 : vector<8xf32> to vector<1x8xf32>
    %59 = vector.broadcast %58 : vector<1x8xf32> to vector<256x8xf32>
    %60 = arith.addf %55, %59 : vector<256x8xf32>
    %cst_58 = arith.constant 0.000000e+00 : f32
    %61 = vector.broadcast %cst_58 : f32 to vector<256x8xf32>
    %62 = arith.maximumf %60, %61 : vector<256x8xf32>
    %63 = vector.shape_cast %62 : vector<256x8xf32> to vector<16x16x8xf32>
    %64 = arith.truncf %63 : vector<16x16x8xf32> to vector<16x16x8xbf16>
    %c0_59 = arith.constant 0 : index
    %c0_60 = arith.constant 0 : index
    %c0_61 = arith.constant 0 : index
    %c0_62 = arith.constant 0 : index
    %65 = vector.load %arg6[%c0_59, %c0_60, %c0_61, %c0_62] : memref<1x16x16x8xbf16, #tpu.memory_space<vmem>>, vector<1x16x16x8xbf16>
    %66 = vector.shape_cast %65 : vector<1x16x16x8xbf16> to vector<16x16x8xbf16>
    %67 = vector.shape_cast %64 : vector<16x16x8xbf16> to vector<1x16x16x8xbf16>
    tpu.vector_store %arg6[%c0_59, %c0_60, %c0_61, %c0_62], %67 {strides = array<i32>} : memref<1x16x16x8xbf16, #tpu.memory_space<vmem>>, vector<1x16x16x8xbf16>,
    return
  }
  func.func @transform_0(%arg0: i32, %arg1: i32) -> (i32, i32, i32, i32) {
    %c0_i32 = arith.constant 0 : i32
    %c0_i32_0 = arith.constant 0 : i32
    %c0_i32_1 = arith.constant 0 : i32
    %c0_i32_2 = arith.constant 0 : i32
    return %arg0, %c0_i32, %c0_i32_0, %c0_i32_1 : i32, i32, i32, i32
  }
  func.func @transform_1(%arg0: i32, %arg1: i32) -> (i32, i32) {
    %c0_i32 = arith.constant 0 : i32
    %c0_i32_0 = arith.constant 0 : i32
    %c0_i32_1 = arith.constant 0 : i32
    return %c0_i32, %c0_i32_0 : i32, i32
  }
  func.func @transform_2(%arg0: i32, %arg1: i32) -> (i32, i32) {
    %c0_i32 = arith.constant 0 : i32
    %c0_i32_0 = arith.constant 0 : i32
    %c0_i32_1 = arith.constant 0 : i32
    return %c0_i32, %c0_i32_0 : i32, i32
  }
  func.func @transform_3(%arg0: i32, %arg1: i32) -> (i32, i32) {
    %c0_i32 = arith.constant 0 : i32
    %c0_i32_0 = arith.constant 0 : i32
    %c0_i32_1 = arith.constant 0 : i32
    return %c0_i32, %c0_i32_0 : i32, i32
  }
  func.func @transform_4(%arg0: i32, %arg1: i32) -> (i32, i32, i32, i32) {
    %c0_i32 = arith.constant 0 : i32
    %c0_i32_0 = arith.constant 0 : i32
    %c0_i32_1 = arith.constant 0 : i32
    return %arg0, %arg1, %c0_i32, %c0_i32_0 : i32, i32, i32, i32
  }
}

</mosaic_0001>

<bundles_post_ra>
// kernel: tpu_custom_call.1
= control target key start
LH: loop header
LB: loop body
LE: loop exit
PB: predicated region body
PF: predicated region fallthrough
CT: control target
= control target key end

     0   :  { %s4449_s15 = smov 0   ;;  %s4451_s16 = smov 0   ;;  %s6043_s0 = inlined_call_operand.vmem [shape: bf16[2,18,18,4], index: 0, kind: input, shape index: {}]   ;;  %s6044_s1 = inlined_call_operand.vmem [shape: bf16[36,8], index: 1, kind: input, shape index: {}]   ;;  %s6045_s2 = inlined_call_operand.vmem [shape: f32[1,8], index: 2, kind: input, shape index: {}]   ;;  %s6046_s3 = inlined_call_operand.vmem [shape: f32[1,8], index: 3, kind: input, shape index: {}]   ;;  %s6047_s4 = inlined_call_operand.vmem [shape: bf16[2,16,16,8], index: 4, kind: output, shape index: {}]  }
   0x1   :  { %s4453_s17 = smov 0  }
   0x2 LB: > { %s26_s18 = sadd.s32 1, %s4410_s16  ;;  %p3931_p0 = scmp.ge.s32.totalorder %s4414_s17, 1  ;;  %s4414_s17 = sphi %s4453_s17, %s14_s17   ;;  %s4410_s16 = sphi %s4451_s16, %s6053_s16   ;;  %s4406_s15 = sphi %s4449_s15, %s6052_s15  }
   0x3   : > { %p28_p1 = scmp.ge.s32.totalorder %s26_s18, 2  ;;  %p176_p2 = scmp.lt.s32.totalorder %s4414_s17, 3 }
   0x5   : > { %s6055_s18 = smov (%p28_p1, %s26_s18), 0  ;;  %p177_p3 = pnand %p3931_p0, %p176_p2 }
   0x6   : > { %p207_p4 = scmp.lt.s32.totalorder (!%p177_p3), %s4406_s15, 1  ;;  %s4416_s23 = smov (!%p177_p3), 4  }
   0x7   : > { %180 = sbr.rel (%p177_p3) target bundleno = 973 (0x3cd), region = 36  ;;  %s4417_s24 = smov (!%p177_p3), 8  }
   0x8   : > { %s4418_s25 = smov (!%p177_p3), 12   ;;  %s4419_s26 = smov (!%p177_p3), 16  }
   0x9   : > { %s4420_s27 = smov (!%p177_p3), 20   ;;  %s4421_s28 = smov (!%p177_p3), 24  }
   0xa   : > { %s4422_s29 = smov (!%p177_p3), 28   ;;  %s4423_s30 = smov (!%p177_p3), 32  }
   0xc   : > { %s6057_s15 = smov (!%p207_p4, %s4406_s15), 1  ;;  %vm341_vm0 = vsmask.f32 3328  ;;  %vm342_vm1 = vsmask.f32 7440  ;;  %vm953_vm3 = vcmask 1042432  }
   0xd   : > { %s4357_s19 = smul.u32 216, %s6057_s15  ;;  %vm4484_vm2 = vmor %vm341_vm0, %vm342_vm1  ;;  %vm954_vm4 = vcmask 1046532   ;;  %vm260_vm5 = vcmask 27648   ;;  %vm824_vm7 = vcmask 60448   ;;  %vm1164_vm8 = vcmask 93248  }
   0xe   : > { %vm4659_vm6 = vmor %vm953_vm3, %vm954_vm4  ;;  %vm1361_vm9 = vcmask 126048   ;;  %vm1922_vm10 = vcmask 158848   ;;  %vm2259_vm11 = vcmask 191648   ;;  %vm2456_vm12 = vcmask 224448  }
   0xf   : > { %s4473_s22 = scalar_lea.vmem %s6043_s0, %s4357_s19  ;;  %vm3568_vm13 = vcmask 1041408   ;;  %vm3017_vm14 = vcmask 257248   ;;  %vm3354_vm15 = vcmask 290048   ;;  %vm3519_vm0 = vcmask 293888   ;;  %s4329_s19 = sshll.u32 %s6057_s15, 7 }
  0x10   : > { %v296_v0 = vld [vmem:[%s4473_s22 + $0xc] sm:$0xf]  ;;  %v297_v1 = vld [vmem:[%s4473_s22 + $0x10] sm:$0xf]  ;;  %v293_v2 = vld [vmem:[%s4473_s22] sm:$0xf] }
  0x11   : > { %v369_v3 = vshrl.u32 %v296_v0, 16  ;;  %v372_v4 = vshll.u32 %v296_v0, 16  ;;  %v378_v5 = vshll.u32 %v297_v1, 16  ;;  %v382_v6 = vshrl.u32 %v297_v1, 16  ;;  %v294_v7 = vld [vmem:[%s4473_s22 + $0x4] sm:$0xf] }
  0x12   : > { %v345_v8 = vshrl.u32 %v293_v2, 16  ;;  %v348_v9 = vshll.u32 %v293_v2, 16  ;;  %v354_v10 = vshll.u32 %v294_v7, 16  ;;  %v358_v11 = vshrl.u32 %v294_v7, 16  ;;  %v298_v12 = vld [vmem:[%s4473_s22 + $0x14] sm:$0x1] }
  0x13   : > { %v371_v13 = vrot.slane %v369_v3, 4  ;;  %v374_v14 = vrot.slane %v372_v4, 5  ;;  %v380_v15 = vrot.slane %v378_v5, 5  ;;  %v384_v16 = vrot.slane %v382_v6, 4  ;;  %v295_v17 = vld [vmem:[%s4473_s22 + $0x8] sm:$0x1] }
  0x14   : > { %v347_v18 = vrot.slane %v345_v8, 4  ;;  %v350_v19 = vrot.slane %v348_v9, 5  ;;  %v360_v20 = vrot.slane %v358_v11, 4  ;;  %v303_v21 = vld [vmem:[%s4473_s22 + $0x28] sm:$0xf]  ;;  %v388_v24 = vshll.u32 %v298_v12, 16 }
  0x15   : > { %v375_v22 = vor.u32 %v374_v14, %v371_v13  ;;  %v385_v23 = vor.u32 %v384_v16, %v380_v15  ;;  %v356_v27 = vrot.slane %v354_v10, 5  ;;  %v426_v28 = vshll.u32 %v303_v21, 16  ;;  %v302_v30 = vld [vmem:[%s4473_s22 + $0x24] sm:$0xf]  ;;  %v299_v35 = vld [vmem:[%s4473_s22 + $0x18] sm:$0xf] }
  0x16   : > { %v351_v26 = vor.u32 %v350_v19, %v347_v18  ;;  %v430_v29 = vshrl.u32 %v303_v21, 16  ;;  %v364_v32 = vshll.u32 %v295_v17, 16  ;;  %v390_v38 = vrot.slane %v388_v24, 5  ;;  %v300_v40 = vld [vmem:[%s4473_s22 + $0x1c] sm:$0xf] }
  0x17   : > { %v376_v31 = vrot.slane %v375_v22, 4  ;;  %v361_v34 = vor.u32 %v360_v20, %v356_v27  ;;  %v386_v37 = vrot.slane %v385_v23, 4  ;;  %v417_v39 = vshrl.u32 %v302_v30, 16  ;;  %v304_v42 = vld [vmem:[%s4473_s22 + $0x2c] sm:$0x1] }
  0x18   : > { %v352_v33 = vrot.slane %v351_v26, 4  ;;  %v4497_v43 = vrot.slane %v426_v28, 5  ;;  %v432_v44 = vrot.slane %v430_v29, 4  ;;  %v420_v45 = vshll.u32 %v302_v30, 16  ;;  %v308_v50 = vld [vmem:[%s4473_s22 + $0x3c] sm:$0xf] }
  0x19   : > { %v381_v36 = vsel %vm4484_vm2, %v376_v31, %v380_v15  ;;  %v366_v46 = vrot.slane %v364_v32, 5  ;;  %v419_v47 = vrot.slane %v417_v39, 4  ;;  %v393_v48 = vshrl.u32 %v299_v35, 16  ;;  %v306_v58 = vld [vmem:[%s4473_s22 + $0x34] sm:$0xf] }
  0x1a   : > { %732 = vrot.lane.b32.xlu1 %v381_v36, %s4416_s23  ;;  %v357_v41 = vsel %vm4484_vm2, %v352_v33, %v356_v27  ;;  %v396_v49 = vshll.u32 %v299_v35, 16  ;;  %v362_v51 = vrot.slane %v361_v34, 4  ;;  %v422_v52 = vrot.slane %v420_v45, 5  ;;  %v301_v6 = vld [vmem:[%s4473_s22 + $0x20] sm:$0x1] }
  0x1b   : > { %728 = vrot.lane.b32.xlu0 %v357_v41, %s4416_s23  ;;  %v402_v53 = vshll.u32 %v300_v40, 16  ;;  %v406_v54 = vshrl.u32 %v300_v40, 16  ;;  %v436_v55 = vshll.u32 %v304_v42, 16  ;;  %v395_v56 = vrot.slane %v393_v48, 4  ;;  %v309_v15 = vld [vmem:[%s4473_s22 + $0x40] sm:$0xf] }
  0x1c   : > { %v398_v57 = vrot.slane %v396_v49, 5  ;;  %v433_v59 = vor.u32 %v432_v44, %v4497_v43  ;;  %v465_v61 = vshrl.u32 %v308_v50, 16  ;;  %v468_v62 = vshll.u32 %v308_v50, 16  ;;  %v307_v16 = vld [vmem:[%s4473_s22 + $0x38] sm:$0x1] }
  0x1d   : > { %v408_v60 = vrot.slane %v406_v54, 4  ;;  %v391_v63 = vsel %vm4484_vm2, %v386_v37, %v390_v38  ;;  %v423_v0 = vor.u32 %v422_v52, %v419_v47  ;;  %v404_v2 = vrot.slane %v402_v53, 5  ;;  %v312_v20 = vld [vmem:[%s4473_s22 + $0x4c] sm:$0xf]  ;;  %v305_v21 = vld [vmem:[%s4473_s22 + $0x30] sm:$0xf] }
  0x1e   : > { %v399_v1 = vor.u32 %v398_v57, %v395_v56  ;;  %v367_v3 = vsel %vm4484_vm2, %v362_v51, %v366_v46  ;;  %v450_v4 = vshll.u32 %v306_v58, 16  ;;  %v454_v5 = vshrl.u32 %v306_v58, 16  ;;  %v311_v24 = vld [vmem:[%s4473_s22 + $0x48] sm:$0xf]  ;;  %v317_v47 = vld [vmem:[%s4473_s22 + $0x60] sm:$0xf] }
  0x1f   : > { %v438_v7 = vrot.slane %v436_v55, 5  ;;  %v434_v9 = vrot.slane %v433_v59, 4  ;;  %v467_v10 = vrot.slane %v465_v61, 4  ;;  %v470_v11 = vrot.slane %v468_v62, 5  ;;  %v313_v49 = vld [vmem:[%s4473_s22 + $0x50] sm:$0x1] }
  0x20   : > { %v400_v8 = vrot.slane %v399_v1, 4  ;;  %v409_v12 = vor.u32 %v408_v60, %v404_v2  ;;  %v424_v13 = vrot.slane %v423_v0, 4  ;;  %v412_v17 = vshll.u32 %v301_v6, 16  ;;  %v315_v53 = vld [vmem:[%s4473_s22 + $0x58] sm:$0xf] }
  0x21   : > { %v4515_v18 = vrot.slane %v450_v4, 5  ;;  %v456_v19 = vrot.slane %v454_v5, 4  ;;  %v439_v26 = vsel %vm4484_vm2, %v434_v9, %v438_v7  ;;  %v471_v27 = vor.u32 %v470_v11, %v467_v10  ;;  %v310_v58 = vld [vmem:[%s4473_s22 + $0x44] sm:$0x1]  ;;  %v321_v11 = vld [vmem:[%s4473_s22 + $0x70] sm:$0xf] }
  0x22   : > { %734 = vrot.lane.b32.xlu1 %v391_v63, %s4416_s23  ;;  %v405_v14 = vsel %vm4484_vm2, %v400_v8, %v404_v2  ;;  %v410_v22 = vrot.slane %v409_v12, 4  ;;  %v414_v23 = vrot.slane %v412_v17, 5  ;;  %v474_v28 = vshll.u32 %v309_v15, 16  ;;  %v314_v2 = vld [vmem:[%s4473_s22 + $0x54] sm:$0xf] }
  0x23   : > { %730 = vrot.lane.b32.xlu0 %v367_v3, %s4416_s23  ;;  %736 = vrot.lane.b32.xlu2 %v405_v14, %s4416_s23  ;;  %v460_v29 = vshll.u32 %v307_v16, 16  ;;  %v429_v30 = vsel %vm4484_vm2, %v424_v13, %v4497_v43  ;;  %v498_v31 = vshll.u32 %v312_v20, 16  ;;  %v502_v32 = vshrl.u32 %v312_v20, 16  ;;  %v318_v6 = vld [vmem:[%s4473_s22 + $0x64] sm:$0xf] }
  0x24   : > { %v441_v33 = vshrl.u32 %v305_v21, 16  ;;  %v457_v34 = vor.u32 %v456_v19, %v4515_v18  ;;  %v489_v35 = vshrl.u32 %v311_v24, 16  ;;  %v492_v36 = vshll.u32 %v311_v24, 16  ;;  %v320_v20 = vld [vmem:[%s4473_s22 + $0x6c] sm:$0xf] }
  0x25   : > { %v444_v37 = vshll.u32 %v305_v21, 16  ;;  %v478_v38 = vshrl.u32 %v309_v15, 16  ;;  %v415_v39 = vsel %vm4484_vm2, %v410_v22, %v414_v23  ;;  %v476_v41 = vrot.slane %v474_v28, 5  ;;  %v316_v15 = vld [vmem:[%s4473_s22 + $0x5c] sm:$0x1] }
  0x26   : > { %v443_v40 = vrot.slane %v441_v33, 4  ;;  %v472_v43 = vrot.slane %v471_v27, 4  ;;  %v462_v44 = vrot.slane %v460_v29, 5  ;;  %v4530_v45 = vrot.slane %v498_v31, 5 }
  0x27   : > { %v446_v42 = vrot.slane %v444_v37, 5  ;;  %v504_v46 = vrot.slane %v502_v32, 4  ;;  %v458_v48 = vrot.slane %v457_v34, 4  ;;  %v491_v50 = vrot.slane %v489_v35, 4 }
  0x28   : > { %v494_v51 = vrot.slane %v492_v36, 5  ;;  %v480_v54 = vrot.slane %v478_v38, 4  ;;  %v537_v56 = vshrl.u32 %v317_v47, 16  ;;  %v540_v57 = vshll.u32 %v317_v47, 16  ;;  %v324_v47 = vld [vmem:[%s4473_s22 + $0x7c] sm:$0xf] }
  0x29   : > { %v447_v52 = vor.u32 %v446_v42, %v443_v40  ;;  %v477_v59 = vsel %vm4484_vm2, %v472_v43, %v476_v41  ;;  %v505_v60 = vor.u32 %v504_v46, %v4530_v45  ;;  %v508_v61 = vshll.u32 %v313_v49, 16  ;;  %v326_v42 = vld [vmem:[%s4473_s22 + $0x84] sm:$0xf]  ;;  %v319_v49 = vld [vmem:[%s4473_s22 + $0x68] sm:$0x1] }
  0x2a   : > { %742 = vrot.lane.b32.xlu1 %v439_v26, %s4416_s23  ;;  %v463_v62 = vsel %vm4484_vm2, %v458_v48, %v462_v44  ;;  %v495_v63 = vor.u32 %v494_v51, %v491_v50  ;;  %v522_v0 = vshll.u32 %v315_v53, 16  ;;  %v526_v1 = vshrl.u32 %v315_v53, 16 }
  0x2b   : > { %740 = vrot.lane.b32.xlu0 %v429_v30, %s4416_s23  ;;  %738 = vrot.lane.b32.xlu2 %v415_v39, %s4416_s23  ;;  %v448_v55 = vrot.slane %v447_v52, 4  ;;  %v481_v4 = vor.u32 %v480_v54, %v476_v41  ;;  %v484_v5 = vshll.u32 %v310_v58, 16  ;;  %v539_v7 = vrot.slane %v537_v56, 4  ;;  %v322_v41 = vld [vmem:[%s4473_s22 + $0x74] sm:$0x1] }
  0x2c   : > { %v542_v8 = vrot.slane %v540_v57, 5  ;;  %v506_v9 = vrot.slane %v505_v60, 4  ;;  %v510_v10 = vrot.slane %v508_v61, 5  ;;  %v513_v12 = vshrl.u32 %v314_v2, 16  ;;  %v323_v54 = vld [vmem:[%s4473_s22 + $0x78] sm:$0xf] }
  0x2d   : > { %v453_v3 = vsel %vm4484_vm2, %v448_v55, %v4515_v18  ;;  %v516_v13 = vshll.u32 %v314_v2, 16  ;;  %v496_v14 = vrot.slane %v495_v63, 4  ;;  %v4552_v16 = vrot.slane %v522_v0, 5 }
  0x2e   : > { %v528_v17 = vrot.slane %v526_v1, 4  ;;  %v482_v18 = vrot.slane %v481_v4, 4  ;;  %v486_v19 = vrot.slane %v484_v5, 5  ;;  %v515_v21 = vrot.slane %v513_v12, 4  ;;  %v327_v4 = vld [vmem:[%s4473_s22 + $0x88] sm:$0xf] }
  0x2f   : > { %v518_v22 = vrot.slane %v516_v13, 5  ;;  %v543_v23 = vor.u32 %v542_v8, %v539_v7  ;;  %v546_v24 = vshll.u32 %v318_v6, 16  ;;  %v570_v26 = vshll.u32 %v321_v11, 16 }
  0x30   : > { %v574_v27 = vshrl.u32 %v321_v11, 16  ;;  %v511_v28 = vsel %vm4484_vm2, %v506_v9, %v510_v10  ;;  %v532_v29 = vshll.u32 %v316_v15, 16  ;;  %v501_v30 = vsel %vm4484_vm2, %v496_v14, %v4530_v45  ;;  %v330_v9 = vld [vmem:[%s4473_s22 + $0x94] sm:$0xf]  ;;  %v325_v11 = vld [vmem:[%s4473_s22 + $0x80] sm:$0x1] }
  0x31   : > { %v529_v31 = vor.u32 %v528_v17, %v4552_v16  ;;  %v561_v32 = vshrl.u32 %v320_v20, 16  ;;  %v564_v33 = vshll.u32 %v320_v20, 16  ;;  %v550_v34 = vshrl.u32 %v318_v6, 16  ;;  %v329_v14 = vld [vmem:[%s4473_s22 + $0x90] sm:$0xf] }
  0x32   : > { %748 = vrot.lane.b32.xlu1 %v477_v59, %s4416_s23  ;;  %v487_v35 = vsel %vm4484_vm2, %v482_v18, %v486_v19  ;;  %v519_v36 = vor.u32 %v518_v22, %v515_v21  ;;  %v544_v37 = vrot.slane %v543_v23, 4  ;;  %v548_v38 = vrot.slane %v546_v24, 5 }
  0x33   : > { %746 = vrot.lane.b32.xlu0 %v463_v62, %s4416_s23  ;;  %744 = vrot.lane.b32.xlu2 %v453_v3, %s4416_s23  ;;  %v4564_v39 = vrot.slane %v570_v26, 5  ;;  %v576_v40 = vrot.slane %v574_v27, 4  ;;  %v530_v43 = vrot.slane %v529_v31, 4  ;;  %v534_v44 = vrot.slane %v532_v29, 5 }
  0x34   : > { %v563_v45 = vrot.slane %v561_v32, 4  ;;  %v566_v46 = vrot.slane %v564_v33, 5  ;;  %v520_v48 = vrot.slane %v519_v36, 4  ;;  %v552_v50 = vrot.slane %v550_v34, 4 }
  0x35   : > { %v549_v51 = vsel %vm4484_vm2, %v544_v37, %v548_v38  ;;  %v577_v52 = vor.u32 %v576_v40, %v4564_v39  ;;  %v580_v53 = vshll.u32 %v322_v41, 16  ;;  %v609_v55 = vshrl.u32 %v326_v42, 16  ;;  %v331_v37 = vld [vmem:[%s4473_s22 + $0x98] sm:$0x1]  ;;  %v335_v40 = vld [vmem:[%s4473_s22 + $0xa8] sm:$0xf] }
  0x36   : > { %v612_v56 = vshll.u32 %v326_v42, 16  ;;  %v594_v57 = vshll.u32 %v324_v47, 16  ;;  %v598_v58 = vshrl.u32 %v324_v47, 16  ;;  %v535_v59 = vsel %vm4484_vm2, %v530_v43, %v534_v44  ;;  %v333_v42 = vld [vmem:[%s4473_s22 + $0xa0] sm:$0xf] }
  0x37   : > { %v567_v60 = vor.u32 %v566_v46, %v563_v45  ;;  %v556_v61 = vshll.u32 %v319_v49, 16  ;;  %v525_v62 = vsel %vm4484_vm2, %v520_v48, %v4552_v16  ;;  %v553_v63 = vor.u32 %v552_v50, %v548_v38  ;;  %v328_v43 = vld [vmem:[%s4473_s22 + $0x8c] sm:$0x1]  ;;  %v332_v47 = vld [vmem:[%s4473_s22 + $0x9c] sm:$0xf] }
  0x38   : > { %v585_v0 = vshrl.u32 %v323_v54, 16  ;;  %v588_v1 = vshll.u32 %v323_v54, 16  ;;  %v578_v2 = vrot.slane %v577_v52, 4  ;;  %v582_v3 = vrot.slane %v580_v53, 5 }
  0x39   : > { %v611_v5 = vrot.slane %v609_v55, 4  ;;  %v614_v6 = vrot.slane %v612_v56, 5  ;;  %v4584_v7 = vrot.slane %v594_v57, 5  ;;  %v600_v8 = vrot.slane %v598_v58, 4 }
  0x3a   : > { %754 = vrot.lane.b32.xlu1 %v511_v28, %s4416_s23  ;;  %v568_v10 = vrot.slane %v567_v60, 4  ;;  %v554_v12 = vrot.slane %v553_v63, 4  ;;  %v558_v13 = vrot.slane %v556_v61, 5  ;;  %v587_v15 = vrot.slane %v585_v0, 4 }
  0x3b   : > { %752 = vrot.lane.b32.xlu0 %v501_v30, %s4416_s23  ;;  %750 = vrot.lane.b32.xlu2 %v487_v35, %s4416_s23  ;;  %v590_v16 = vrot.slane %v588_v1, 5  ;;  %v618_v17 = vshll.u32 %v327_v4, 16  ;;  %v642_v18 = vshll.u32 %v330_v9, 16  ;;  %v646_v19 = vshrl.u32 %v330_v9, 16  ;;  %v334_v1 = vld [vmem:[%s4473_s22 + $0xa4] sm:$0x1] }
  0x3c   : > { %v583_v20 = vsel %vm4484_vm2, %v578_v2, %v582_v3  ;;  %v615_v21 = vor.u32 %v614_v6, %v611_v5  ;;  %v601_v22 = vor.u32 %v600_v8, %v4584_v7  ;;  %v604_v23 = vshll.u32 %v325_v11, 16  ;;  %v339_v5 = vld [vmem:[%s4473_s22 + $0xb8] sm:$0xf]  ;;  %v338_v8 = vld [vmem:[%s4473_s22 + $0xb4] sm:$0xf] }
  0x3d   : > { %v573_v24 = vsel %vm4484_vm2, %v568_v10, %v4564_v39  ;;  %v633_v26 = vshrl.u32 %v329_v14, 16  ;;  %v636_v27 = vshll.u32 %v329_v14, 16  ;;  %v622_v28 = vshrl.u32 %v327_v4, 16 }
  0x3e   : > { %v559_v29 = vsel %vm4484_vm2, %v554_v12, %v558_v13  ;;  %v591_v30 = vor.u32 %v590_v16, %v587_v15  ;;  %v4599_v31 = vrot.slane %v642_v18, 5  ;;  %v648_v32 = vrot.slane %v646_v19, 4 }
  0x3f   : > { %v616_v33 = vrot.slane %v615_v21, 4  ;;  %v620_v34 = vrot.slane %v618_v17, 5  ;;  %v602_v35 = vrot.slane %v601_v22, 4  ;;  %v606_v36 = vrot.slane %v604_v23, 5 }
  0x40   : > { %v635_v38 = vrot.slane %v633_v26, 4  ;;  %v638_v39 = vrot.slane %v636_v27, 5  ;;  %v592_v41 = vrot.slane %v591_v30, 4  ;;  %v624_v44 = vrot.slane %v622_v28, 4 }
  0x41   : > { %v649_v45 = vor.u32 %v648_v32, %v4599_v31  ;;  %v652_v46 = vshll.u32 %v331_v37, 16  ;;  %v621_v48 = vsel %vm4484_vm2, %v616_v33, %v620_v34  ;;  %v607_v49 = vsel %vm4484_vm2, %v602_v35, %v606_v36  ;;  %v337_v36 = vld [vmem:[%s4473_s22 + $0xb0] sm:$0x1] }
  0x42   : > { %760 = vrot.lane.b32.xlu1 %v549_v51, %s4416_s23  ;;  %v681_v50 = vshrl.u32 %v335_v40, 16  ;;  %v684_v51 = vshll.u32 %v335_v40, 16  ;;  %v639_v52 = vor.u32 %v638_v39, %v635_v38  ;;  %v666_v53 = vshll.u32 %v333_v42, 16 }
  0x43   : > { %758 = vrot.lane.b32.xlu0 %v535_v59, %s4416_s23  ;;  %756 = vrot.lane.b32.xlu2 %v525_v62, %s4416_s23  ;;  %v670_v54 = vshrl.u32 %v333_v42, 16  ;;  %v628_v55 = vshll.u32 %v328_v43, 16  ;;  %v597_v56 = vsel %vm4484_vm2, %v592_v41, %v4584_v7  ;;  %v625_v57 = vor.u32 %v624_v44, %v620_v34  ;;  %v336_v62 = vld [vmem:[%s4473_s22 + $0xac] sm:$0xf] }
  0x44   : > { %v657_v58 = vshrl.u32 %v332_v47, 16  ;;  %v660_v59 = vshll.u32 %v332_v47, 16  ;;  %v650_v60 = vrot.slane %v649_v45, 4  ;;  %v654_v61 = vrot.slane %v652_v46, 5 }
  0x45   : > { %v683_v63 = vrot.slane %v681_v50, 4  ;;  %v686_v0 = vrot.slane %v684_v51, 5  ;;  %v640_v2 = vrot.slane %v639_v52, 4  ;;  %v668_v3 = vrot.slane %v666_v53, 5  ;;  %v860_v51 = vld [vmem:[%s4473_s22 + $0xc] sm:$0xe] }
  0x46   : > { %v672_v4 = vrot.slane %v670_v54, 4  ;;  %v626_v6 = vrot.slane %v625_v57, 4  ;;  %v630_v7 = vrot.slane %v628_v55, 5  ;;  %v659_v9 = vrot.slane %v657_v58, 4  ;;  %v861_v53 = vld [vmem:[%s4473_s22 + $0x10] sm:$0xf] }
  0x47   : > { %v662_v10 = vrot.slane %v660_v59, 5  ;;  %v655_v11 = vsel %vm4484_vm2, %v650_v60, %v654_v61  ;;  %v690_v12 = vshll.u32 %v336_v62, 16  ;;  %v687_v13 = vor.u32 %v686_v0, %v683_v63  ;;  %v859_v54 = vld [vmem:[%s4473_s22 + $0x8] sm:$0x1]  ;;  %v857_v61 = vld [vmem:[%s4473_s22] sm:$0xe] }
  0x48   : > { %v676_v14 = vshll.u32 %v334_v1, 16  ;;  %v714_v15 = vshll.u32 %v339_v5, 16  ;;  %v718_v16 = vshrl.u32 %v339_v5, 16  ;;  %v645_v17 = vsel %vm4484_vm2, %v640_v2, %v4599_v31  ;;  %v340_v31 = vld [vmem:[%s4473_s22 + $0xbc] sm:$0x1] }
  0x49   : > { %v673_v18 = vor.u32 %v672_v4, %v668_v3  ;;  %v705_v19 = vshrl.u32 %v338_v8, 16  ;;  %v694_v21 = vshrl.u32 %v336_v62, 16  ;;  %v631_v22 = vsel %vm4484_vm2, %v626_v6, %v630_v7  ;;  %v864_v63 = vld [vmem:[%s4473_s22 + $0x1c] sm:$0xf]  ;;  %v232_v0 = vld [vmem:[%s4473_s22 + $0x18] sm:$0xf] }
  0x4a   : > { %766 = vrot.lane.b32.xlu1 %v583_v20, %s4416_s23  ;;  %v708_v20 = vshll.u32 %v338_v8, 16  ;;  %v663_v23 = vor.u32 %v662_v10, %v659_v9  ;;  %v692_v26 = vrot.slane %v690_v12, 5  ;;  %v716_v27 = vrot.slane %v714_v15, 5  ;;  %265 = vst.msk [vmem:[#allocation2 + $0x10] sm:$0xf] %vm260_vm5, %v232_v0 }
  0x4b   : > { %764 = vrot.lane.b32.xlu0 %v573_v24, %s4416_s23  ;;  %762 = vrot.lane.b32.xlu2 %v559_v29, %s4416_s23  ;;  %v688_v24 = vrot.slane %v687_v13, 4  ;;  %v720_v28 = vrot.slane %v718_v16, 4  ;;  %v674_v29 = vrot.slane %v673_v18, 4  ;;  %v678_v30 = vrot.slane %v676_v14, 5  ;;  %v230_v2 = vld [vmem:[%s4473_s22 + $0xc] sm:$0xf] }
  0x4c   : > { %v707_v32 = vrot.slane %v705_v19, 4  ;;  %v710_v33 = vrot.slane %v708_v20, 5  ;;  %v664_v34 = vrot.slane %v663_v23, 4  ;;  %v696_v35 = vrot.slane %v694_v21, 4  ;;  %263 = vst.msk [vmem:[#allocation2 + $0x8] sm:$0xf] %vm260_vm5, %v230_v2 }
  0x4d   : > { %v693_v37 = vsel %vm4484_vm2, %v688_v24, %v692_v26  ;;  %v721_v38 = vor.u32 %v720_v28, %v716_v27  ;;  %v724_v39 = vshll.u32 %v340_v31, 16  ;;  %v679_v40 = vsel %vm4484_vm2, %v674_v29, %v678_v30  ;;  %v865_v6 = vld [vmem:[%s4473_s22 + $0x20] sm:$0x1]  ;;  %v863_v9 = vld [vmem:[%s4473_s22 + $0x18] sm:$0xe] }
  0x4e   : > { %v711_v41 = vor.u32 %v710_v33, %v707_v32  ;;  %v669_v42 = vsel %vm4484_vm2, %v664_v34, %v668_v3  ;;  %v697_v43 = vor.u32 %v696_v35, %v692_v26  ;;  %v700_v44 = vshll.u32 %v337_v36, 16  ;;  %v228_v3 = vld [vmem:[%s4473_s22] sm:$0xf]  ;;  %v862_v12 = vld [vmem:[%s4473_s22 + $0x14] sm:$0x1] }
  0x4f   : > { %v722_v45 = vrot.slane %v721_v38, 4  ;;  %v726_v46 = vrot.slane %v724_v39, 5  ;;  %v3936_v58 = vrot.slane %v860_v51, 9  ;;  %v965_v59 = vrot.slane %v861_v53, 5  ;;  %261 = vst.msk [vmem:[#allocation2] sm:$0xf] %vm260_vm5, %v228_v3 }
  0x50   : > { %v712_v47 = vrot.slane %v711_v41, 4  ;;  %v702_v50 = vrot.slane %v700_v44, 5  ;;  %v961_v60 = vrot.slane %v859_v54, 5  ;;  %v3935_v4 = vrot.slane %v857_v61, 9  ;;  %v867_v15 = vld [vmem:[%s4473_s22 + $0x28] sm:$0xf] }
  0x51   : > { %v727_v52 = vsel %vm4484_vm2, %v722_v45, %v726_v46  ;;  %v966_v5 = vsel %vm4659_vm6, %v3936_v58, %v965_v59  ;;  %v972_v7 = vrot.slane %v864_v63, 5  ;;  %v3937_v14 = vrot.slane %v863_v9, 9  ;;  %v233_v16 = vld [vmem:[%s4473_s22 + $0x1c] sm:$0xf]  ;;  %v229_v18 = vld [vmem:[%s4473_s22 + $0x4] sm:$0xf] }
  0x52   : > { %772 = vrot.lane.b32.xlu1 %v621_v48, %s4416_s23  ;;  %v858_v48 = vld [vmem:[%s4473_s22 + $0x4] sm:$0xf]  ;;  %266 = vst.msk [vmem:[#allocation2 + $0x14] sm:$0xf] %vm260_vm5, %v233_v16  ;;  %v967_v19 = vrot.slane %v965_v59, 4  ;;  %v968_v20 = vrot.slane %v862_v12, 5 }
  0x53   : > { %770 = vrot.lane.b32.xlu0 %v607_v49, %s4416_s23  ;;  %768 = vrot.lane.b32.xlu2 %v597_v56, %s4416_s23  ;;  %v698_v49 = vrot.slane %v697_v43, 4  ;;  %v958_v55 = vrot.slane %v858_v48, 5  ;;  %v717_v56 = vsel %vm4484_vm2, %v712_v47, %v716_v27  ;;  %v974_v13 = vrot.slane %v972_v7, 4  ;;  %262 = vst.msk [vmem:[#allocation2 + $0x4] sm:$0xf] %vm260_vm5, %v229_v18 }
  0x54   : > { %v870_v23 = vld [vmem:[%s4473_s22 + $0x34] sm:$0xf]  ;;  %v979_v24 = vrot.slane %v867_v15, 5  ;;  %v973_v26 = vsel %vm4659_vm6, %v3937_v14, %v972_v7  ;;  %v868_v27 = vld [vmem:[%s4473_s22 + $0x2c] sm:$0x1]  ;;  %v969_v28 = vsel %vm4659_vm6, %v967_v19, %v968_v20  ;;  %vm3797_vm1 = vcmask 60416  }
  0x55   : > { %v703_v57 = vsel %vm4484_vm2, %v698_v49, %v702_v50  ;;  %v960_v62 = vrot.slane %v958_v55, 4  ;;  %v959_v10 = vsel %vm4659_vm6, %v3935_v4, %v958_v55  ;;  %v986_v30 = vrot.slane %v870_v23, 5  ;;  %v866_v31 = vld [vmem:[%s4473_s22 + $0x24] sm:$0xe]  ;;  %v873_v34 = vld [vmem:[%s4473_s22 + $0x40] sm:$0xf] }
  0x56   : > { %v981_v32 = vrot.slane %v979_v24, 4  ;;  %v982_v33 = vrot.slane %v868_v27, 5  ;;  %v236_v35 = vld [vmem:[%s4473_s22 + $0x30] sm:$0xf]  ;;  %v235_v36 = vld [vmem:[%s4473_s22 + $0x28] sm:$0xf] }
  0x57   : > { %v962_v8 = vsel %vm4659_vm6, %v960_v62, %v961_v60  ;;  %269 = vst.msk [vmem:[#allocation2 + $0x20] sm:$0xf] %vm260_vm5, %v236_v35  ;;  %v3938_v38 = vrot.slane %v866_v31, 9  ;;  %v993_v41 = vrot.slane %v873_v34, 5  ;;  %v874_v43 = vld [vmem:[%s4473_s22 + $0x44] sm:$0x1] }
  0x58   : > { %268 = vst.msk [vmem:[#allocation2 + $0x1c] sm:$0xf] %vm260_vm5, %v235_v36  ;;  %v872_v44 = vld [vmem:[%s4473_s22 + $0x3c] sm:$0xe]  ;;  %v871_v46 = vld [vmem:[%s4473_s22 + $0x38] sm:$0x1] }
  0x59   : > { %v980_v45 = vsel %vm4659_vm6, %v3938_v38, %v979_v24  ;;  %v995_v47 = vrot.slane %v993_v41, 4  ;;  %v996_v48 = vrot.slane %v874_v43, 5  ;;  %v3940_v49 = vrot.slane %v872_v44, 9  ;;  %v239_v50 = vld [vmem:[%s4473_s22 + $0x40] sm:$0xf] }
  0x5a   : > { %778 = vrot.lane.b32.xlu1 %v655_v11, %s4416_s23  ;;  %v975_v11 = vrot.slane %v865_v6, 5  ;;  %272 = vst.msk [vmem:[#allocation2 + $0x2c] sm:$0xf] %vm260_vm5, %v239_v50  ;;  %v238_v51 = vld [vmem:[%s4473_s22 + $0x3c] sm:$0xf]  ;;  %v988_v54 = vrot.slane %v986_v30, 4 }
  0x5b   : > { %776 = vrot.lane.b32.xlu0 %v645_v17, %s4416_s23  ;;  %774 = vrot.lane.b32.xlu2 %v631_v22, %s4416_s23  ;;  %v231_v17 = vld [vmem:[%s4473_s22 + $0x10] sm:$0xf]  ;;  %v876_v53 = vld [vmem:[%s4473_s22 + $0x4c] sm:$0xf]  ;;  %v989_v55 = vrot.slane %v871_v46, 5  ;;  %v994_v58 = vsel %vm4659_vm6, %v3940_v49, %v993_v41 }
  0x5c   : > { %264 = vst.msk [vmem:[#allocation2 + $0xc] sm:$0xf] %vm260_vm5, %v231_v17  ;;  %v976_v21 = vsel %vm4659_vm6, %v974_v13, %v975_v11  ;;  %v869_v22 = vld [vmem:[%s4473_s22 + $0x30] sm:$0xe]  ;;  %v878_v59 = vld [vmem:[%s4473_s22 + $0x54] sm:$0xe] }
  0x5d   : > { %v3939_v29 = vrot.slane %v869_v22, 9  ;;  %271 = vst.msk [vmem:[#allocation2 + $0x28] sm:$0xf] %vm260_vm5, %v238_v51  ;;  %v879_v60 = vld [vmem:[%s4473_s22 + $0x58] sm:$0xf]  ;;  %v1000_v61 = vrot.slane %v876_v53, 5  ;;  %v990_v63 = vsel %vm4659_vm6, %v988_v54, %v989_v55 }
  0x5e   : > { %v877_v62 = vld [vmem:[%s4473_s22 + $0x50] sm:$0x1]  ;;  %v875_v0 = vld [vmem:[%s4473_s22 + $0x48] sm:$0xe]  ;;  %v3942_v2 = vrot.slane %v878_v59, 9  ;;  %v1007_v3 = vrot.slane %v879_v60, 5 }
  0x5f   : > { %v242_v4 = vld [vmem:[%s4473_s22 + $0x54] sm:$0xf]  ;;  %v1002_v6 = vrot.slane %v1000_v61, 4  ;;  %v1003_v7 = vrot.slane %v877_v62, 5  ;;  %v241_v11 = vld [vmem:[%s4473_s22 + $0x4c] sm:$0xf] }
  0x60   : > { %275 = vst.msk [vmem:[#allocation2 + $0x38] sm:$0xf] %vm260_vm5, %v242_v4  ;;  %v240_v13 = vld [vmem:[%s4473_s22 + $0x48] sm:$0xf]  ;;  %v1008_v14 = vsel %vm4659_vm6, %v3942_v2, %v1007_v3  ;;  %v881_v18 = vld [vmem:[%s4473_s22 + $0x60] sm:$0xe] }
  0x61   : > { %v1004_v16 = vsel %vm4659_vm6, %v1002_v6, %v1003_v7  ;;  %v883_v17 = vld [vmem:[%s4473_s22 + $0x68] sm:$0x1]  ;;  %274 = vst.msk [vmem:[#allocation2 + $0x34] sm:$0xf] %vm260_vm5, %v241_v11  ;;  %v880_v20 = vld [vmem:[%s4473_s22 + $0x5c] sm:$0x1] }
  0x62   : > { %784 = vrot.lane.b32.xlu1 %v693_v37, %s4416_s23  ;;  %v234_v37 = vld [vmem:[%s4473_s22 + $0x24] sm:$0xf]  ;;  %273 = vst.msk [vmem:[#allocation2 + $0x30] sm:$0xf] %vm260_vm5, %v240_v13  ;;  %v1017_v22 = vrot.slane %v883_v17, 5 }
  0x63   : > { %782 = vrot.lane.b32.xlu0 %v679_v40, %s4416_s23  ;;  %780 = vrot.lane.b32.xlu2 %v669_v42, %s4416_s23  ;;  %267 = vst.msk [vmem:[#allocation2 + $0x18] sm:$0xf] %vm260_vm5, %v234_v37  ;;  %v987_v40 = vsel %vm4659_vm6, %v3939_v29, %v986_v30  ;;  %v983_v42 = vsel %vm4659_vm6, %v981_v32, %v982_v33  ;;  %v245_v23 = vld [vmem:[%s4473_s22 + $0x64] sm:$0xf]  ;;  %v885_v27 = vld [vmem:[%s4473_s22 + $0x70] sm:$0xf] }
  0x64   : > { %278 = vst.msk [vmem:[#allocation2 + $0x44] sm:$0xf] %vm260_vm5, %v245_v23  ;;  %v1009_v29 = vrot.slane %v1007_v3, 4  ;;  %v1010_v30 = vrot.slane %v880_v20, 5  ;;  %v244_v31 = vld [vmem:[%s4473_s22 + $0x60] sm:$0xf] }
  0x65   : > { %v243_v33 = vld [vmem:[%s4473_s22 + $0x58] sm:$0xf]  ;;  %v888_v37 = vld [vmem:[%s4473_s22 + $0x7c] sm:$0xf]  ;;  %v1021_v38 = vrot.slane %v885_v27, 5 }
  0x66   : > { %v887_v35 = vld [vmem:[%s4473_s22 + $0x78] sm:$0xe]  ;;  %277 = vst.msk [vmem:[#allocation2 + $0x40] sm:$0xf] %vm260_vm5, %v244_v31  ;;  %v884_v41 = vld [vmem:[%s4473_s22 + $0x6c] sm:$0xe] }
  0x67   : > { %276 = vst.msk [vmem:[#allocation2 + $0x3c] sm:$0xf] %vm260_vm5, %v243_v33  ;;  %v1028_v43 = vrot.slane %v888_v37, 5  ;;  %v248_v44 = vld [vmem:[%s4473_s22 + $0x78] sm:$0xf]  ;;  %v1023_v46 = vrot.slane %v1021_v38, 4 }
  0x68   : > { %281 = vst.msk [vmem:[#allocation2 + $0x50] sm:$0xf] %vm260_vm5, %v248_v44  ;;  %v3944_v50 = vrot.slane %v884_v41, 9  ;;  %v247_v51 = vld [vmem:[%s4473_s22 + $0x70] sm:$0xf] }
  0x69   : > { %v246_v53 = vld [vmem:[%s4473_s22 + $0x6c] sm:$0xf]  ;;  %280 = vst.msk [vmem:[#allocation2 + $0x4c] sm:$0xf] %vm260_vm5, %v247_v51  ;;  %v889_v60 = vld [vmem:[%s4473_s22 + $0x80] sm:$0x1] }
  0x6a   : > { %790 = vrot.lane.b32.xlu1 %v727_v52, %s4416_s23  ;;  %v237_v52 = vld [vmem:[%s4473_s22 + $0x34] sm:$0xf]  ;;  %v1022_v59 = vsel %vm4659_vm6, %v3944_v50, %v1021_v38  ;;  %279 = vst.msk [vmem:[#allocation2 + $0x48] sm:$0xf] %vm260_vm5, %v246_v53  ;;  %v1031_v6 = vrot.slane %v889_v60, 5 }
  0x6b   : > { %788 = vrot.lane.b32.xlu0 %v717_v56, %s4416_s23  ;;  %786 = vrot.lane.b32.xlu2 %v703_v57, %s4416_s23  ;;  %270 = vst.msk [vmem:[#allocation2 + $0x24] sm:$0xf] %vm260_vm5, %v237_v52  ;;  %v997_v57 = vsel %vm4659_vm6, %v995_v47, %v996_v48  ;;  %v891_v48 = vld [vmem:[%s4473_s22 + $0x88] sm:$0xf]  ;;  %v894_v3 = vld [vmem:[%s4473_s22 + $0x94] sm:$0xf] }
  0x6c   : > { %v1035_v55 = vrot.slane %v891_v48, 5  ;;  %v250_v7 = vld [vmem:[%s4473_s22 + $0x84] sm:$0xf]  ;;  %v896_v11 = vld [vmem:[%s4473_s22 + $0x9c] sm:$0xe] }
  0x6d   : > { %v897_v13 = vld [vmem:[%s4473_s22 + $0xa0] sm:$0xf]  ;;  %283 = vst.msk [vmem:[#allocation2 + $0x58] sm:$0xf] %vm260_vm5, %v250_v7  ;;  %v893_v17 = vld [vmem:[%s4473_s22 + $0x90] sm:$0xe] }
  0x6e   : > { %v254_v20 = vld [vmem:[%s4473_s22 + $0x9c] sm:$0xf]  ;;  %v3947_v27 = vrot.slane %v893_v17, 9  ;;  %v898_v37 = vld [vmem:[%s4473_s22 + $0xa4] sm:$0x1] }
  0x6f   : > { %287 = vst.msk [vmem:[#allocation2 + $0x68] sm:$0xf] %vm260_vm5, %v254_v20  ;;  %v904_v53 = vld [vmem:[%s4473_s22 + $0xbc] sm:$0x1] }
  0x70   : > { %v3954_v7 = vld [vmem:[%s4473_s22 + $0x1c] sm:$0xf] }
  0x71   : > { %v3959_v20 = vld [vmem:[%s4473_s22 + $0x3c] sm:$0xf] }
  0x72   : > { %1072 = vrot.lane.b32.xlu1 %v966_v5, %s4417_s24 }
  0x73   : > { %1070 = vrot.lane.b32.xlu0 %v962_v8, %s4417_s24  ;;  %1068 = vrot.lane.b32.xlu2 %v959_v10, %s4417_s24  ;;  %v882_v8 = vld [vmem:[%s4473_s22 + $0x64] sm:$0xf]  ;;  %v3941_v10 = vrot.slane %v875_v0, 9 }
  0x74   : > { %v1014_v15 = vrot.slane %v882_v8, 5 }
  0x75   : > { %v1001_v19 = vsel %vm4659_vm6, %v3941_v10, %v1000_v61  ;;  %v1037_v61 = vrot.slane %v1035_v55, 4 }
  0x7a   : > { %1078 = vrot.lane.b32.xlu1 %v976_v21, %s4417_s24  ;;  %v1016_v21 = vrot.slane %v1014_v15, 4 }
  0x7b   : > { %1076 = vrot.lane.b32.xlu0 %v973_v26, %s4417_s24  ;;  %1074 = vrot.lane.b32.xlu2 %v969_v28, %s4417_s24  ;;  %v3943_v26 = vrot.slane %v881_v18, 9  ;;  %v3948_v18 = vrot.slane %v896_v11, 9 }
  0x7c   : > { %v1018_v34 = vsel %vm4659_vm6, %v1016_v21, %v1017_v22 }
  0x7d   : > { %v737_v39 = vpop.permute.xlu2 %736  ;;  %v1015_v36 = vsel %vm4659_vm6, %v3943_v26, %v1014_v15  ;;  %v895_v15 = vld [vmem:[%s4473_s22 + $0x98] sm:$0x1] }
  0x7e   : > { %829 = vst.msk [vmem:[#allocation2 + $0x10] sm:$0xf] %vm824_vm7, %v737_v39  ;;  %v886_v39 = vld [vmem:[%s4473_s22 + $0x74] sm:$0x1]  ;;  %v1045_v23 = vrot.slane %v895_v15, 5 }
  0x7f   : > { %v1024_v47 = vrot.slane %v886_v39, 5  ;;  %v3955_v15 = vld [vmem:[%s4473_s22 + $0x24] sm:$0xf] }
  0x82   : > { %1084 = vrot.lane.b32.xlu1 %v987_v40, %s4417_s24  ;;  %v1011_v40 = vsel %vm4659_vm6, %v1009_v29, %v1010_v30  ;;  %v252_v30 = vld [vmem:[%s4473_s22 + $0x90] sm:$0xf] }
  0x83   : > { %1082 = vrot.lane.b32.xlu0 %v983_v42, %s4417_s24  ;;  %1080 = vrot.lane.b32.xlu2 %v980_v45, %s4417_s24  ;;  %v3945_v42 = vrot.slane %v887_v35, 9  ;;  %v899_v35 = vld [vmem:[%s4473_s22 + $0xa8] sm:$0xe]  ;;  %285 = vst.msk [vmem:[#allocation2 + $0x60] sm:$0xf] %vm260_vm5, %v252_v30 }
  0x85   : > { %v739_v56 = vpop.permute.xlu2 %738  ;;  %v1029_v54 = vsel %vm4659_vm6, %v3945_v42, %v1028_v43  ;;  %v3949_v42 = vrot.slane %v899_v35, 9 }
  0x86   : > { %830 = vst.msk [vmem:[#allocation2 + $0x14] sm:$0xf] %vm824_vm7, %v739_v56  ;;  %v1025_v56 = vsel %vm4659_vm6, %v1023_v46, %v1024_v47  ;;  %v1052_v46 = vrot.slane %v898_v37, 5  ;;  %v256_v47 = vld [vmem:[%s4473_s22 + $0xa8] sm:$0xf] }
  0x87   : > { %289 = vst.msk [vmem:[#allocation2 + $0x70] sm:$0xf] %vm260_vm5, %v256_v47 }
  0x8a   : > { %1090 = vrot.lane.b32.xlu1 %v997_v57, %s4417_s24  ;;  %v892_v57 = vld [vmem:[%s4473_s22 + $0x8c] sm:$0x1] }
  0x8b   : > { %1088 = vrot.lane.b32.xlu0 %v994_v58, %s4417_s24  ;;  %1086 = vrot.lane.b32.xlu2 %v990_v63, %s4417_s24  ;;  %v890_v58 = vld [vmem:[%s4473_s22 + $0x84] sm:$0xe]  ;;  %v1038_v62 = vrot.slane %v892_v57, 5  ;;  %v251_v63 = vld [vmem:[%s4473_s22 + $0x88] sm:$0xf] }
  0x8c   : > { %v733_v5 = vpop.permute.xlu1 %732  ;;  %v3946_v2 = vrot.slane %v890_v58, 9  ;;  %284 = vst.msk [vmem:[#allocation2 + $0x5c] sm:$0xf] %vm260_vm5, %v251_v63  ;;  %v1066_v58 = vrot.slane %v904_v53, 5  ;;  %v258_v63 = vld [vmem:[%s4473_s22 + $0xb4] sm:$0xf] }
  0x8d   : > { %827 = vst.msk [vmem:[#allocation2 + $0x8] sm:$0xf] %vm824_vm7, %v733_v5  ;;  %v729_v9 = vpop.permute.xlu0 %728  ;;  %v745_v12 = vpop.permute.xlu2 %744  ;;  %v1030_v5 = vrot.slane %v1028_v43, 4  ;;  %v1039_v10 = vsel %vm4659_vm6, %v1037_v61, %v1038_v62  ;;  %v903_v43 = vld [vmem:[%s4473_s22 + $0xb8] sm:$0xf] }
  0x8e   : > { %825 = vst.msk [vmem:[#allocation2] sm:$0xf] %vm824_vm7, %v729_v9  ;;  %v249_v9 = vld [vmem:[%s4473_s22 + $0x7c] sm:$0xf]  ;;  %v259_v61 = vld [vmem:[%s4473_s22 + $0xb8] sm:$0xf] }
  0x8f   : > { %833 = vst.msk [vmem:[#allocation2 + $0x20] sm:$0xf] %vm824_vm7, %v745_v12  ;;  %v1036_v12 = vsel %vm4659_vm6, %v3946_v2, %v1035_v55  ;;  %v902_v55 = vld [vmem:[%s4473_s22 + $0xb4] sm:$0xe]  ;;  %v3984_v53 = vld [vmem:[%s4473_s22 + $0x10] sm:$0xf] }
  0x90   : > { %282 = vst.msk [vmem:[#allocation2 + $0x54] sm:$0xf] %vm260_vm5, %v249_v9  ;;  %v3950_v60 = vrot.slane %v902_v55, 9  ;;  %v3952_v9 = vld [vmem:[%s4473_s22 + $0x10] sm:$0xf] }
  0x91   : > { %292 = vst.msk [vmem:[#allocation2 + $0x7c] sm:$0xf] %vm260_vm5, %v259_v61  ;;  %v3977_v61 = vld [vmem:[%s4473_s22 + $0xa8] sm:$0xf] }
  0x92   : > { %1096 = vrot.lane.b32.xlu1 %v1008_v14, %s4417_s24  ;;  %v1042_v14 = vrot.slane %v894_v3, 5  ;;  %291 = vst.msk [vmem:[#allocation2 + $0x78] sm:$0xf] %vm260_vm5, %v258_v63 }
  0x93   : > { %1094 = vrot.lane.b32.xlu0 %v1004_v16, %s4417_s24  ;;  %1092 = vrot.lane.b32.xlu2 %v1001_v19, %s4417_s24  ;;  %v1032_v16 = vsel %vm4659_vm6, %v1030_v5, %v1031_v6  ;;  %v1049_v19 = vrot.slane %v897_v13, 5  ;;  %v3957_v13 = vld [vmem:[%s4473_s22 + $0x30] sm:$0xf] }
  0x94   : > { %v735_v24 = vpop.permute.xlu1 %734  ;;  %v1044_v22 = vrot.slane %v1042_v14, 4 }
  0x95   : > { %828 = vst.msk [vmem:[#allocation2 + $0xc] sm:$0xf] %vm824_vm7, %v735_v24  ;;  %v731_v28 = vpop.permute.xlu0 %730  ;;  %v751_v32 = vpop.permute.xlu2 %750  ;;  %v900_v24 = vld [vmem:[%s4473_s22 + $0xac] sm:$0xf]  ;;  %v1050_v31 = vsel %vm4659_vm6, %v3948_v18, %v1049_v19 }
  0x96   : > { %826 = vst.msk [vmem:[#allocation2 + $0x4] sm:$0xf] %vm824_vm7, %v731_v28  ;;  %v253_v28 = vld [vmem:[%s4473_s22 + $0x94] sm:$0xf]  ;;  %v1046_v33 = vsel %vm4659_vm6, %v1044_v22, %v1045_v23 }
  0x97   : > { %836 = vst.msk [vmem:[#allocation2 + $0x2c] sm:$0xf] %vm824_vm7, %v751_v32  ;;  %v1056_v32 = vrot.slane %v900_v24, 5 }
  0x98   : > { %286 = vst.msk [vmem:[#allocation2 + $0x64] sm:$0xf] %vm260_vm5, %v253_v28  ;;  %v3961_v28 = vld [vmem:[%s4473_s22 + $0x48] sm:$0xf] }
  0x99   : > { %v1058_v38 = vrot.slane %v1056_v32, 4  ;;  %v1057_v51 = vsel %vm4659_vm6, %v3949_v42, %v1056_v32  ;;  %v3966_v32 = vld [vmem:[%s4473_s22 + $0x64] sm:$0xf] }
  0x9a   : > { %1102 = vrot.lane.b32.xlu1 %v1018_v34, %s4417_s24  ;;  %v901_v34 = vld [vmem:[%s4473_s22 + $0xb0] sm:$0x1] }
  0x9b   : > { %1100 = vrot.lane.b32.xlu0 %v1015_v36, %s4417_s24  ;;  %1098 = vrot.lane.b32.xlu2 %v1011_v40, %s4417_s24  ;;  %v1043_v36 = vsel %vm4659_vm6, %v3947_v27, %v1042_v14  ;;  %v1059_v39 = vrot.slane %v901_v34, 5  ;;  %v257_v40 = vld [vmem:[%s4473_s22 + $0xac] sm:$0xf]  ;;  %v3956_v14 = vld [vmem:[%s4473_s22 + $0x28] sm:$0xf] }
  0x9c   : > { %v743_v45 = vpop.permute.xlu1 %742  ;;  %290 = vst.msk [vmem:[#allocation2 + $0x74] sm:$0xf] %vm260_vm5, %v257_v40  ;;  %v3962_v27 = vld [vmem:[%s4473_s22 + $0x4c] sm:$0xf]  ;;  %v3964_v34 = vld [vmem:[%s4473_s22 + $0x58] sm:$0xf] }
  0x9d   : > { %832 = vst.msk [vmem:[#allocation2 + $0x1c] sm:$0xf] %vm824_vm7, %v743_v45  ;;  %v741_v49 = vpop.permute.xlu0 %740  ;;  %v757_v52 = vpop.permute.xlu2 %756  ;;  %v1051_v45 = vrot.slane %v1049_v19, 4  ;;  %v1060_v50 = vsel %vm4659_vm6, %v1058_v38, %v1059_v39  ;;  %v3960_v19 = vld [vmem:[%s4473_s22 + $0x40] sm:$0xf] }
  0x9e   : > { %831 = vst.msk [vmem:[#allocation2 + $0x18] sm:$0xf] %vm824_vm7, %v741_v49  ;;  %v255_v49 = vld [vmem:[%s4473_s22 + $0xa0] sm:$0xf]  ;;  %v3969_v38 = vld [vmem:[%s4473_s22 + $0x78] sm:$0xf] }
  0x9f   : > { %839 = vst.msk [vmem:[#allocation2 + $0x38] sm:$0xf] %vm824_vm7, %v757_v52  ;;  %v1063_v52 = vrot.slane %v903_v43, 5  ;;  %v3968_v39 = vld [vmem:[%s4473_s22 + $0x70] sm:$0xf] }
  0xa0   : > { %288 = vst.msk [vmem:[#allocation2 + $0x6c] sm:$0xf] %vm260_vm5, %v255_v49  ;;  %v3967_v40 = vld [vmem:[%s4473_s22 + $0x6c] sm:$0xf] }
  0xa1   : > { %v1065_v57 = vrot.slane %v1063_v52, 4  ;;  %v1064_v3 = vsel %vm4659_vm6, %v3950_v60, %v1063_v52  ;;  %v3973_v52 = vld [vmem:[%s4473_s22 + $0x90] sm:$0xf]  ;;  %v3978_v60 = vld [vmem:[%s4473_s22 + $0xac] sm:$0xf] }
  0xa2   : > { %1108 = vrot.lane.b32.xlu1 %v1029_v54, %s4417_s24  ;;  %v1053_v54 = vsel %vm4659_vm6, %v1051_v45, %v1052_v46  ;;  %v3971_v45 = vld [vmem:[%s4473_s22 + $0x84] sm:$0xf]  ;;  %v3970_v46 = vld [vmem:[%s4473_s22 + $0x7c] sm:$0xf] }
  0xa3   : > { %1106 = vrot.lane.b32.xlu0 %v1025_v56, %s4417_s24  ;;  %1104 = vrot.lane.b32.xlu2 %v1022_v59, %s4417_s24  ;;  %v1067_v2 = vsel %vm4659_vm6, %v1065_v57, %v1066_v58  ;;  %v1452_v58 = vshll.u32 %v3984_v53, 16 }
  0xa4   : > { %v749_v0 = vpop.permute.xlu1 %748 }
  0xa5   : > { %835 = vst.msk [vmem:[#allocation2 + $0x28] sm:$0xf] %vm824_vm7, %v749_v0  ;;  %v747_v4 = vpop.permute.xlu0 %746  ;;  %v763_v8 = vpop.permute.xlu2 %762  ;;  %v3951_v0 = vld [vmem:[%s4473_s22 + $0xc] sm:$0xf] }
  0xa6   : > { %834 = vst.msk [vmem:[#allocation2 + $0x24] sm:$0xf] %vm824_vm7, %v747_v4 }
  0xa7   : > { %842 = vst.msk [vmem:[#allocation2 + $0x44] sm:$0xf] %vm824_vm7, %v763_v8  ;;  %v3953_v8 = vld [vmem:[%s4473_s22 + $0x18] sm:$0xf] }
  0xaa   : > { %1114 = vrot.lane.b32.xlu1 %v1039_v10, %s4417_s24 }
  0xab   : > { %1112 = vrot.lane.b32.xlu0 %v1036_v12, %s4417_s24  ;;  %1110 = vrot.lane.b32.xlu2 %v1032_v16, %s4417_s24 }
  0xac   : > { %v755_v21 = vpop.permute.xlu1 %754 }
  0xad   : > { %838 = vst.msk [vmem:[#allocation2 + $0x34] sm:$0xf] %vm824_vm7, %v755_v21  ;;  %v753_v26 = vpop.permute.xlu0 %752  ;;  %v769_v29 = vpop.permute.xlu2 %768  ;;  %v3958_v21 = vld [vmem:[%s4473_s22 + $0x34] sm:$0xf] }
  0xae   : > { %837 = vst.msk [vmem:[#allocation2 + $0x30] sm:$0xf] %vm824_vm7, %v753_v26  ;;  %v3963_v26 = vld [vmem:[%s4473_s22 + $0x54] sm:$0xf] }
  0xaf   : > { %845 = vst.msk [vmem:[#allocation2 + $0x50] sm:$0xf] %vm824_vm7, %v769_v29 }
  0xb2   : > { %1120 = vrot.lane.b32.xlu1 %v1050_v31, %s4417_s24 }
  0xb3   : > { %1118 = vrot.lane.b32.xlu0 %v1046_v33, %s4417_s24  ;;  %1116 = vrot.lane.b32.xlu2 %v1043_v36, %s4417_s24  ;;  %v3965_v33 = vld [vmem:[%s4473_s22 + $0x60] sm:$0xf] }
  0xb4   : > { %v761_v41 = vpop.permute.xlu1 %760 }
  0xb5   : > { %841 = vst.msk [vmem:[#allocation2 + $0x40] sm:$0xf] %vm824_vm7, %v761_v41  ;;  %v759_v44 = vpop.permute.xlu0 %758  ;;  %v775_v48 = vpop.permute.xlu2 %774 }
  0xb6   : > { %840 = vst.msk [vmem:[#allocation2 + $0x3c] sm:$0xf] %vm824_vm7, %v759_v44  ;;  %v3972_v44 = vld [vmem:[%s4473_s22 + $0x88] sm:$0xf] }
  0xb7   : > { %848 = vst.msk [vmem:[#allocation2 + $0x5c] sm:$0xf] %vm824_vm7, %v775_v48 }
  0xba   : > { %1126 = vrot.lane.b32.xlu1 %v1060_v50, %s4417_s24  ;;  %v3975_v50 = vld [vmem:[%s4473_s22 + $0x9c] sm:$0xf] }
  0xbb   : > { %1124 = vrot.lane.b32.xlu0 %v1057_v51, %s4417_s24  ;;  %1122 = vrot.lane.b32.xlu2 %v1053_v54, %s4417_s24  ;;  %v3974_v51 = vld [vmem:[%s4473_s22 + $0x94] sm:$0xf] }
  0xbc   : > { %v767_v56 = vpop.permute.xlu1 %766 }
  0xbd   : > { %844 = vst.msk [vmem:[#allocation2 + $0x4c] sm:$0xf] %vm824_vm7, %v767_v56  ;;  %v765_v59 = vpop.permute.xlu0 %764  ;;  %v781_v62 = vpop.permute.xlu2 %780  ;;  %v3983_v56 = vld [vmem:[%s4473_s22 + $0xc] sm:$0xf] }
  0xbe   : > { %843 = vst.msk [vmem:[#allocation2 + $0x48] sm:$0xf] %vm824_vm7, %v765_v59  ;;  %v1456_v59 = vshrl.u32 %v3984_v53, 16  ;;  %v1446_v63 = vshll.u32 %v3983_v56, 16  ;;  %v3982_v53 = vld [vmem:[%s4473_s22 + $0xc4] sm:$0xf] }
  0xbf   : > { %851 = vst.msk [vmem:[#allocation2 + $0x68] sm:$0xf] %vm824_vm7, %v781_v62  ;;  %v1443_v62 = vshrl.u32 %v3983_v56, 16 }
  0xc2   : > { %1265 = vrot.lane.b32.xlu1 %v3951_v0, %s4418_s25  ;;  %v3976_v0 = vld [vmem:[%s4473_s22 + $0xa0] sm:$0xf] }
  0xc3   : > { %1130 = vrot.lane.b32.xlu0 %v1067_v2, %s4417_s24  ;;  %1128 = vrot.lane.b32.xlu2 %v1064_v3, %s4417_s24  ;;  %v4971_v2 = vrot.slane %v1452_v58, 5  ;;  %v1458_v3 = vrot.slane %v1456_v59, 4 }
  0xc4   : > { %v773_v4 = vpop.permute.xlu1 %772 }
  0xc5   : > { %847 = vst.msk [vmem:[#allocation2 + $0x58] sm:$0xf] %vm824_vm7, %v773_v4  ;;  %v771_v5 = vpop.permute.xlu0 %770  ;;  %v787_v6 = vpop.permute.xlu2 %786  ;;  %v3985_v4 = vld [vmem:[%s4473_s22 + $0x14] sm:$0x1] }
  0xc6   : > { %846 = vst.msk [vmem:[#allocation2 + $0x54] sm:$0xf] %vm824_vm7, %v771_v5 }
  0xc7   : > { %854 = vst.msk [vmem:[#allocation2 + $0x74] sm:$0xf] %vm824_vm7, %v787_v6  ;;  %v1445_v6 = vrot.slane %v1443_v62, 4  ;;  %v3998_v62 = vld [vmem:[%s4473_s22 + $0x48] sm:$0xf] }
  0xca   : > { %1271 = vrot.lane.b32.xlu1 %v3954_v7, %s4418_s25  ;;  %v1448_v7 = vrot.slane %v1446_v63, 5 }
  0xcb   : > { %1269 = vrot.lane.b32.xlu0 %v3953_v8, %s4418_s25  ;;  %1267 = vrot.lane.b32.xlu2 %v3952_v9, %s4418_s25  ;;  %v3989_v8 = vld [vmem:[%s4473_s22 + $0x24] sm:$0xf] }
  0xcc   : > { %v779_v10 = vpop.permute.xlu1 %778 }
  0xcd   : > { %850 = vst.msk [vmem:[#allocation2 + $0x64] sm:$0xf] %vm824_vm7, %v779_v10  ;;  %v777_v11 = vpop.permute.xlu0 %776  ;;  %v1069_v12 = vpop.permute.xlu2 %1068  ;;  %v3987_v10 = vld [vmem:[%s4473_s22 + $0x1c] sm:$0xf] }
  0xce   : > { %849 = vst.msk [vmem:[#allocation2 + $0x60] sm:$0xf] %vm824_vm7, %v777_v11  ;;  %v1459_v11 = vor.u32 %v1458_v3, %v4971_v2  ;;  %v3996_v3 = vld [vmem:[%s4473_s22 + $0x40] sm:$0xf] }
  0xcf   : > { %1165 = vst.msk [vmem:[#allocation2] sm:$0xf] %vm1164_vm8, %v1069_v12  ;;  %v1462_v12 = vshll.u32 %v3985_v4, 16 }
  0xd2   : > { %1277 = vrot.lane.b32.xlu1 %v3957_v13, %s4418_s25 }
  0xd3   : > { %1275 = vrot.lane.b32.xlu0 %v3956_v14, %s4418_s25  ;;  %1273 = vrot.lane.b32.xlu2 %v3955_v15, %s4418_s25  ;;  %v3986_v14 = vld [vmem:[%s4473_s22 + $0x18] sm:$0xf]  ;;  %v3981_v15 = vld [vmem:[%s4473_s22 + $0xc0] sm:$0xf] }
  0xd4   : > { %v785_v16 = vpop.permute.xlu1 %784 }
  0xd5   : > { %853 = vst.msk [vmem:[#allocation2 + $0x70] sm:$0xf] %vm824_vm7, %v785_v16  ;;  %v783_v17 = vpop.permute.xlu0 %782  ;;  %v1075_v18 = vpop.permute.xlu2 %1074  ;;  %v1491_v16 = vshrl.u32 %v3989_v8, 16 }
  0xd6   : > { %852 = vst.msk [vmem:[#allocation2 + $0x6c] sm:$0xf] %vm824_vm7, %v783_v17  ;;  %v1494_v17 = vshll.u32 %v3989_v8, 16 }
  0xd7   : > { %1168 = vst.msk [vmem:[#allocation2 + $0xc] sm:$0xf] %vm1164_vm8, %v1075_v18  ;;  %v3980_v18 = vld [vmem:[%s4473_s22 + $0xb8] sm:$0xf] }
  0xda   : > { %1283 = vrot.lane.b32.xlu1 %v3960_v19, %s4418_s25  ;;  %v1449_v19 = vor.u32 %v1448_v7, %v1445_v6  ;;  %v3995_v7 = vld [vmem:[%s4473_s22 + $0x3c] sm:$0xf] }
  0xdb   : > { %1281 = vrot.lane.b32.xlu0 %v3959_v20, %s4418_s25  ;;  %1279 = vrot.lane.b32.xlu2 %v3958_v21, %s4418_s25  ;;  %v1476_v20 = vshll.u32 %v3987_v10, 16  ;;  %v1480_v21 = vshrl.u32 %v3987_v10, 16 }
  0xdc   : > { %v791_v22 = vpop.permute.xlu1 %790 }
  0xdd   : > { %856 = vst.msk [vmem:[#allocation2 + $0x7c] sm:$0xf] %vm824_vm7, %v791_v22  ;;  %v789_v23 = vpop.permute.xlu0 %788  ;;  %v1081_v24 = vpop.permute.xlu2 %1080  ;;  %v3979_v22 = vld [vmem:[%s4473_s22 + $0xb4] sm:$0xf] }
  0xde   : > { %855 = vst.msk [vmem:[#allocation2 + $0x78] sm:$0xf] %vm824_vm7, %v789_v23  ;;  %v1467_v23 = vshrl.u32 %v3986_v14, 16 }
  0xdf   : > { %1171 = vst.msk [vmem:[#allocation2 + $0x18] sm:$0xf] %vm1164_vm8, %v1081_v24  ;;  %v1470_v24 = vshll.u32 %v3986_v14, 16 }
  0xe2   : > { %1289 = vrot.lane.b32.xlu1 %v3963_v26, %s4418_s25  ;;  %v1460_v26 = vrot.slane %v1459_v11, 4 }
  0xe3   : > { %1287 = vrot.lane.b32.xlu0 %v3962_v27, %s4418_s25  ;;  %1285 = vrot.lane.b32.xlu2 %v3961_v28, %s4418_s25  ;;  %v1464_v27 = vrot.slane %v1462_v12, 5  ;;  %v1493_v28 = vrot.slane %v1491_v16, 4  ;;  %v1563_v12 = vshrl.u32 %v3998_v62, 16  ;;  %v1548_v16 = vshll.u32 %v3996_v3, 16 }
  0xe4   : > { %v1073_v29 = vpop.permute.xlu1 %1072 }
  0xe5   : > { %1167 = vst.msk [vmem:[#allocation2 + $0x8] sm:$0xf] %vm1164_vm8, %v1073_v29  ;;  %v1071_v30 = vpop.permute.xlu0 %1070  ;;  %v1087_v31 = vpop.permute.xlu2 %1086  ;;  %v1496_v29 = vrot.slane %v1494_v17, 5  ;;  %v1552_v17 = vshrl.u32 %v3996_v3, 16 }
  0xe6   : > { %1166 = vst.msk [vmem:[#allocation2 + $0x4] sm:$0xf] %vm1164_vm8, %v1071_v30  ;;  %v3993_v30 = vld [vmem:[%s4473_s22 + $0x34] sm:$0xf] }
  0xe7   : > { %1174 = vst.msk [vmem:[#allocation2 + $0x24] sm:$0xf] %vm1164_vm8, %v1087_v31  ;;  %v3992_v31 = vld [vmem:[%s4473_s22 + $0x30] sm:$0xf] }
  0xea   : > { %1295 = vrot.lane.b32.xlu1 %v3966_v32, %s4418_s25 }
  0xeb   : > { %1293 = vrot.lane.b32.xlu0 %v3965_v33, %s4418_s25  ;;  %1291 = vrot.lane.b32.xlu2 %v3964_v34, %s4418_s25  ;;  %v1450_v33 = vrot.slane %v1449_v19, 4  ;;  %v3990_v34 = vld [vmem:[%s4473_s22 + $0x28] sm:$0xf]  ;;  %v4002_v19 = vld [vmem:[%s4473_s22 + $0x58] sm:$0xf] }
  0xec   : > { %v1079_v35 = vpop.permute.xlu1 %1078 }
  0xed   : > { %1170 = vst.msk [vmem:[#allocation2 + $0x14] sm:$0xf] %vm1164_vm8, %v1079_v35  ;;  %v1077_v36 = vpop.permute.xlu0 %1076  ;;  %v1093_v37 = vpop.permute.xlu2 %1092  ;;  %v4992_v35 = vrot.slane %v1476_v20, 5  ;;  %v1539_v20 = vshrl.u32 %v3995_v7, 16 }
  0xee   : > { %1169 = vst.msk [vmem:[#allocation2 + $0x10] sm:$0xf] %vm1164_vm8, %v1077_v36  ;;  %v1482_v36 = vrot.slane %v1480_v21, 4  ;;  %v1542_v21 = vshll.u32 %v3995_v7, 16  ;;  %v4005_v7 = vld [vmem:[%s4473_s22 + $0x64] sm:$0xf] }
  0xef   : > { %1177 = vst.msk [vmem:[#allocation2 + $0x30] sm:$0xf] %vm1164_vm8, %v1093_v37 }
  0xf2   : > { %1301 = vrot.lane.b32.xlu1 %v3969_v38, %s4418_s25  ;;  %v3988_v38 = vld [vmem:[%s4473_s22 + $0x20] sm:$0x1] }
  0xf3   : > { %1299 = vrot.lane.b32.xlu0 %v3968_v39, %s4418_s25  ;;  %1297 = vrot.lane.b32.xlu2 %v3967_v40, %s4418_s25  ;;  %v1469_v39 = vrot.slane %v1467_v23, 4  ;;  %v1472_v40 = vrot.slane %v1470_v24, 5 }
  0xf4   : > { %v1085_v41 = vpop.permute.xlu1 %1084 }
  0xf5   : > { %1173 = vst.msk [vmem:[#allocation2 + $0x20] sm:$0xf] %vm1164_vm8, %v1085_v41  ;;  %v1083_v42 = vpop.permute.xlu0 %1082  ;;  %v1099_v43 = vpop.permute.xlu2 %1098 }
  0xf6   : > { %1172 = vst.msk [vmem:[#allocation2 + $0x1c] sm:$0xf] %vm1164_vm8, %v1083_v42  ;;  %v1524_v42 = vshll.u32 %v3993_v30, 16 }
  0xf7   : > { %1180 = vst.msk [vmem:[#allocation2 + $0x3c] sm:$0xf] %vm1164_vm8, %v1099_v43  ;;  %v1528_v43 = vshrl.u32 %v3993_v30, 16  ;;  %v1565_v30 = vrot.slane %v1563_v12, 4 }
  0xf9   : > { %v1530_v56 = vrot.slane %v1528_v43, 4 }
  0xfa   : > { %1307 = vrot.lane.b32.xlu1 %v3972_v44, %s4418_s25  ;;  %v1515_v44 = vshrl.u32 %v3992_v31, 16 }
  0xfb   : > { %1305 = vrot.lane.b32.xlu0 %v3971_v45, %s4418_s25  ;;  %1303 = vrot.lane.b32.xlu2 %v3970_v46, %s4418_s25  ;;  %v1518_v45 = vshll.u32 %v3992_v31, 16  ;;  %v1465_v46 = vsel %vm4484_vm2, %v1460_v26, %v1464_v27 }
  0xfc   : > { %v1091_v47 = vpop.permute.xlu1 %1090 }
  0xfd   : > { %1176 = vst.msk [vmem:[#allocation2 + $0x2c] sm:$0xf] %vm1164_vm8, %v1091_v47  ;;  %v1089_v48 = vpop.permute.xlu0 %1088  ;;  %v1105_v49 = vpop.permute.xlu2 %1104  ;;  %v1497_v47 = vor.u32 %v1496_v29, %v1493_v28  ;;  %v1520_v58 = vrot.slane %v1518_v45, 5  ;;  %v3999_v29 = vld [vmem:[%s4473_s22 + $0x4c] sm:$0xf] }
  0xfe   : > { %1175 = vst.msk [vmem:[#allocation2 + $0x28] sm:$0xf] %vm1164_vm8, %v1089_v48  ;;  %v1500_v48 = vshll.u32 %v3990_v34, 16 }
  0xff   : > { %1183 = vst.msk [vmem:[#allocation2 + $0x48] sm:$0xf] %vm1164_vm8, %v1105_v49  ;;  %v1455_v49 = vsel %vm4484_vm2, %v1450_v33, %v4971_v2  ;;  %v1498_v59 = vrot.slane %v1497_v47, 4  ;;  %v5031_v33 = vrot.slane %v1548_v16, 5 }
 0x102   : > { %1313 = vrot.lane.b32.xlu1 %v3975_v50, %s4418_s25  ;;  %v1483_v50 = vor.u32 %v1482_v36, %v4992_v35  ;;  %v1596_v36 = vshll.u32 %v4002_v19, 16 }
 0x103   : > { %1311 = vrot.lane.b32.xlu0 %v3974_v51, %s4418_s25  ;;  %1309 = vrot.lane.b32.xlu2 %v3973_v52, %s4418_s25  ;;  %v1486_v51 = vshll.u32 %v3988_v38, 16  ;;  %v1504_v52 = vshrl.u32 %v3990_v34, 16  ;;  %v1554_v34 = vrot.slane %v1552_v17, 4  ;;  %v4001_v38 = vld [vmem:[%s4473_s22 + $0x54] sm:$0xf]  ;;  %v1620_v17 = vshll.u32 %v4005_v7, 16 }
 0x104   : > { %v1097_v54 = vpop.permute.xlu1 %1096 }
 0x105   : > { %1179 = vst.msk [vmem:[#allocation2 + $0x38] sm:$0xf] %vm1164_vm8, %v1097_v54  ;;  %v1095_v55 = vpop.permute.xlu0 %1094  ;;  %v1111_v57 = vpop.permute.xlu2 %1110  ;;  %v1473_v54 = vor.u32 %v1472_v40, %v1469_v39  ;;  %v1488_v2 = vrot.slane %v1486_v51, 5  ;;  %v1506_v6 = vrot.slane %v1504_v52, 4  ;;  %v1541_v39 = vrot.slane %v1539_v20, 4 }
 0x106   : > { %1178 = vst.msk [vmem:[#allocation2 + $0x34] sm:$0xf] %vm1164_vm8, %v1095_v55  ;;  %v5006_v55 = vrot.slane %v1524_v42, 5  ;;  %v1544_v40 = vrot.slane %v1542_v21, 5  ;;  %v1587_v51 = vshrl.u32 %v4001_v38, 16  ;;  %v5044_v52 = vrot.slane %v1596_v36, 5 }
 0x107   : > { %1186 = vst.msk [vmem:[#allocation2 + $0x54] sm:$0xf] %vm1164_vm8, %v1111_v57  ;;  %v1517_v57 = vrot.slane %v1515_v44, 4 }
 0x108   : > { %v1531_v8 = vor.u32 %v1530_v56, %v5006_v55  ;;  %v1545_v56 = vor.u32 %v1544_v40, %v1541_v39 }
 0x109   : > { %v1521_v10 = vor.u32 %v1520_v58, %v1517_v57  ;;  %v1576_v57 = vshrl.u32 %v3999_v29, 16 }
 0x10a   : > { %1319 = vrot.lane.b32.xlu1 %v3978_v60, %s4418_s25  ;;  %v1502_v60 = vrot.slane %v1500_v48, 5  ;;  %v1532_v26 = vrot.slane %v1531_v8, 4 }
 0x10b   : > { %1317 = vrot.lane.b32.xlu0 %v3977_v61, %s4418_s25  ;;  %1315 = vrot.lane.b32.xlu2 %v3976_v0, %s4418_s25  ;;  %v3994_v61 = vld [vmem:[%s4473_s22 + $0x38] sm:$0x1]  ;;  %v1484_v0 = vrot.slane %v1483_v50, 4  ;;  %v1522_v28 = vrot.slane %v1521_v10, 4 }
 0x10c   : > { %v1103_v5 = vpop.permute.xlu1 %1102  ;;  %v1503_v14 = vsel %vm4484_vm2, %v1498_v59, %v1502_v60  ;;  %v1507_v23 = vor.u32 %v1506_v6, %v1502_v60  ;;  %v4007_v60 = vld [vmem:[%s4473_s22 + $0x6c] sm:$0xf]  ;;  %v1546_v6 = vrot.slane %v1545_v56, 4 }
 0x10d   : > { %1182 = vst.msk [vmem:[#allocation2 + $0x44] sm:$0xf] %vm1164_vm8, %v1103_v5  ;;  %v1101_v9 = vpop.permute.xlu0 %1100  ;;  %v1117_v13 = vpop.permute.xlu2 %1116  ;;  %v1474_v5 = vrot.slane %v1473_v54, 4  ;;  %v1527_v45 = vsel %vm4484_vm2, %v1522_v28, %v5006_v55  ;;  %v1590_v54 = vshll.u32 %v4001_v38, 16  ;;  %v4003_v55 = vld [vmem:[%s4473_s22 + $0x5c] sm:$0x1] }
 0x10e   : > { %1181 = vst.msk [vmem:[#allocation2 + $0x40] sm:$0xf] %vm1164_vm8, %v1101_v9  ;;  %v1534_v9 = vshll.u32 %v3994_v61, 16  ;;  %v1508_v42 = vrot.slane %v1507_v23, 4  ;;  %v1638_v10 = vshll.u32 %v4007_v60, 16 }
 0x10f   : > { %1189 = vst.msk [vmem:[#allocation2 + $0x60] sm:$0xf] %vm1164_vm8, %v1117_v13  ;;  %v3991_v13 = vld [vmem:[%s4473_s22 + $0x2c] sm:$0x1]  ;;  %v4006_v38 = vld [vmem:[%s4473_s22 + $0x68] sm:$0x1] }
 0x110   : > { %v1510_v24 = vshll.u32 %v3991_v13, 16  ;;  %v1536_v27 = vrot.slane %v1534_v9, 5  ;;  %v1635_v9 = vshrl.u32 %v4007_v60, 16  ;;  %v4000_v13 = vld [vmem:[%s4473_s22 + $0x50] sm:$0x1] }
 0x112   : > { %1325 = vrot.lane.b32.xlu1 %v3981_v15, %s4418_s25  ;;  %v1566_v15 = vshll.u32 %v3998_v62, 16  ;;  %v1512_v43 = vrot.slane %v1510_v24, 5  ;;  %v1537_v44 = vsel %vm4484_vm2, %v1532_v26, %v1536_v27  ;;  %v1582_v24 = vshll.u32 %v4000_v13, 16 }
 0x113   : > { %1323 = vrot.lane.b32.xlu0 %v3980_v18, %s4418_s25  ;;  %1321 = vrot.lane.b32.xlu2 %v3979_v22, %s4418_s25  ;;  %v1489_v18 = vsel %vm4484_vm2, %v1484_v0, %v1488_v2  ;;  %v1479_v22 = vsel %vm4484_vm2, %v1474_v5, %v4992_v35  ;;  %v1600_v35 = vshrl.u32 %v4002_v19, 16  ;;  %v1589_v0 = vrot.slane %v1587_v51, 4 }
 0x114   : > { %v1109_v32 = vpop.permute.xlu1 %1108  ;;  %v1568_v31 = vrot.slane %v1566_v15, 5  ;;  %v1513_v58 = vsel %vm4484_vm2, %v1508_v42, %v1512_v43  ;;  %v1592_v5 = vrot.slane %v1590_v54, 5  ;;  %v1637_v28 = vrot.slane %v1635_v9, 4  ;;  %v4013_v9 = vld [vmem:[%s4473_s22 + $0x84] sm:$0xf] }
 0x115   : > { %1185 = vst.msk [vmem:[#allocation2 + $0x50] sm:$0xf] %vm1164_vm8, %v1109_v32  ;;  %v1107_v37 = vpop.permute.xlu0 %1106  ;;  %v1123_v41 = vpop.permute.xlu2 %1122  ;;  %v3997_v32 = vld [vmem:[%s4473_s22 + $0x44] sm:$0x1] }
 0x116   : > { %1184 = vst.msk [vmem:[#allocation2 + $0x4c] sm:$0xf] %vm1164_vm8, %v1107_v37  ;;  %v1569_v48 = vor.u32 %v1568_v31, %v1565_v30  ;;  %v1558_v50 = vshll.u32 %v3997_v32, 16  ;;  %v1593_v21 = vor.u32 %v1592_v5, %v1589_v0  ;;  %v5069_v30 = vrot.slane %v1620_v17, 5  ;;  %v4011_v32 = vld [vmem:[%s4473_s22 + $0x7c] sm:$0xf] }
 0x117   : > { %1192 = vst.msk [vmem:[#allocation2 + $0x6c] sm:$0xf] %vm1164_vm8, %v1123_v41  ;;  %v4014_v5 = vld [vmem:[%s4473_s22 + $0x88] sm:$0xf] }
 0x118   : > { %v1570_v61 = vrot.slane %v1569_v48, 4 }
 0x11a   : > { %1828 = vrot.lane.b32.xlu1 %v1465_v46, %s4419_s26  ;;  %v1572_v46 = vshll.u32 %v3999_v29, 16  ;;  %v1640_v29 = vrot.slane %v1638_v10, 5 }
 0x11b   : > { %1826 = vrot.lane.b32.xlu0 %v1455_v49, %s4419_s26  ;;  %1327 = vrot.lane.b32.xlu2 %v3982_v53, %s4418_s25  ;;  %v1555_v49 = vor.u32 %v1554_v34, %v5031_v33  ;;  %v1602_v53 = vrot.slane %v1600_v35, 4  ;;  %v4010_v34 = vld [vmem:[%s4473_s22 + $0x78] sm:$0xf]  ;;  %v4008_v35 = vld [vmem:[%s4473_s22 + $0x70] sm:$0xf] }
 0x11c   : > { %v1115_v63 = vpop.permute.xlu1 %1114  ;;  %v1574_v59 = vrot.slane %v1572_v46, 5  ;;  %v1672_v46 = vshrl.u32 %v4011_v32, 16  ;;  %v1662_v48 = vshll.u32 %v4010_v34, 16  ;;  %v1648_v56 = vshrl.u32 %v4008_v35, 16 }
 0x11d   : > { %1188 = vst.msk [vmem:[#allocation2 + $0x5c] sm:$0xf] %vm1164_vm8, %v1115_v63  ;;  %v1113_v4 = vpop.permute.xlu0 %1112  ;;  %v1129_v11 = vpop.permute.xlu2 %1128  ;;  %v1556_v62 = vrot.slane %v1555_v49, 4  ;;  %v1560_v63 = vrot.slane %v1558_v50, 5  ;;  %v1603_v3 = vor.u32 %v1602_v53, %v5044_v52  ;;  %v1641_v49 = vor.u32 %v1640_v29, %v1637_v28 }
 0x11e   : > { %1187 = vst.msk [vmem:[#allocation2 + $0x58] sm:$0xf] %vm1164_vm8, %v1113_v4  ;;  %v1606_v4 = vshll.u32 %v4003_v55, 16  ;;  %v1575_v15 = vsel %vm4484_vm2, %v1570_v61, %v1574_v59  ;;  %v1644_v50 = vshll.u32 %v4008_v35, 16  ;;  %v1630_v53 = vshll.u32 %v4006_v38, 16 }
 0x11f   : > { %1195 = vst.msk [vmem:[#allocation2 + $0x78] sm:$0xf] %vm1164_vm8, %v1129_v11  ;;  %v1578_v11 = vrot.slane %v1576_v57, 4  ;;  %v1561_v16 = vsel %vm4484_vm2, %v1556_v62, %v1560_v63  ;;  %v1604_v19 = vrot.slane %v1603_v3, 4  ;;  %v1664_v61 = vrot.slane %v1662_v48, 5 }
 0x120   : > { %v1608_v20 = vrot.slane %v1606_v4, 5  ;;  %v1642_v62 = vrot.slane %v1641_v49, 4  ;;  %v1646_v63 = vrot.slane %v1644_v50, 5  ;;  %v1632_v0 = vrot.slane %v1630_v53, 5  ;;  %v4016_v4 = vld [vmem:[%s4473_s22 + $0x90] sm:$0xf] }
 0x121   : > { %v1579_v23 = vor.u32 %v1578_v11, %v1574_v59  ;;  %v1674_v59 = vrot.slane %v1672_v46, 4  ;;  %v1707_v17 = vshrl.u32 %v4016_v4, 16 }
 0x122   : > { %1834 = vrot.lane.b32.xlu1 %v1503_v14, %s4419_s26  ;;  %v4004_v14 = vld [vmem:[%s4473_s22 + $0x60] sm:$0xf] }
 0x123   : > { %1832 = vrot.lane.b32.xlu0 %v1489_v18, %s4419_s26  ;;  %1830 = vrot.lane.b32.xlu2 %v1479_v22, %s4419_s26  ;;  %v1624_v18 = vshrl.u32 %v4005_v7, 16  ;;  %v1551_v22 = vsel %vm4484_vm2, %v1546_v6, %v5031_v33  ;;  %v1611_v26 = vshrl.u32 %v4004_v14, 16  ;;  %v1614_v27 = vshll.u32 %v4004_v14, 16  ;;  %v4009_v14 = vld [vmem:[%s4473_s22 + $0x74] sm:$0x1] }
 0x124   : > { %v1121_v37 = vpop.permute.xlu1 %1120  ;;  %v1609_v33 = vsel %vm4484_vm2, %v1604_v19, %v1608_v20  ;;  %v1580_v40 = vrot.slane %v1579_v23, 4  ;;  %v1692_v19 = vshll.u32 %v4014_v5, 16  ;;  %v1696_v20 = vshrl.u32 %v4014_v5, 16 }
 0x125   : > { %1191 = vst.msk [vmem:[#allocation2 + $0x68] sm:$0xf] %vm1164_vm8, %v1121_v37  ;;  %v1119_v41 = vpop.permute.xlu0 %1118  ;;  %v1268_v47 = vpop.permute.xlu2 %1267  ;;  %v1626_v31 = vrot.slane %v1624_v18, 4  ;;  %v1594_v37 = vrot.slane %v1593_v21, 4  ;;  %v1613_v42 = vrot.slane %v1611_v26, 4  ;;  %v1616_v43 = vrot.slane %v1614_v27, 5 }
 0x126   : > { %1190 = vst.msk [vmem:[#allocation2 + $0x64] sm:$0xf] %vm1164_vm8, %v1119_v41  ;;  %v1584_v41 = vrot.slane %v1582_v24, 5  ;;  %v1710_v18 = vshll.u32 %v4016_v4, 16  ;;  %v1683_v21 = vshrl.u32 %v4013_v9, 16  ;;  %v1654_v26 = vshll.u32 %v4009_v14, 16 }
 0x127   : > { %1363 = vst.msk [vmem:[#allocation2 + $0x4] sm:$0xf] %vm1361_vm9, %v1268_v47  ;;  %v1659_v47 = vshrl.u32 %v4010_v34, 16  ;;  %v1627_v51 = vor.u32 %v1626_v31, %v5069_v30  ;;  %v1599_v54 = vsel %vm4484_vm2, %v1594_v37, %v5044_v52  ;;  %v1709_v31 = vrot.slane %v1707_v17, 4  ;;  %v4020_v34 = vld [vmem:[%s4473_s22 + $0xa0] sm:$0xf] }
 0x128   : > { %v1585_v57 = vsel %vm4484_vm2, %v1580_v40, %v1584_v41  ;;  %v4017_v37 = vld [vmem:[%s4473_s22 + $0x94] sm:$0xf]  ;;  %v5114_v35 = vrot.slane %v1692_v19, 5  ;;  %v1685_v38 = vrot.slane %v1683_v21, 4  ;;  %v4015_v41 = vld [vmem:[%s4473_s22 + $0x8c] sm:$0x1] }
 0x129   : > { %v1661_v60 = vrot.slane %v1659_v47, 4  ;;  %v1628_v52 = vrot.slane %v1627_v51, 4  ;;  %v1744_v46 = vshrl.u32 %v4020_v34, 16  ;;  %v1716_v51 = vshll.u32 %v4017_v37, 16  ;;  %v4018_v14 = vld [vmem:[%s4473_s22 + $0x98] sm:$0x1] }
 0x12a   : > { %1840 = vrot.lane.b32.xlu1 %v1537_v44, %s4419_s26 }
 0x12b   : > { %1838 = vrot.lane.b32.xlu0 %v1527_v45, %s4419_s26  ;;  %1836 = vrot.lane.b32.xlu2 %v1513_v58, %s4419_s26  ;;  %v1668_v45 = vshll.u32 %v4011_v32, 16  ;;  %v1617_v58 = vor.u32 %v1616_v43, %v1613_v42  ;;  %v1712_v32 = vrot.slane %v1710_v18, 5  ;;  %v1656_v43 = vrot.slane %v1654_v26, 5 }
 0x12c   : > { %v1127_v2 = vpop.permute.xlu1 %1126 }
 0x12d   : > { %1194 = vst.msk [vmem:[#allocation2 + $0x74] sm:$0xf] %vm1164_vm8, %v1127_v2  ;;  %v1125_v8 = vpop.permute.xlu0 %1124  ;;  %v1274_v12 = vpop.permute.xlu2 %1273  ;;  %v5088_v55 = vrot.slane %v1668_v45, 5  ;;  %v4012_v2 = vld [vmem:[%s4473_s22 + $0x80] sm:$0x1]  ;;  %v1618_v7 = vrot.slane %v1617_v58, 4  ;;  %v1713_v50 = vor.u32 %v1712_v32, %v1709_v31 }
 0x12e   : > { %1193 = vst.msk [vmem:[#allocation2 + $0x70] sm:$0xf] %vm1164_vm8, %v1125_v8  ;;  %v1650_v8 = vrot.slane %v1648_v56, 4  ;;  %v1678_v11 = vshll.u32 %v4012_v2, 16  ;;  %v1740_v45 = vshll.u32 %v4020_v34, 16  ;;  %v1702_v56 = vshll.u32 %v4015_v41, 16 }
 0x12f   : > { %1366 = vst.msk [vmem:[#allocation2 + $0x10] sm:$0xf] %vm1361_vm9, %v1274_v12  ;;  %v1675_v10 = vor.u32 %v1674_v59, %v5088_v55  ;;  %v1665_v12 = vor.u32 %v1664_v61, %v1661_v60  ;;  %v1623_v23 = vsel %vm4484_vm2, %v1618_v7, %v5069_v30  ;;  %v1698_v30 = vrot.slane %v1696_v20, 4  ;;  %v4021_v60 = vld [vmem:[%s4473_s22 + $0xa4] sm:$0x1] }
 0x130   : > { %v1651_v24 = vor.u32 %v1650_v8, %v1646_v63  ;;  %v1680_v28 = vrot.slane %v1678_v11, 5  ;;  %v1720_v58 = vshrl.u32 %v4017_v37, 16  ;;  %v5130_v61 = vrot.slane %v1740_v45, 5  ;;  %v4026_v32 = vld [vmem:[%s4473_s22 + $0xb8] sm:$0xf] }
 0x131   : > { %v1676_v27 = vrot.slane %v1675_v10, 4  ;;  %v1666_v29 = vrot.slane %v1665_v12, 4  ;;  %v1704_v4 = vrot.slane %v1702_v56, 5  ;;  %v1750_v8 = vshll.u32 %v4021_v60, 16 }
 0x132   : > { %1846 = vrot.lane.b32.xlu1 %v1575_v15, %s4419_s26  ;;  %v1647_v15 = vsel %vm4484_vm2, %v1642_v62, %v1646_v63  ;;  %v1652_v42 = vrot.slane %v1651_v24, 4  ;;  %v1746_v62 = vrot.slane %v1744_v46, 4  ;;  %v1722_v10 = vrot.slane %v1720_v58, 4 }
 0x133   : > { %1844 = vrot.lane.b32.xlu0 %v1561_v16, %s4419_s26  ;;  %1842 = vrot.lane.b32.xlu2 %v1551_v22, %s4419_s26  ;;  %v1633_v16 = vsel %vm4484_vm2, %v1628_v52, %v1632_v0  ;;  %v1686_v22 = vshll.u32 %v4013_v9, 16  ;;  %v1681_v49 = vsel %vm4484_vm2, %v1676_v27, %v1680_v28  ;;  %v1671_v53 = vsel %vm4484_vm2, %v1666_v29, %v5088_v55  ;;  %v4023_v9 = vld [vmem:[%s4473_s22 + $0xac] sm:$0xf] }
 0x134   : > { %v1266_v36 = vpop.permute.xlu1 %1265  ;;  %v1657_v59 = vsel %vm4484_vm2, %v1652_v42, %v1656_v43  ;;  %v1714_v55 = vrot.slane %v1713_v50, 4  ;;  %v1718_v0 = vrot.slane %v1716_v51, 5  ;;  %v1747_v11 = vor.u32 %v1746_v62, %v5130_v61 }
 0x135   : > { %1362 = vst.msk [vmem:[#allocation2] sm:$0xf] %vm1361_vm9, %v1266_v36  ;;  %v1131_v39 = vpop.permute.xlu0 %1130  ;;  %v1280_v44 = vpop.permute.xlu2 %1279  ;;  %v4019_v36 = vld [vmem:[%s4473_s22 + $0x9c] sm:$0xf]  ;;  %v1764_v21 = vshll.u32 %v4023_v9, 16  ;;  %v1726_v24 = vshll.u32 %v4018_v14, 16 }
 0x136   : > { %1196 = vst.msk [vmem:[#allocation2 + $0x7c] sm:$0xf] %vm1164_vm8, %v1131_v39  ;;  %v1688_v39 = vrot.slane %v1686_v22, 5  ;;  %v1731_v47 = vshrl.u32 %v4019_v36, 16  ;;  %v1734_v48 = vshll.u32 %v4019_v36, 16  ;;  %v1768_v22 = vshrl.u32 %v4023_v9, 16 }
 0x137   : > { %1369 = vst.msk [vmem:[#allocation2 + $0x1c] sm:$0xf] %vm1361_vm9, %v1280_v44  ;;  %v1748_v28 = vrot.slane %v1747_v11, 4  ;;  %v1752_v29 = vrot.slane %v1750_v8, 5  ;;  %v1728_v42 = vrot.slane %v1726_v24, 5  ;;  %v1792_v58 = vshrl.u32 %v4026_v32, 16 }
 0x138   : > { %v1733_v63 = vrot.slane %v1731_v47, 4  ;;  %v1736_v52 = vrot.slane %v1734_v48, 5  ;;  %v4032_v24 = vld [vmem:[%s4473_s22 + $0x10] sm:$0xf] }
 0x139   : > { %v1753_v45 = vsel %vm4484_vm2, %v1748_v28, %v1752_v29  ;;  %v1794_v8 = vrot.slane %v1792_v58, 4 }
 0x13a   : > { %1852 = vrot.lane.b32.xlu1 %v1609_v33, %s4419_s26  ;;  %v1737_v12 = vor.u32 %v1736_v52, %v1733_v63 }
 0x13b   : > { %1850 = vrot.lane.b32.xlu0 %v1599_v54, %s4419_s26  ;;  %1848 = vrot.lane.b32.xlu2 %v1585_v57, %s4419_s26  ;;  %v1699_v54 = vor.u32 %v1698_v30, %v5114_v35  ;;  %v1689_v57 = vor.u32 %v1688_v39, %v1685_v38  ;;  %v1770_v30 = vrot.slane %v1768_v22, 4  ;;  %v4029_v38 = vld [vmem:[%s4473_s22 + $0xc4] sm:$0xf]  ;;  %v4028_v39 = vld [vmem:[%s4473_s22 + $0xc0] sm:$0xf] }
 0x13c   : > { %v1272_v3 = vpop.permute.xlu1 %1271  ;;  %v1738_v31 = vrot.slane %v1737_v12, 4  ;;  %v1812_v50 = vshll.u32 %v4029_v38, 16  ;;  %v1816_v51 = vshrl.u32 %v4029_v38, 16  ;;  %v1803_v56 = vshrl.u32 %v4028_v39, 16 }
 0x13d   : > { %1365 = vst.msk [vmem:[#allocation2 + $0xc] sm:$0xf] %vm1361_vm9, %v1272_v3  ;;  %v1270_v6 = vpop.permute.xlu0 %1269  ;;  %v1286_v13 = vpop.permute.xlu2 %1285  ;;  %v1700_v3 = vrot.slane %v1699_v54, 4  ;;  %v1690_v5 = vrot.slane %v1689_v57, 4  ;;  %v1806_v57 = vshll.u32 %v4028_v39, 16 }
 0x13e   : > { %1364 = vst.msk [vmem:[#allocation2 + $0x8] sm:$0xf] %vm1361_vm9, %v1270_v6  ;;  %v4025_v6 = vld [vmem:[%s4473_s22 + $0xb4] sm:$0xf]  ;;  %v1743_v46 = vsel %vm4484_vm2, %v1738_v31, %v5130_v61  ;;  %v1814_v63 = vrot.slane %v1812_v50, 5  ;;  %v1818_v52 = vrot.slane %v1816_v51, 4 }
 0x13f   : > { %1372 = vst.msk [vmem:[#allocation2 + $0x28] sm:$0xf] %vm1361_vm9, %v1286_v13  ;;  %v1779_v17 = vshrl.u32 %v4025_v6, 16  ;;  %v1782_v18 = vshll.u32 %v4025_v6, 16  ;;  %v1705_v19 = vsel %vm4484_vm2, %v1700_v3, %v1704_v4  ;;  %v1695_v20 = vsel %vm4484_vm2, %v1690_v5, %v5114_v35  ;;  %v4030_v3 = vld [vmem:[%s4473_s22 + $0xc8] sm:$0x1] }
 0x140   : > { %v1766_v35 = vrot.slane %v1764_v21, 5  ;;  %v1805_v4 = vrot.slane %v1803_v56, 4  ;;  %v1808_v5 = vrot.slane %v1806_v57, 5  ;;  %v1819_v12 = vor.u32 %v1818_v52, %v1814_v63  ;;  %v4037_v50 = vld [vmem:[%s4473_s22 + $0x24] sm:$0xe] }
 0x141   : > { %v1781_v34 = vrot.slane %v1779_v17, 4  ;;  %v1784_v36 = vrot.slane %v1782_v18, 5  ;;  %v4081_v58 = vrot.slane %v4037_v50, 9 }
 0x142   : > { %1858 = vrot.lane.b32.xlu1 %v1647_v15, %s4419_s26  ;;  %v4022_v15 = vld [vmem:[%s4473_s22 + $0xa8] sm:$0xf] }
 0x143   : > { %1856 = vrot.lane.b32.xlu0 %v1633_v16, %s4419_s26  ;;  %1854 = vrot.lane.b32.xlu2 %v1623_v23, %s4419_s26  ;;  %v1719_v16 = vsel %vm4484_vm2, %v1714_v55, %v1718_v0  ;;  %v1723_v23 = vor.u32 %v1722_v10, %v1718_v0  ;;  %v1755_v26 = vshrl.u32 %v4022_v15, 16  ;;  %v1758_v27 = vshll.u32 %v4022_v15, 16  ;;  %v4027_v10 = vld [vmem:[%s4473_s22 + $0xbc] sm:$0x1] }
 0x144   : > { %v1278_v33 = vpop.permute.xlu1 %1277  ;;  %v1785_v48 = vor.u32 %v1784_v36, %v1781_v34  ;;  %v1809_v15 = vor.u32 %v1808_v5, %v1805_v4  ;;  %v1798_v18 = vshll.u32 %v4027_v10, 16  ;;  %v4035_v34 = vld [vmem:[%s4473_s22 + $0x1c] sm:$0xf]  ;;  %v2053_v36 = vrot.slane %v4032_v24, 5  ;;  %v4042_v4 = vld [vmem:[%s4473_s22 + $0x38] sm:$0x1] }
 0x145   : > { %1368 = vst.msk [vmem:[#allocation2 + $0x18] sm:$0xf] %vm1361_vm9, %v1278_v33  ;;  %v1276_v40 = vpop.permute.xlu0 %1275  ;;  %v1292_v44 = vpop.permute.xlu2 %1291  ;;  %v4024_v33 = vld [vmem:[%s4473_s22 + $0xb0] sm:$0x1]  ;;  %v1724_v41 = vrot.slane %v1723_v23, 4  ;;  %v1757_v43 = vrot.slane %v1755_v26, 4 }
 0x146   : > { %1367 = vst.msk [vmem:[#allocation2 + $0x14] sm:$0xf] %vm1361_vm9, %v1276_v40  ;;  %v1774_v54 = vshll.u32 %v4024_v33, 16  ;;  %v1786_v61 = vrot.slane %v1785_v48, 4  ;;  %v1810_v22 = vrot.slane %v1809_v15, 4  ;;  %v2060_v38 = vrot.slane %v4035_v34, 5 }
 0x147   : > { %1375 = vst.msk [vmem:[#allocation2 + $0x34] sm:$0xf] %vm1361_vm9, %v1292_v44  ;;  %v1760_v44 = vrot.slane %v1758_v27, 5  ;;  %v1800_v27 = vrot.slane %v1798_v18, 5  ;;  %v4033_v33 = vld [vmem:[%s4473_s22 + $0x14] sm:$0x1] }
 0x148   : > { %v1815_v31 = vsel %vm4484_vm2, %v1810_v22, %v1814_v63  ;;  %v4045_v22 = vld [vmem:[%s4473_s22 + $0x44] sm:$0x1] }
 0x149   : > { %v1761_v60 = vor.u32 %v1760_v44, %v1757_v43 }
 0x14a   : > { %1864 = vrot.lane.b32.xlu1 %v1681_v49, %s4419_s26  ;;  %v1788_v49 = vshll.u32 %v4026_v32, 16  ;;  %v4034_v32 = vld [vmem:[%s4473_s22 + $0x18] sm:$0xe] }
 0x14b   : > { %1862 = vrot.lane.b32.xlu0 %v1671_v53, %s4419_s26  ;;  %1860 = vrot.lane.b32.xlu2 %v1657_v59, %s4419_s26  ;;  %v1771_v53 = vor.u32 %v1770_v30, %v1766_v35  ;;  %v1729_v59 = vsel %vm4484_vm2, %v1724_v41, %v1728_v42  ;;  %v4080_v30 = vrot.slane %v4034_v32, 9  ;;  %v2056_v41 = vrot.slane %v4033_v33, 5  ;;  %v4038_v42 = vld [vmem:[%s4473_s22 + $0x28] sm:$0xf] }
 0x14c   : > { %v1284_v2 = vpop.permute.xlu1 %1283  ;;  %v1790_v62 = vrot.slane %v1788_v49, 5  ;;  %v4039_v49 = vld [vmem:[%s4473_s22 + $0x2c] sm:$0x1]  ;;  %v2084_v32 = vrot.slane %v4045_v22, 5 }
 0x14d   : > { %1371 = vst.msk [vmem:[#allocation2 + $0x24] sm:$0xf] %vm1361_vm9, %v1284_v2  ;;  %v1282_v7 = vpop.permute.xlu0 %1281  ;;  %v1298_v13 = vpop.permute.xlu2 %1297  ;;  %v1772_v0 = vrot.slane %v1771_v53, 4  ;;  %v1776_v2 = vrot.slane %v1774_v54, 5  ;;  %v4036_v53 = vld [vmem:[%s4473_s22 + $0x20] sm:$0x1] }
 0x14e   : > { %1370 = vst.msk [vmem:[#allocation2 + $0x20] sm:$0xf] %vm1361_vm9, %v1282_v7  ;;  %v1762_v7 = vrot.slane %v1761_v60, 4  ;;  %v1791_v11 = vsel %vm4484_vm2, %v1786_v61, %v1790_v62  ;;  %v1795_v17 = vor.u32 %v1794_v8, %v1790_v62  ;;  %v2070_v56 = vrot.slane %v4039_v49, 5  ;;  %v4041_v60 = vld [vmem:[%s4473_s22 + $0x34] sm:$0xf] }
 0x14f   : > { %1378 = vst.msk [vmem:[#allocation2 + $0x40] sm:$0xf] %vm1361_vm9, %v1298_v13  ;;  %v1822_v13 = vshll.u32 %v4030_v3, 16  ;;  %v1777_v14 = vsel %vm4484_vm2, %v1772_v0, %v1776_v2  ;;  %v2062_v61 = vrot.slane %v2060_v38, 4  ;;  %v2063_v62 = vrot.slane %v4036_v53, 5 }
 0x150   : > { %v1796_v26 = vrot.slane %v1795_v17, 4  ;;  %v4043_v0 = vld [vmem:[%s4473_s22 + $0x3c] sm:$0xe]  ;;  %v4044_v2 = vld [vmem:[%s4473_s22 + $0x40] sm:$0xf]  ;;  %v2074_v3 = vrot.slane %v4041_v60, 5 }
 0x151   : > { %v2064_v5 = vsel %vm4659_vm6, %v2062_v61, %v2063_v62  ;;  %v2081_v8 = vrot.slane %v4044_v2, 5 }
 0x152   : > { %1870 = vrot.lane.b32.xlu1 %v1719_v16, %s4419_s26  ;;  %v1767_v16 = vsel %vm4484_vm2, %v1762_v7, %v1766_v35  ;;  %v4031_v35 = vld [vmem:[%s4473_s22 + $0xc] sm:$0xe]  ;;  %v4083_v7 = vrot.slane %v4043_v0, 9  ;;  %v2076_v10 = vrot.slane %v2074_v3, 4 }
 0x153   : > { %1868 = vrot.lane.b32.xlu0 %v1705_v19, %s4419_s26  ;;  %1866 = vrot.lane.b32.xlu2 %v1695_v20, %s4419_s26  ;;  %v1820_v19 = vrot.slane %v1819_v12, 4  ;;  %v1824_v20 = vrot.slane %v1822_v13, 5  ;;  %v4079_v44 = vrot.slane %v4031_v35, 9  ;;  %v4047_v12 = vld [vmem:[%s4473_s22 + $0x4c] sm:$0xf] }
 0x154   : > { %v1290_v37 = vpop.permute.xlu1 %1289  ;;  %v2088_v17 = vrot.slane %v4047_v12, 5  ;;  %v4053_v35 = vld [vmem:[%s4473_s22 + $0x64] sm:$0xf] }
 0x155   : > { %1374 = vst.msk [vmem:[#allocation2 + $0x30] sm:$0xf] %vm1361_vm9, %v1290_v37  ;;  %v1288_v40 = vpop.permute.xlu0 %1287  ;;  %v1304_v47 = vpop.permute.xlu2 %1303  ;;  %v1825_v29 = vsel %vm4484_vm2, %v1820_v19, %v1824_v20  ;;  %v1801_v37 = vsel %vm4484_vm2, %v1796_v26, %v1800_v27  ;;  %v2054_v51 = vsel %vm4659_vm6, %v4079_v44, %v2053_v36  ;;  %v4048_v19 = vld [vmem:[%s4473_s22 + $0x50] sm:$0x1]  ;;  %v4046_v20 = vld [vmem:[%s4473_s22 + $0x48] sm:$0xe] }
 0x156   : > { %1373 = vst.msk [vmem:[#allocation2 + $0x2c] sm:$0xf] %vm1361_vm9, %v1288_v40  ;;  %v2055_v40 = vrot.slane %v2053_v36, 4  ;;  %v2091_v24 = vrot.slane %v4048_v19, 5  ;;  %v4084_v27 = vrot.slane %v4046_v20, 9 }
 0x157   : > { %1381 = vst.msk [vmem:[#allocation2 + $0x4c] sm:$0xf] %vm1361_vm9, %v1304_v47  ;;  %v2067_v47 = vrot.slane %v4038_v42, 5  ;;  %v2102_v42 = vrot.slane %v4053_v35, 5 }
 0x158   : > { %v2057_v48 = vsel %vm4659_vm6, %v2055_v40, %v2056_v41  ;;  %v2089_v33 = vsel %vm4659_vm6, %v4084_v27, %v2088_v17  ;;  %v4049_v40 = vld [vmem:[%s4473_s22 + $0x54] sm:$0xe]  ;;  %v4063_v27 = vld [vmem:[%s4473_s22 + $0x8c] sm:$0x1] }
 0x159   : > { %v2069_v54 = vrot.slane %v2067_v47, 4 }
 0x15a   : > { %1876 = vrot.lane.b32.xlu1 %v1753_v45, %s4419_s26 }
 0x15b   : > { %1874 = vrot.lane.b32.xlu0 %v1743_v46, %s4419_s26  ;;  %1872 = vrot.lane.b32.xlu2 %v1729_v59, %s4419_s26  ;;  %v2061_v46 = vsel %vm4659_vm6, %v4080_v30, %v2060_v38  ;;  %v2071_v52 = vsel %vm4659_vm6, %v2069_v54, %v2070_v56  ;;  %v4051_v38 = vld [vmem:[%s4473_s22 + $0x5c] sm:$0x1]  ;;  %v4057_v54 = vld [vmem:[%s4473_s22 + $0x74] sm:$0x1] }
 0x15c   : > { %v1296_v55 = vpop.permute.xlu1 %1295  ;;  %v4055_v56 = vld [vmem:[%s4473_s22 + $0x6c] sm:$0xe]  ;;  %v2112_v60 = vrot.slane %v4057_v54, 5 }
 0x15d   : > { %1377 = vst.msk [vmem:[#allocation2 + $0x3c] sm:$0xf] %vm1361_vm9, %v1296_v55  ;;  %v1294_v6 = vpop.permute.xlu0 %1293  ;;  %v1310_v9 = vpop.permute.xlu2 %1309  ;;  %v2068_v55 = vsel %vm4659_vm6, %v4081_v58, %v2067_v47  ;;  %v4054_v58 = vld [vmem:[%s4473_s22 + $0x68] sm:$0x1]  ;;  %v4087_v62 = vrot.slane %v4055_v56, 9 }
 0x15e   : > { %1376 = vst.msk [vmem:[#allocation2 + $0x38] sm:$0xf] %vm1361_vm9, %v1294_v6  ;;  %v4040_v6 = vld [vmem:[%s4473_s22 + $0x30] sm:$0xe]  ;;  %v2105_v0 = vrot.slane %v4054_v58, 5 }
 0x15f   : > { %1384 = vst.msk [vmem:[#allocation2 + $0x58] sm:$0xf] %vm1361_vm9, %v1310_v9 }
 0x162   : > { %1882 = vrot.lane.b32.xlu1 %v1791_v11, %s4419_s26  ;;  %v2077_v11 = vrot.slane %v4042_v4, 5 }
 0x163   : > { %1880 = vrot.lane.b32.xlu0 %v1777_v14, %s4419_s26  ;;  %1878 = vrot.lane.b32.xlu2 %v1767_v16, %s4419_s26  ;;  %v4082_v14 = vrot.slane %v4040_v6, 9  ;;  %v2082_v16 = vsel %vm4659_vm6, %v4083_v7, %v2081_v8  ;;  %v4062_v6 = vld [vmem:[%s4473_s22 + $0x88] sm:$0xf] }
 0x164   : > { %v1302_v21 = vpop.permute.xlu1 %1301  ;;  %v2078_v18 = vsel %vm4659_vm6, %v2076_v10, %v2077_v11  ;;  %v4058_v10 = vld [vmem:[%s4473_s22 + $0x78] sm:$0xe]  ;;  %v2123_v12 = vrot.slane %v4062_v6, 5 }
 0x165   : > { %1380 = vst.msk [vmem:[#allocation2 + $0x48] sm:$0xf] %vm1361_vm9, %v1302_v21  ;;  %v1300_v23 = vpop.permute.xlu0 %1299  ;;  %v1316_v28 = vpop.permute.xlu2 %1315  ;;  %v2075_v21 = vsel %vm4659_vm6, %v4082_v14, %v2074_v3 }
 0x166   : > { %1379 = vst.msk [vmem:[#allocation2 + $0x44] sm:$0xf] %vm1361_vm9, %v1300_v23  ;;  %v2090_v23 = vrot.slane %v2088_v17, 4 }
 0x167   : > { %1387 = vst.msk [vmem:[#allocation2 + $0x64] sm:$0xf] %vm1361_vm9, %v1316_v28 }
 0x168   : > { %v2092_v36 = vsel %vm4659_vm6, %v2090_v23, %v2091_v24  ;;  %v4066_v23 = vld [vmem:[%s4473_s22 + $0x98] sm:$0x1]  ;;  %v4064_v24 = vld [vmem:[%s4473_s22 + $0x90] sm:$0xe] }
 0x16a   : > { %1888 = vrot.lane.b32.xlu1 %v1825_v29, %s4419_s26  ;;  %v4050_v29 = vld [vmem:[%s4473_s22 + $0x58] sm:$0xf] }
 0x16b   : > { %1886 = vrot.lane.b32.xlu0 %v1815_v31, %s4419_s26  ;;  %1884 = vrot.lane.b32.xlu2 %v1801_v37, %s4419_s26  ;;  %v2083_v31 = vrot.slane %v2081_v8, 4  ;;  %v4052_v37 = vld [vmem:[%s4473_s22 + $0x60] sm:$0xe]  ;;  %v2095_v30 = vrot.slane %v4050_v29, 5  ;;  %v4060_v8 = vld [vmem:[%s4473_s22 + $0x80] sm:$0x1] }
 0x16c   : > { %v1308_v39 = vpop.permute.xlu1 %1307  ;;  %v4086_v41 = vrot.slane %v4052_v37, 9  ;;  %v2133_v29 = vrot.slane %v4066_v23, 5  ;;  %v2126_v37 = vrot.slane %v4063_v27, 5  ;;  %v4097_v27 = vld [vmem:[%s4473_s22 + $0x24] sm:$0xf] }
 0x16d   : > { %1383 = vst.msk [vmem:[#allocation2 + $0x54] sm:$0xf] %vm1361_vm9, %v1308_v39  ;;  %v1306_v43 = vpop.permute.xlu0 %1305  ;;  %v1322_v45 = vpop.permute.xlu2 %1321  ;;  %v2085_v39 = vsel %vm4659_vm6, %v2083_v31, %v2084_v32  ;;  %v2097_v44 = vrot.slane %v2095_v30, 4  ;;  %v4090_v32 = vrot.slane %v4064_v24, 9 }
 0x16e   : > { %1382 = vst.msk [vmem:[#allocation2 + $0x50] sm:$0xf] %vm1361_vm9, %v1306_v43  ;;  %v2103_v50 = vsel %vm4659_vm6, %v4086_v41, %v2102_v42 }
 0x16f   : > { %1390 = vst.msk [vmem:[#allocation2 + $0x70] sm:$0xf] %vm1361_vm9, %v1322_v45  ;;  %v2098_v45 = vrot.slane %v4051_v38, 5 }
 0x171   : > { %v2099_v53 = vsel %vm4659_vm6, %v2097_v44, %v2098_v45  ;;  %v4067_v44 = vld [vmem:[%s4473_s22 + $0x9c] sm:$0xe] }
 0x172   : > { %2167 = vrot.lane.b32.xlu1 %v2061_v46, %s4420_s27  ;;  %v4056_v46 = vld [vmem:[%s4473_s22 + $0x70] sm:$0xf] }
 0x173   : > { %2165 = vrot.lane.b32.xlu0 %v2057_v48, %s4420_s27  ;;  %2163 = vrot.lane.b32.xlu2 %v2054_v51, %s4420_s27  ;;  %v4085_v48 = vrot.slane %v4049_v40, 9  ;;  %v2109_v51 = vrot.slane %v4056_v46, 5  ;;  %v4071_v40 = vld [vmem:[%s4473_s22 + $0xac] sm:$0xf] }
 0x174   : > { %v1314_v57 = vpop.permute.xlu1 %1313  ;;  %v2144_v46 = vrot.slane %v4071_v40, 5  ;;  %v4102_v40 = vld [vmem:[%s4473_s22 + $0x40] sm:$0xf] }
 0x175   : > { %1386 = vst.msk [vmem:[#allocation2 + $0x60] sm:$0xf] %vm1361_vm9, %v1314_v57  ;;  %v1312_v59 = vpop.permute.xlu0 %1311  ;;  %v1328_v63 = vpop.permute.xlu2 %1327  ;;  %v2096_v57 = vsel %vm4659_vm6, %v4085_v48, %v2095_v30  ;;  %v2110_v4 = vsel %vm4659_vm6, %v4087_v62, %v2109_v51  ;;  %v4072_v62 = vld [vmem:[%s4473_s22 + $0xb0] sm:$0x1] }
 0x176   : > { %1385 = vst.msk [vmem:[#allocation2 + $0x5c] sm:$0xf] %vm1361_vm9, %v1312_v59  ;;  %v2111_v59 = vrot.slane %v2109_v51, 4 }
 0x177   : > { %1393 = vst.msk [vmem:[#allocation2 + $0x7c] sm:$0xf] %vm1361_vm9, %v1328_v63 }
 0x178   : > { %v2113_v3 = vsel %vm4659_vm6, %v2111_v59, %v2112_v60  ;;  %v4075_v59 = vld [vmem:[%s4473_s22 + $0xbc] sm:$0x1]  ;;  %v4073_v60 = vld [vmem:[%s4473_s22 + $0xb4] sm:$0xe] }
 0x17a   : > { %2173 = vrot.lane.b32.xlu1 %v2071_v52, %s4420_s27  ;;  %v4059_v52 = vld [vmem:[%s4473_s22 + $0x7c] sm:$0xf] }
 0x17b   : > { %2171 = vrot.lane.b32.xlu0 %v2068_v55, %s4420_s27  ;;  %2169 = vrot.lane.b32.xlu2 %v2064_v5, %s4420_s27  ;;  %v2104_v55 = vrot.slane %v2102_v42, 4  ;;  %v4061_v5 = vld [vmem:[%s4473_s22 + $0x84] sm:$0xe]  ;;  %v2116_v7 = vrot.slane %v4059_v52, 5  ;;  %v4069_v42 = vld [vmem:[%s4473_s22 + $0xa4] sm:$0x1] }
 0x17c   : > { %v1320_v9 = vpop.permute.xlu1 %1319  ;;  %v4089_v11 = vrot.slane %v4061_v5, 9  ;;  %v2154_v52 = vrot.slane %v4075_v59, 5  ;;  %v2147_v5 = vrot.slane %v4072_v62, 5  ;;  %v4112_v59 = vld [vmem:[%s4473_s22 + $0x7c] sm:$0xf] }
 0x17d   : > { %1389 = vst.msk [vmem:[#allocation2 + $0x6c] sm:$0xf] %vm1361_vm9, %v1320_v9  ;;  %v1318_v13 = vpop.permute.xlu0 %1317  ;;  %v1831_v15 = vpop.permute.xlu2 %1830  ;;  %v2106_v9 = vsel %vm4659_vm6, %v2104_v55, %v2105_v0  ;;  %v2118_v14 = vrot.slane %v2116_v7, 4  ;;  %v4093_v0 = vrot.slane %v4073_v60, 9 }
 0x17e   : > { %1388 = vst.msk [vmem:[#allocation2 + $0x68] sm:$0xf] %vm1361_vm9, %v1318_v13  ;;  %v2124_v20 = vsel %vm4659_vm6, %v4089_v11, %v2123_v12 }
 0x17f   : > { %1925 = vst.msk [vmem:[#allocation2 + $0x8] sm:$0xf] %vm1922_vm10, %v1831_v15  ;;  %v2119_v15 = vrot.slane %v4060_v8, 5 }
 0x181   : > { %v2120_v22 = vsel %vm4659_vm6, %v2118_v14, %v2119_v15 }
 0x182   : > { %2179 = vrot.lane.b32.xlu1 %v2082_v16, %s4420_s27  ;;  %v4065_v16 = vld [vmem:[%s4473_s22 + $0x94] sm:$0xf] }
 0x183   : > { %2177 = vrot.lane.b32.xlu0 %v2078_v18, %s4420_s27  ;;  %2175 = vrot.lane.b32.xlu2 %v2075_v21, %s4420_s27  ;;  %v4088_v18 = vrot.slane %v4058_v10, 9  ;;  %v2130_v21 = vrot.slane %v4065_v16, 5  ;;  %v4078_v10 = vld [vmem:[%s4473_s22 + $0xc8] sm:$0x1] }
 0x184   : > { %v1326_v26 = vpop.permute.xlu1 %1325  ;;  %v2161_v15 = vrot.slane %v4078_v10, 5  ;;  %v4165_v10 = vld [vmem:[%s4473_s22 + $0xb0] sm:$0x1] }
 0x185   : > { %1392 = vst.msk [vmem:[#allocation2 + $0x78] sm:$0xf] %vm1361_vm9, %v1326_v26  ;;  %v1324_v28 = vpop.permute.xlu0 %1323  ;;  %v1837_v34 = vpop.permute.xlu2 %1836  ;;  %v2117_v26 = vsel %vm4659_vm6, %v4088_v18, %v2116_v7  ;;  %v2131_v38 = vsel %vm4659_vm6, %v4090_v32, %v2130_v21 }
 0x186   : > { %1391 = vst.msk [vmem:[#allocation2 + $0x74] sm:$0xf] %vm1361_vm9, %v1324_v28  ;;  %v2132_v28 = vrot.slane %v2130_v21, 4 }
 0x187   : > { %1928 = vst.msk [vmem:[#allocation2 + $0x14] sm:$0xf] %vm1922_vm10, %v1837_v34 }
 0x188   : > { %v2134_v30 = vsel %vm4659_vm6, %v2132_v28, %v2133_v29  ;;  %v4096_v28 = vld [vmem:[%s4473_s22 + $0x1c] sm:$0xf] }
 0x18a   : > { %2185 = vrot.lane.b32.xlu1 %v2092_v36, %s4420_s27  ;;  %v4068_v36 = vld [vmem:[%s4473_s22 + $0xa0] sm:$0xf] }
 0x18b   : > { %2183 = vrot.lane.b32.xlu0 %v2089_v33, %s4420_s27  ;;  %2181 = vrot.lane.b32.xlu2 %v2085_v39, %s4420_s27  ;;  %v2125_v33 = vrot.slane %v2123_v12, 4  ;;  %v4070_v39 = vld [vmem:[%s4473_s22 + $0xa8] sm:$0xe]  ;;  %v2137_v41 = vrot.slane %v4068_v36, 5  ;;  %v4076_v12 = vld [vmem:[%s4473_s22 + $0xc0] sm:$0xe] }
 0x18c   : > { %v1829_v43 = vpop.permute.xlu1 %1828  ;;  %v4092_v45 = vrot.slane %v4070_v39, 9  ;;  %v4100_v36 = vld [vmem:[%s4473_s22 + $0x34] sm:$0xf]  ;;  %v4103_v39 = vld [vmem:[%s4473_s22 + $0x48] sm:$0xf] }
 0x18d   : > { %1924 = vst.msk [vmem:[#allocation2 + $0x4] sm:$0xf] %vm1922_vm10, %v1829_v43  ;;  %v1827_v47 = vpop.permute.xlu0 %1826  ;;  %v1843_v49 = vpop.permute.xlu2 %1842  ;;  %v2127_v43 = vsel %vm4659_vm6, %v2125_v33, %v2126_v37  ;;  %v2139_v48 = vrot.slane %v2137_v41, 4  ;;  %v4099_v33 = vld [vmem:[%s4473_s22 + $0x30] sm:$0xf] }
 0x18e   : > { %1923 = vst.msk [vmem:[#allocation2] sm:$0xf] %vm1922_vm10, %v1827_v47  ;;  %v2145_v56 = vsel %vm4659_vm6, %v4092_v45, %v2144_v46  ;;  %v4107_v45 = vld [vmem:[%s4473_s22 + $0x60] sm:$0xf] }
 0x18f   : > { %1931 = vst.msk [vmem:[#allocation2 + $0x20] sm:$0xf] %vm1922_vm10, %v1843_v49  ;;  %v2140_v49 = vrot.slane %v4069_v42, 5  ;;  %v4151_v42 = vld [vmem:[%s4473_s22 + $0x78] sm:$0xf] }
 0x191   : > { %v2141_v58 = vsel %vm4659_vm6, %v2139_v48, %v2140_v49  ;;  %v4106_v48 = vld [vmem:[%s4473_s22 + $0x58] sm:$0xf]  ;;  %v4105_v49 = vld [vmem:[%s4473_s22 + $0x54] sm:$0xf] }
 0x192   : > { %2191 = vrot.lane.b32.xlu1 %v2103_v50, %s4420_s27  ;;  %v4074_v50 = vld [vmem:[%s4473_s22 + $0xb8] sm:$0xf] }
 0x193   : > { %2189 = vrot.lane.b32.xlu0 %v2099_v53, %s4420_s27  ;;  %2187 = vrot.lane.b32.xlu2 %v2096_v57, %s4420_s27  ;;  %v4091_v53 = vrot.slane %v4067_v44, 9  ;;  %v2151_v57 = vrot.slane %v4074_v50, 5 }
 0x194   : > { %v1835_v61 = vpop.permute.xlu1 %1834 }
 0x195   : > { %1927 = vst.msk [vmem:[#allocation2 + $0x10] sm:$0xf] %vm1922_vm10, %v1835_v61  ;;  %v1833_v63 = vpop.permute.xlu0 %1832  ;;  %v1849_v2 = vpop.permute.xlu2 %1848  ;;  %v2138_v61 = vsel %vm4659_vm6, %v4091_v53, %v2137_v41  ;;  %v2152_v8 = vsel %vm4659_vm6, %v4093_v0, %v2151_v57 }
 0x196   : > { %1926 = vst.msk [vmem:[#allocation2 + $0xc] sm:$0xf] %vm1922_vm10, %v1833_v63  ;;  %v2153_v63 = vrot.slane %v2151_v57, 4 }
 0x197   : > { %1934 = vst.msk [vmem:[#allocation2 + $0x2c] sm:$0xf] %vm1922_vm10, %v1849_v2 }
 0x198   : > { %v2155_v7 = vsel %vm4659_vm6, %v2153_v63, %v2154_v52 }
 0x19a   : > { %2197 = vrot.lane.b32.xlu1 %v2113_v3, %s4420_s27  ;;  %v4077_v3 = vld [vmem:[%s4473_s22 + $0xc4] sm:$0xf] }
 0x19b   : > { %2195 = vrot.lane.b32.xlu0 %v2110_v4, %s4420_s27  ;;  %2193 = vrot.lane.b32.xlu2 %v2106_v9, %s4420_s27  ;;  %v2146_v4 = vrot.slane %v2144_v46, 4  ;;  %v2158_v9 = vrot.slane %v4077_v3, 5  ;;  %v2730_v46 = vshrl.u32 %v4151_v42, 16 }
 0x19c   : > { %v1841_v13 = vpop.permute.xlu1 %1840 }
 0x19d   : > { %1930 = vst.msk [vmem:[#allocation2 + $0x1c] sm:$0xf] %vm1922_vm10, %v1841_v13  ;;  %v1839_v17 = vpop.permute.xlu0 %1838  ;;  %v1855_v19 = vpop.permute.xlu2 %1854  ;;  %v2148_v11 = vsel %vm4659_vm6, %v2146_v4, %v2147_v5  ;;  %v2160_v14 = vrot.slane %v2158_v9, 4  ;;  %v2732_v50 = vrot.slane %v2730_v46, 4  ;;  %v4108_v4 = vld [vmem:[%s4473_s22 + $0x64] sm:$0xf] }
 0x19e   : > { %1929 = vst.msk [vmem:[#allocation2 + $0x18] sm:$0xf] %vm1922_vm10, %v1839_v17  ;;  %v4094_v17 = vrot.slane %v4076_v12, 9  ;;  %v4201_v46 = vld [vmem:[%s4473_s22 + $0x80] sm:$0x1] }
 0x19f   : > { %1937 = vst.msk [vmem:[#allocation2 + $0x38] sm:$0xf] %vm1922_vm10, %v1855_v19  ;;  %v4095_v19 = vld [vmem:[%s4473_s22 + $0x18] sm:$0xf] }
 0x1a0   : > { %v2159_v21 = vsel %vm4659_vm6, %v4094_v17, %v2158_v9 }
 0x1a2   : > { %2203 = vrot.lane.b32.xlu1 %v2124_v20, %s4420_s27  ;;  %v2162_v20 = vsel %vm4659_vm6, %v2160_v14, %v2161_v15 }
 0x1a3   : > { %2201 = vrot.lane.b32.xlu0 %v2120_v22, %s4420_s27  ;;  %2199 = vrot.lane.b32.xlu2 %v2117_v26, %s4420_s27  ;;  %v4098_v26 = vld [vmem:[%s4473_s22 + $0x28] sm:$0xf] }
 0x1a4   : > { %v1847_v31 = vpop.permute.xlu1 %1846 }
 0x1a5   : > { %1933 = vst.msk [vmem:[#allocation2 + $0x28] sm:$0xf] %vm1922_vm10, %v1847_v31  ;;  %v1845_v34 = vpop.permute.xlu0 %1844  ;;  %v1861_v35 = vpop.permute.xlu2 %1860 }
 0x1a6   : > { %1932 = vst.msk [vmem:[#allocation2 + $0x24] sm:$0xf] %vm1922_vm10, %v1845_v34  ;;  %v4101_v34 = vld [vmem:[%s4473_s22 + $0x3c] sm:$0xf] }
 0x1a7   : > { %1940 = vst.msk [vmem:[#allocation2 + $0x44] sm:$0xf] %vm1922_vm10, %v1861_v35 }
 0x1aa   : > { %2209 = vrot.lane.b32.xlu1 %v2134_v30, %s4420_s27 }
 0x1ab   : > { %2207 = vrot.lane.b32.xlu0 %v2131_v38, %s4420_s27  ;;  %2205 = vrot.lane.b32.xlu2 %v2127_v43, %s4420_s27  ;;  %v4104_v38 = vld [vmem:[%s4473_s22 + $0x4c] sm:$0xf] }
 0x1ac   : > { %v1853_v47 = vpop.permute.xlu1 %1852 }
 0x1ad   : > { %1936 = vst.msk [vmem:[#allocation2 + $0x34] sm:$0xf] %vm1922_vm10, %v1853_v47  ;;  %v1851_v51 = vpop.permute.xlu0 %1850  ;;  %v1867_v54 = vpop.permute.xlu2 %1866  ;;  %v2733_v47 = vshll.u32 %v4151_v42, 16  ;;  %v4212_v42 = vld [vmem:[%s4473_s22 + $0xac] sm:$0xf] }
 0x1ae   : > { %1935 = vst.msk [vmem:[#allocation2 + $0x30] sm:$0xf] %vm1922_vm10, %v1851_v51 }
 0x1af   : > { %1943 = vst.msk [vmem:[#allocation2 + $0x50] sm:$0xf] %vm1922_vm10, %v1867_v54  ;;  %v2735_v51 = vrot.slane %v2733_v47, 5  ;;  %v4152_v54 = vld [vmem:[%s4473_s22 + $0x7c] sm:$0xf] }
 0x1b0   : > { %v2739_v62 = vshll.u32 %v4152_v54, 16  ;;  %v2743_v3 = vshrl.u32 %v4152_v54, 16 }
 0x1b2   : > { %2215 = vrot.lane.b32.xlu1 %v2145_v56, %s4420_s27  ;;  %v4164_v56 = vld [vmem:[%s4473_s22 + $0xac] sm:$0xf]  ;;  %v2745_v14 = vrot.slane %v2743_v3, 4 }
 0x1b3   : > { %2213 = vrot.lane.b32.xlu0 %v2141_v58, %s4420_s27  ;;  %2211 = vrot.lane.b32.xlu2 %v2138_v61, %s4420_s27  ;;  %v4163_v58 = vld [vmem:[%s4473_s22 + $0xa8] sm:$0xf]  ;;  %v2736_v61 = vor.u32 %v2735_v51, %v2732_v50  ;;  %v2835_v63 = vshll.u32 %v4164_v56, 16  ;;  %v2839_v52 = vshrl.u32 %v4164_v56, 16  ;;  %v3232_v50 = vrot.slane %v4212_v42, 5 }
 0x1b4   : > { %v1859_v55 = vpop.permute.xlu1 %1858  ;;  %v2826_v0 = vshrl.u32 %v4163_v58, 16 }
 0x1b5   : > { %1939 = vst.msk [vmem:[#allocation2 + $0x40] sm:$0xf] %vm1922_vm10, %v1859_v55  ;;  %v1857_v2 = vpop.permute.xlu0 %1856  ;;  %v1873_v6 = vpop.permute.xlu2 %1872  ;;  %v4111_v55 = vld [vmem:[%s4473_s22 + $0x78] sm:$0xf]  ;;  %v2737_v5 = vrot.slane %v2736_v61, 4 }
 0x1b6   : > { %1938 = vst.msk [vmem:[#allocation2 + $0x3c] sm:$0xf] %vm1922_vm10, %v1857_v2  ;;  %v2829_v2 = vshll.u32 %v4163_v58, 16  ;;  %v4129_v58 = vld [vmem:[%s4473_s22 + $0x20] sm:$0x1] }
 0x1b7   : > { %1946 = vst.msk [vmem:[#allocation2 + $0x5c] sm:$0xf] %vm1922_vm10, %v1873_v6  ;;  %v2741_v6 = vrot.slane %v2739_v62, 5  ;;  %v2557_v3 = vshll.u32 %v4129_v58, 16 }
 0x1b8   : > { %v2831_v12 = vrot.slane %v2829_v2, 5 }
 0x1b9   : > { %v2742_v17 = vsel %vm4484_vm2, %v2737_v5, %v2741_v6 }
 0x1ba   : > { %2221 = vrot.lane.b32.xlu1 %v2155_v7, %s4420_s27  ;;  %v2837_v7 = vrot.slane %v2835_v63, 5  ;;  %v4140_v63 = vld [vmem:[%s4473_s22 + $0x4c] sm:$0xf] }
 0x1bb   : > { %2219 = vrot.lane.b32.xlu0 %v2152_v8, %s4420_s27  ;;  %2217 = vrot.lane.b32.xlu2 %v2148_v11, %s4420_s27  ;;  %v2841_v8 = vrot.slane %v2839_v52, 4  ;;  %v2828_v11 = vrot.slane %v2826_v0, 4 }
 0x1bc   : > { %v1865_v13 = vpop.permute.xlu1 %1864 }
 0x1bd   : > { %1942 = vst.msk [vmem:[#allocation2 + $0x4c] sm:$0xf] %vm1922_vm10, %v1865_v13  ;;  %v1863_v16 = vpop.permute.xlu0 %1862  ;;  %v1879_v18 = vpop.permute.xlu2 %1878 }
 0x1be   : > { %1941 = vst.msk [vmem:[#allocation2 + $0x48] sm:$0xf] %vm1922_vm10, %v1863_v16  ;;  %v4153_v16 = vld [vmem:[%s4473_s22 + $0x80] sm:$0x1] }
 0x1bf   : > { %1949 = vst.msk [vmem:[#allocation2 + $0x68] sm:$0xf] %vm1922_vm10, %v1879_v18  ;;  %v2842_v18 = vor.u32 %v2841_v8, %v2837_v7 }
 0x1c2   : > { %2360 = vrot.lane.b32.xlu1 %v4095_v19, %s4421_s28  ;;  %v2845_v19 = vshll.u32 %v4165_v10, 16 }
 0x1c3   : > { %2225 = vrot.lane.b32.xlu0 %v2162_v20, %s4420_s27  ;;  %2223 = vrot.lane.b32.xlu2 %v2159_v21, %s4420_s27  ;;  %v4120_v20 = vld [vmem:[%s4473_s22 + $0xac] sm:$0xf]  ;;  %v2832_v21 = vor.u32 %v2831_v12, %v2828_v11  ;;  %v4213_v11 = vld [vmem:[%s4473_s22 + $0xb0] sm:$0x1] }
 0x1c4   : > { %v1871_v22 = vpop.permute.xlu1 %1870 }
 0x1c5   : > { %1945 = vst.msk [vmem:[#allocation2 + $0x58] sm:$0xf] %vm1922_vm10, %v1871_v22  ;;  %v1869_v23 = vpop.permute.xlu0 %1868  ;;  %v1885_v24 = vpop.permute.xlu2 %1884  ;;  %v4119_v22 = vld [vmem:[%s4473_s22 + $0xa8] sm:$0xf] }
 0x1c6   : > { %1944 = vst.msk [vmem:[#allocation2 + $0x54] sm:$0xf] %vm1922_vm10, %v1869_v23  ;;  %v2746_v23 = vor.u32 %v2745_v14, %v2741_v6  ;;  %v2643_v6 = vshll.u32 %v4140_v63, 16 }
 0x1c7   : > { %1952 = vst.msk [vmem:[#allocation2 + $0x74] sm:$0xf] %vm1922_vm10, %v1885_v24  ;;  %v2749_v24 = vshll.u32 %v4153_v16, 16  ;;  %v4141_v16 = vld [vmem:[%s4473_s22 + $0x50] sm:$0x1] }
 0x1ca   : > { %2366 = vrot.lane.b32.xlu1 %v4098_v26, %s4421_s28  ;;  %v2843_v26 = vrot.slane %v2842_v18, 4 }
 0x1cb   : > { %2364 = vrot.lane.b32.xlu0 %v4097_v27, %s4421_s28  ;;  %2362 = vrot.lane.b32.xlu2 %v4096_v28, %s4421_s28  ;;  %v2847_v27 = vrot.slane %v2845_v19, 5 }
 0x1cc   : > { %v1877_v29 = vpop.permute.xlu1 %1876 }
 0x1cd   : > { %1948 = vst.msk [vmem:[#allocation2 + $0x64] sm:$0xf] %vm1922_vm10, %v1877_v29  ;;  %v1875_v31 = vpop.permute.xlu0 %1874  ;;  %v2164_v32 = vpop.permute.xlu2 %2163  ;;  %v2833_v29 = vrot.slane %v2832_v21, 4  ;;  %v3235_v21 = vrot.slane %v4213_v11, 5  ;;  %v4167_v11 = vld [vmem:[%s4473_s22 + $0xb8] sm:$0xf] }
 0x1ce   : > { %1947 = vst.msk [vmem:[#allocation2 + $0x60] sm:$0xf] %vm1922_vm10, %v1875_v31  ;;  %v4200_v31 = vld [vmem:[%s4473_s22 + $0x7c] sm:$0xf] }
 0x1cf   : > { %2260 = vst.msk [vmem:[#allocation2] sm:$0xf] %vm2259_vm11, %v2164_v32  ;;  %v4128_v32 = vld [vmem:[%s4473_s22 + $0x1c] sm:$0xf] }
 0x1d2   : > { %2372 = vrot.lane.b32.xlu1 %v4101_v34, %s4421_s28 }
 0x1d3   : > { %2370 = vrot.lane.b32.xlu0 %v4100_v36, %s4421_s28  ;;  %2368 = vrot.lane.b32.xlu2 %v4099_v33, %s4421_s28  ;;  %v2747_v36 = vrot.slane %v2746_v23, 4  ;;  %v2751_v33 = vrot.slane %v2749_v24, 5 }
 0x1d4   : > { %v1883_v37 = vpop.permute.xlu1 %1882 }
 0x1d5   : > { %1951 = vst.msk [vmem:[#allocation2 + $0x70] sm:$0xf] %vm1922_vm10, %v1883_v37  ;;  %v1881_v35 = vpop.permute.xlu0 %1880  ;;  %v2170_v30 = vpop.permute.xlu2 %2169  ;;  %v4127_v37 = vld [vmem:[%s4473_s22 + $0x18] sm:$0xf]  ;;  %v2752_v47 = vsel %vm4484_vm2, %v2747_v36, %v2751_v33 }
 0x1d6   : > { %1950 = vst.msk [vmem:[#allocation2 + $0x6c] sm:$0xf] %vm1922_vm10, %v1881_v35 }
 0x1d7   : > { %2263 = vst.msk [vmem:[#allocation2 + $0xc] sm:$0xf] %vm2259_vm11, %v2170_v30  ;;  %v2848_v30 = vsel %vm4484_vm2, %v2843_v26, %v2847_v27 }
 0x1da   : > { %2378 = vrot.lane.b32.xlu1 %v4104_v38, %s4421_s28  ;;  %v4211_v38 = vld [vmem:[%s4473_s22 + $0xa8] sm:$0xe] }
 0x1db   : > { %2376 = vrot.lane.b32.xlu0 %v4103_v39, %s4421_s28  ;;  %2374 = vrot.lane.b32.xlu2 %v4102_v40, %s4421_s28  ;;  %v2547_v39 = vshll.u32 %v4128_v32, 16  ;;  %v2551_v40 = vshrl.u32 %v4128_v32, 16  ;;  %v2653_v32 = vshll.u32 %v4141_v16, 16 }
 0x1dc   : > { %v1889_v41 = vpop.permute.xlu1 %1888 }
 0x1dd   : > { %1954 = vst.msk [vmem:[#allocation2 + $0x7c] sm:$0xf] %vm1922_vm10, %v1889_v41  ;;  %v1887_v43 = vpop.permute.xlu0 %1886  ;;  %v2176_v44 = vpop.permute.xlu2 %2175  ;;  %v2838_v41 = vsel %vm4484_vm2, %v2833_v29, %v2837_v7  ;;  %v2549_v51 = vrot.slane %v2547_v39, 5  ;;  %v2647_v7 = vshrl.u32 %v4140_v63, 16  ;;  %v4176_v29 = vld [vmem:[%s4473_s22 + $0x1c] sm:$0xf] }
 0x1de   : > { %1953 = vst.msk [vmem:[#allocation2 + $0x78] sm:$0xf] %vm1922_vm10, %v1887_v43  ;;  %v3204_v43 = vrot.slane %v4200_v31, 5  ;;  %v4188_v39 = vld [vmem:[%s4473_s22 + $0x4c] sm:$0xf] }
 0x1df   : > { %2266 = vst.msk [vmem:[#allocation2 + $0x18] sm:$0xf] %vm2259_vm11, %v2176_v44  ;;  %v2538_v44 = vshrl.u32 %v4127_v37, 16  ;;  %v2649_v18 = vrot.slane %v2647_v7, 4  ;;  %v4156_v7 = vld [vmem:[%s4473_s22 + $0x8c] sm:$0x1] }
 0x1e0   : > { %v3206_v56 = vrot.slane %v3204_v43, 4  ;;  %v2773_v16 = vshll.u32 %v4156_v7, 16 }
 0x1e2   : > { %2384 = vrot.lane.b32.xlu1 %v4107_v45, %s4421_s28  ;;  %v2541_v45 = vshll.u32 %v4127_v37, 16  ;;  %v3148_v37 = vrot.slane %v4176_v29, 5 }
 0x1e3   : > { %2382 = vrot.lane.b32.xlu0 %v4106_v48, %s4421_s28  ;;  %2380 = vrot.lane.b32.xlu2 %v4105_v49, %s4421_s28  ;;  %v4199_v48 = vld [vmem:[%s4473_s22 + $0x78] sm:$0xe]  ;;  %v4235_v49 = vrot.slane %v4211_v38, 9  ;;  %v2655_v38 = vrot.slane %v2653_v32, 5 }
 0x1e4   : > { %v2168_v53 = vpop.permute.xlu1 %2167  ;;  %v4231_v62 = vrot.slane %v4199_v48, 9  ;;  %v3150_v58 = vrot.slane %v3148_v37, 4 }
 0x1e5   : > { %2262 = vst.msk [vmem:[#allocation2 + $0x8] sm:$0xf] %vm2259_vm11, %v2168_v53  ;;  %v2166_v57 = vpop.permute.xlu0 %2165  ;;  %v2182_v60 = vpop.permute.xlu2 %2181  ;;  %v2553_v53 = vrot.slane %v2551_v40, 4  ;;  %v3233_v0 = vsel %vm4659_vm6, %v4235_v49, %v3232_v50  ;;  %v4177_v49 = vld [vmem:[%s4473_s22 + $0x20] sm:$0x1] }
 0x1e6   : > { %2261 = vst.msk [vmem:[#allocation2 + $0x4] sm:$0xf] %vm2259_vm11, %v2166_v57  ;;  %v3207_v57 = vrot.slane %v4201_v46, 5  ;;  %v3205_v8 = vsel %vm4659_vm6, %v4231_v62, %v3204_v43  ;;  %v4189_v46 = vld [vmem:[%s4473_s22 + $0x50] sm:$0x1] }
 0x1e7   : > { %2269 = vst.msk [vmem:[#allocation2 + $0x24] sm:$0xf] %vm2259_vm11, %v2182_v60  ;;  %v2543_v60 = vrot.slane %v2541_v45, 5  ;;  %v2554_v2 = vor.u32 %v2553_v53, %v2549_v51 }
 0x1e9   : > { %v2555_v12 = vrot.slane %v2554_v2, 4 }
 0x1ea   : > { %2394 = vrot.lane.b32.xlu1 %v4112_v59, %s4421_s28  ;;  %v2540_v59 = vrot.slane %v2538_v44, 4  ;;  %v3176_v44 = vrot.slane %v4188_v39, 5  ;;  %v4203_v39 = vld [vmem:[%s4473_s22 + $0x88] sm:$0xf] }
 0x1eb   : > { %2392 = vrot.lane.b32.xlu0 %v4111_v55, %s4421_s28  ;;  %2386 = vrot.lane.b32.xlu2 %v4108_v4, %s4421_s28  ;;  %v4139_v55 = vld [vmem:[%s4473_s22 + $0x48] sm:$0xf]  ;;  %v3208_v4 = vsel %vm4659_vm6, %v3206_v56, %v3207_v57 }
 0x1ec   : > { %v2174_v9 = vpop.permute.xlu1 %2173  ;;  %v2544_v5 = vor.u32 %v2543_v60, %v2540_v59  ;;  %v2637_v10 = vshll.u32 %v4139_v55, 16  ;;  %v4155_v56 = vld [vmem:[%s4473_s22 + $0x88] sm:$0xf]  ;;  %v3151_v59 = vrot.slane %v4177_v49, 5  ;;  %v4154_v60 = vld [vmem:[%s4473_s22 + $0x84] sm:$0xf] }
 0x1ed   : > { %2265 = vst.msk [vmem:[#allocation2 + $0x14] sm:$0xf] %vm2259_vm11, %v2174_v9  ;;  %v2172_v13 = vpop.permute.xlu0 %2171  ;;  %v2188_v15 = vpop.permute.xlu2 %2187  ;;  %v2634_v9 = vshrl.u32 %v4139_v55, 16  ;;  %v2763_v63 = vshll.u32 %v4155_v56, 16  ;;  %v2757_v2 = vshll.u32 %v4154_v60, 16 }
 0x1ee   : > { %2264 = vst.msk [vmem:[#allocation2 + $0x10] sm:$0xf] %vm2259_vm11, %v2172_v13  ;;  %v2559_v13 = vrot.slane %v2557_v3, 5  ;;  %v2639_v23 = vrot.slane %v2637_v10, 5  ;;  %v3152_v3 = vsel %vm4659_vm6, %v3150_v58, %v3151_v59  ;;  %v4215_v49 = vld [vmem:[%s4473_s22 + $0xb8] sm:$0xf] }
 0x1ef   : > { %2272 = vst.msk [vmem:[#allocation2 + $0x30] sm:$0xf] %vm2259_vm11, %v2188_v15  ;;  %v2545_v15 = vrot.slane %v2544_v5, 4  ;;  %v4130_v58 = vld [vmem:[%s4473_s22 + $0x24] sm:$0xf] }
 0x1f0   : > { %v2560_v26 = vsel %vm4484_vm2, %v2555_v12, %v2559_v13  ;;  %v4166_v13 = vld [vmem:[%s4473_s22 + $0xb4] sm:$0xf] }
 0x1f1   : > { %v2550_v27 = vsel %vm4484_vm2, %v2545_v15, %v2549_v51  ;;  %v3179_v51 = vrot.slane %v4189_v46, 5 }
 0x1f2   : > { %2953 = vrot.lane.b32.xlu1 %v2742_v17, %s4422_s29  ;;  %v2645_v17 = vrot.slane %v2643_v6, 5 }
 0x1f3   : > { %2410 = vrot.lane.b32.xlu0 %v4120_v20, %s4421_s28  ;;  %2408 = vrot.lane.b32.xlu2 %v4119_v22, %s4421_s28  ;;  %v3234_v20 = vrot.slane %v3232_v50, 4  ;;  %v2636_v22 = vrot.slane %v2634_v9, 4  ;;  %v3178_v50 = vrot.slane %v3176_v44, 4  ;;  %v2759_v9 = vrot.slane %v2757_v2, 5 }
 0x1f4   : > { %v2180_v28 = vpop.permute.xlu1 %2179  ;;  %v2650_v31 = vor.u32 %v2649_v18, %v2645_v17 }
 0x1f5   : > { %2268 = vst.msk [vmem:[#allocation2 + $0x20] sm:$0xf] %vm2259_vm11, %v2180_v28  ;;  %v2178_v34 = vpop.permute.xlu0 %2177  ;;  %v2194_v35 = vpop.permute.xlu2 %2193  ;;  %v4175_v28 = vld [vmem:[%s4473_s22 + $0x18] sm:$0xe]  ;;  %v2640_v36 = vor.u32 %v2639_v23, %v2636_v22  ;;  %v3180_v62 = vsel %vm4659_vm6, %v3178_v50, %v3179_v51  ;;  %v2850_v22 = vshrl.u32 %v4166_v13, 16  ;;  %v2853_v23 = vshll.u32 %v4166_v13, 16 }
 0x1f6   : > { %2267 = vst.msk [vmem:[#allocation2 + $0x1c] sm:$0xf] %vm2259_vm11, %v2178_v34  ;;  %v3236_v34 = vsel %vm4659_vm6, %v3234_v20, %v3235_v21  ;;  %v4223_v33 = vrot.slane %v4175_v28, 9  ;;  %v2863_v20 = vshrl.u32 %v4167_v11, 16  ;;  %v4113_v21 = vld [vmem:[%s4473_s22 + $0x84] sm:$0xf] }
 0x1f7   : > { %2275 = vst.msk [vmem:[#allocation2 + $0x3c] sm:$0xf] %vm2259_vm11, %v2194_v35  ;;  %v4142_v50 = vld [vmem:[%s4473_s22 + $0x54] sm:$0xf]  ;;  %v4132_v13 = vld [vmem:[%s4473_s22 + $0x2c] sm:$0x1] }
 0x1f8   : > { %v3149_v43 = vsel %vm4659_vm6, %v4223_v33, %v3148_v37  ;;  %v2855_v33 = vrot.slane %v2853_v23, 5 }
 0x1fa   : > { %2971 = vrot.lane.b32.xlu1 %v2848_v30, %s4422_s29  ;;  %v2651_v30 = vrot.slane %v2650_v31, 4  ;;  %v2865_v31 = vrot.slane %v2863_v20, 4 }
 0x1fb   : > { %2969 = vrot.lane.b32.xlu0 %v2838_v41, %s4422_s29  ;;  %2955 = vrot.lane.b32.xlu2 %v2752_v47, %s4422_s29  ;;  %v2641_v41 = vrot.slane %v2640_v36, 4  ;;  %v4187_v47 = vld [vmem:[%s4473_s22 + $0x48] sm:$0xe]  ;;  %v2852_v36 = vrot.slane %v2850_v22, 4 }
 0x1fc   : > { %v2186_v54 = vpop.permute.xlu1 %2185  ;;  %v2656_v45 = vsel %vm4484_vm2, %v2651_v30, %v2655_v38  ;;  %v4202_v38 = vld [vmem:[%s4473_s22 + $0x84] sm:$0xe] }
 0x1fd   : > { %2271 = vst.msk [vmem:[#allocation2 + $0x2c] sm:$0xf] %vm2259_vm11, %v2186_v54  ;;  %v2184_v61 = vpop.permute.xlu0 %2183  ;;  %v2200_v52 = vpop.permute.xlu2 %2199  ;;  %v2646_v48 = vsel %vm4484_vm2, %v2641_v41, %v2645_v17  ;;  %v4227_v54 = vrot.slane %v4187_v47, 9  ;;  %v4114_v17 = vld [vmem:[%s4473_s22 + $0x88] sm:$0xf] }
 0x1fe   : > { %2270 = vst.msk [vmem:[#allocation2 + $0x28] sm:$0xf] %vm2259_vm11, %v2184_v61 }
 0x1ff   : > { %2278 = vst.msk [vmem:[#allocation2 + $0x48] sm:$0xf] %vm2259_vm11, %v2200_v52  ;;  %v2767_v52 = vshrl.u32 %v4155_v56, 16  ;;  %v3177_v55 = vsel %vm4659_vm6, %v4227_v54, %v3176_v44  ;;  %v4232_v44 = vrot.slane %v4202_v38, 9  ;;  %v4131_v54 = vld [vmem:[%s4473_s22 + $0x28] sm:$0xf] }
 0x200   : > { %v4216_v56 = vld [vmem:[%s4473_s22 + $0xbc] sm:$0x1] }
 0x201   : > { %v2769_v5 = vrot.slane %v2767_v52, 4  ;;  %v4214_v52 = vld [vmem:[%s4473_s22 + $0xb4] sm:$0xe] }
 0x202   : > { %3306 = vrot.lane.b32.xlu1 %v3233_v0, %s4423_s30  ;;  %v2754_v0 = vshrl.u32 %v4154_v60, 16  ;;  %v3239_v60 = vrot.slane %v4215_v49, 5 }
 0x203   : > { %3292 = vrot.lane.b32.xlu0 %v3208_v4, %s4423_s30  ;;  %3290 = vrot.lane.b32.xlu2 %v3205_v8, %s4423_s30  ;;  %v2765_v4 = vrot.slane %v2763_v63, 5 }
 0x204   : > { %v2192_v14 = vpop.permute.xlu1 %2191  ;;  %v2756_v8 = vrot.slane %v2754_v0, 4  ;;  %v2575_v0 = vshrl.u32 %v4131_v54, 16  ;;  %v3241_v7 = vrot.slane %v3239_v60, 4 }
 0x205   : > { %2274 = vst.msk [vmem:[#allocation2 + $0x38] sm:$0xf] %vm2259_vm11, %v2192_v14  ;;  %v2190_v19 = vpop.permute.xlu0 %2189  ;;  %v2206_v24 = vpop.permute.xlu2 %2205  ;;  %v4121_v14 = vld [vmem:[%s4473_s22 + $0xb4] sm:$0xf]  ;;  %v2770_v15 = vor.u32 %v2769_v5, %v2765_v4  ;;  %v3242_v5 = vrot.slane %v4216_v56, 5 }
 0x206   : > { %2273 = vst.msk [vmem:[#allocation2 + $0x34] sm:$0xf] %vm2259_vm11, %v2190_v19  ;;  %v2760_v18 = vor.u32 %v2759_v9, %v2756_v8  ;;  %v2859_v19 = vshll.u32 %v4167_v11, 16  ;;  %v4236_v8 = vrot.slane %v4214_v52, 9 }
 0x207   : > { %2281 = vst.msk [vmem:[#allocation2 + $0x54] sm:$0xf] %vm2259_vm11, %v2206_v24  ;;  %v2771_v24 = vrot.slane %v2770_v15, 4  ;;  %v2577_v15 = vrot.slane %v2575_v0, 4  ;;  %v3243_v22 = vsel %vm4659_vm6, %v3241_v7, %v3242_v5 }
 0x208   : > { %v2761_v28 = vrot.slane %v2760_v18, 4  ;;  %v2861_v29 = vrot.slane %v2859_v19, 5 }
 0x20a   : > { %2923 = vrot.lane.b32.xlu1 %v2560_v26, %s4422_s29  ;;  %v2775_v26 = vrot.slane %v2773_v16, 5  ;;  %v2766_v30 = vsel %vm4484_vm2, %v2761_v28, %v2765_v4  ;;  %v2565_v4 = vshll.u32 %v4130_v58, 16  ;;  %v2581_v28 = vshll.u32 %v4132_v13, 16 }
 0x20b   : > { %2921 = vrot.lane.b32.xlu0 %v2550_v27, %s4422_s29  ;;  %3308 = vrot.lane.b32.xlu2 %v3236_v34, %s4423_s30  ;;  %v4168_v34 = vld [vmem:[%s4473_s22 + $0xbc] sm:$0x1] }
 0x20c   : > { %v2198_v35 = vpop.permute.xlu1 %2197  ;;  %v2869_v41 = vshll.u32 %v4168_v34, 16  ;;  %v2567_v20 = vrot.slane %v2565_v4, 5 }
 0x20d   : > { %2277 = vst.msk [vmem:[#allocation2 + $0x44] sm:$0xf] %vm2259_vm11, %v2198_v35  ;;  %v2196_v40 = vpop.permute.xlu0 %2195  ;;  %v2212_v42 = vpop.permute.xlu2 %2211  ;;  %v2776_v35 = vsel %vm4484_vm2, %v2771_v24, %v2775_v26  ;;  %v3240_v26 = vsel %vm4659_vm6, %v4236_v8, %v3239_v60 }
 0x20e   : > { %2276 = vst.msk [vmem:[#allocation2 + $0x40] sm:$0xf] %vm2259_vm11, %v2196_v40  ;;  %v2866_v40 = vor.u32 %v2865_v31, %v2861_v29 }
 0x20f   : > { %2284 = vst.msk [vmem:[#allocation2 + $0x60] sm:$0xf] %vm2259_vm11, %v2212_v42  ;;  %v4122_v42 = vld [vmem:[%s4473_s22 + $0xb8] sm:$0xf] }
 0x210   : > { %v2867_v47 = vrot.slane %v2866_v40, 4 }
 0x212   : > { %3258 = vrot.lane.b32.xlu1 %v3149_v43, %s4423_s30  ;;  %v2856_v43 = vor.u32 %v2855_v33, %v2852_v36 }
 0x213   : > { %2939 = vrot.lane.b32.xlu0 %v2656_v45, %s4422_s29  ;;  %2937 = vrot.lane.b32.xlu2 %v2646_v48, %s4422_s29  ;;  %v3211_v45 = vrot.slane %v4203_v39, 5  ;;  %v2871_v48 = vrot.slane %v2869_v41, 5 }
 0x214   : > { %v2204_v53 = vpop.permute.xlu1 %2203 }
 0x215   : > { %2280 = vst.msk [vmem:[#allocation2 + $0x50] sm:$0xf] %vm2259_vm11, %v2204_v53  ;;  %v2202_v57 = vpop.permute.xlu0 %2201  ;;  %v2218_v61 = vpop.permute.xlu2 %2217  ;;  %v2857_v53 = vrot.slane %v2856_v43, 4  ;;  %v3212_v59 = vsel %vm4659_vm6, %v4232_v44, %v3211_v45  ;;  %v2872_v63 = vsel %vm4484_vm2, %v2867_v47, %v2871_v48  ;;  %v4178_v47 = vld [vmem:[%s4473_s22 + $0x24] sm:$0xe] }
 0x216   : > { %2279 = vst.msk [vmem:[#allocation2 + $0x4c] sm:$0xf] %vm2259_vm11, %v2202_v57  ;;  %v4224_v56 = vrot.slane %v4178_v47, 9  ;;  %v4346_v47 = vld [vmem:[%s6044_s1] sm:$0xff] }
 0x217   : > { %2287 = vst.msk [vmem:[#allocation2 + $0x6c] sm:$0xf] %vm2259_vm11, %v2218_v61  ;;  %v2658_v61 = vshrl.u32 %v4142_v50, 16  ;;  %v2862_v2 = vsel %vm4484_vm2, %v2857_v53, %v2861_v29 }
 0x219   : > { %v2660_v9 = vrot.slane %v2658_v61, 4 }
 0x21a   : > { %3276 = vrot.lane.b32.xlu1 %v3180_v62, %s4423_s30  ;;  %v2661_v62 = vshll.u32 %v4142_v50, 16 }
 0x21b   : > { %3274 = vrot.lane.b32.xlu0 %v3177_v55, %s4423_s30  ;;  %3260 = vrot.lane.b32.xlu2 %v3152_v3, %s4423_s30  ;;  %v2571_v55 = vshll.u32 %v4131_v54, 16  ;;  %v2562_v3 = vshrl.u32 %v4130_v58, 16  ;;  %v4191_v58 = vld [vmem:[%s4473_s22 + $0x58] sm:$0xf] }
 0x21c   : > { %v2210_v6 = vpop.permute.xlu1 %2209  ;;  %v3183_v52 = vrot.slane %v4191_v58, 5 }
 0x21d   : > { %2283 = vst.msk [vmem:[#allocation2 + $0x5c] sm:$0xf] %vm2259_vm11, %v2210_v6  ;;  %v2208_v10 = vpop.permute.xlu0 %2207  ;;  %v2224_v12 = vpop.permute.xlu2 %2223  ;;  %v4204_v6 = vld [vmem:[%s4473_s22 + $0x8c] sm:$0x1]  ;;  %v2564_v19 = vrot.slane %v2562_v3, 4 }
 0x21e   : > { %2282 = vst.msk [vmem:[#allocation2 + $0x58] sm:$0xf] %vm2259_vm11, %v2208_v10  ;;  %v2663_v10 = vrot.slane %v2661_v62, 5  ;;  %v3214_v18 = vrot.slane %v4204_v6, 5  ;;  %v3185_v4 = vrot.slane %v3183_v52, 4 }
 0x21f   : > { %2290 = vst.msk [vmem:[#allocation2 + $0x78] sm:$0xf] %vm2259_vm11, %v2224_v12  ;;  %v4143_v12 = vld [vmem:[%s4473_s22 + $0x58] sm:$0xf]  ;;  %v4169_v6 = vld [vmem:[%s4473_s22 + $0xc0] sm:$0xf] }
 0x220   : > { %v2664_v23 = vor.u32 %v2663_v10, %v2660_v9  ;;  %v2667_v24 = vshll.u32 %v4143_v12, 16  ;;  %v2671_v29 = vshrl.u32 %v4143_v12, 16  ;;  %v4158_v9 = vld [vmem:[%s4473_s22 + $0x94] sm:$0xf]  ;;  %v4115_v12 = vld [vmem:[%s4473_s22 + $0x90] sm:$0xf] }
 0x221   : > { %v2874_v13 = vshrl.u32 %v4169_v6, 16 }
 0x222   : > { %2412 = vrot.lane.b32.xlu1 %v4121_v14, %s4421_s28  ;;  %v2573_v14 = vrot.slane %v2571_v55, 5  ;;  %v2665_v34 = vrot.slane %v2664_v23, 4  ;;  %v2669_v36 = vrot.slane %v2667_v24, 5  ;;  %v2673_v40 = vrot.slane %v2671_v29, 4  ;;  %v4192_v55 = vld [vmem:[%s4473_s22 + $0x5c] sm:$0x1] }
 0x223   : > { %2398 = vrot.lane.b32.xlu0 %v4114_v17, %s4421_s28  ;;  %2396 = vrot.lane.b32.xlu2 %v4113_v21, %s4421_s28  ;;  %v3213_v17 = vrot.slane %v3211_v45, 4  ;;  %v3186_v5 = vrot.slane %v4192_v55, 5  ;;  %v2876_v23 = vrot.slane %v2874_v13, 4  ;;  %v4159_v29 = vld [vmem:[%s4473_s22 + $0x98] sm:$0x1] }
 0x224   : > { %v2216_v27 = vpop.permute.xlu1 %2215  ;;  %v2670_v43 = vsel %vm4484_vm2, %v2665_v34, %v2669_v36  ;;  %v2674_v49 = vor.u32 %v2673_v40, %v2669_v36  ;;  %v4134_v13 = vld [vmem:[%s4473_s22 + $0x34] sm:$0xf] }
 0x225   : > { %2286 = vst.msk [vmem:[#allocation2 + $0x68] sm:$0xf] %vm2259_vm11, %v2216_v27  ;;  %v2214_v32 = vpop.permute.xlu0 %2213  ;;  %v2363_v37 = vpop.permute.xlu2 %2362  ;;  %v2578_v27 = vor.u32 %v2577_v15, %v2573_v14  ;;  %v3215_v31 = vsel %vm4659_vm6, %v3213_v17, %v3214_v18  ;;  %v3187_v15 = vsel %vm4659_vm6, %v3185_v4, %v3186_v5  ;;  %v2791_v17 = vshrl.u32 %v4158_v9, 16  ;;  %v3423_v18 = vld [vmem:[%s6044_s1 + $0x10] sm:$0x3] }
 0x226   : > { %2285 = vst.msk [vmem:[#allocation2 + $0x64] sm:$0xf] %vm2259_vm11, %v2214_v32  ;;  %v2568_v32 = vor.u32 %v2567_v20, %v2564_v19 }
 0x227   : > { %2458 = vst.msk [vmem:[#allocation2 + $0x4] sm:$0xf] %vm2456_vm12, %v2363_v37  ;;  %v2579_v37 = vrot.slane %v2578_v27, 4 }
 0x228   : > { %v2569_v39 = vrot.slane %v2568_v32, 4  ;;  %v2793_v32 = vrot.slane %v2791_v17, 4 }
 0x22a   : > { %2959 = vrot.lane.b32.xlu1 %v2776_v35, %s4422_s29  ;;  %v2583_v35 = vrot.slane %v2581_v28, 5  ;;  %v2574_v48 = vsel %vm4484_vm2, %v2569_v39, %v2573_v14  ;;  %v2877_v14 = vshll.u32 %v4169_v6, 16  ;;  %v4170_v28 = vld [vmem:[%s4473_s22 + $0xc4] sm:$0xf] }
 0x22b   : > { %2957 = vrot.lane.b32.xlu0 %v2766_v30, %s4422_s29  ;;  %2414 = vrot.lane.b32.xlu2 %v4122_v42, %s4421_s28  ;;  %v4179_v30 = vld [vmem:[%s4473_s22 + $0x28] sm:$0xf]  ;;  %v4144_v42 = vld [vmem:[%s4473_s22 + $0x5c] sm:$0x1]  ;;  %v2883_v40 = vshll.u32 %v4170_v28, 16 }
 0x22c   : > { %v2222_v46 = vpop.permute.xlu1 %2221  ;;  %v3155_v44 = vrot.slane %v4179_v30, 5  ;;  %v2584_v45 = vsel %vm4484_vm2, %v2579_v37, %v2583_v35  ;;  %v2677_v50 = vshll.u32 %v4144_v42, 16  ;;  %v2879_v24 = vrot.slane %v2877_v14, 5  ;;  %v4347_v30 = vld [vmem:[%s6044_s1 + $0x8] sm:$0xff]  ;;  %v4218_v14 = vld [vmem:[%s4473_s22 + $0xc4] sm:$0xf] }
 0x22d   : > { %2289 = vst.msk [vmem:[#allocation2 + $0x74] sm:$0xf] %vm2259_vm11, %v2222_v46  ;;  %v2220_v51 = vpop.permute.xlu0 %2219  ;;  %v2369_v57 = vpop.permute.xlu2 %2368  ;;  %v4180_v46 = vld [vmem:[%s4473_s22 + $0x2c] sm:$0x1] }
 0x22e   : > { %2288 = vst.msk [vmem:[#allocation2 + $0x70] sm:$0xf] %vm2259_vm11, %v2220_v51  ;;  %v3157_v51 = vrot.slane %v3155_v44, 4  ;;  %v3158_v53 = vrot.slane %v4180_v46, 5  ;;  %v2679_v60 = vrot.slane %v2677_v50, 5  ;;  %v2880_v39 = vor.u32 %v2879_v24, %v2876_v23 }
 0x22f   : > { %2461 = vst.msk [vmem:[#allocation2 + $0x10] sm:$0xf] %vm2456_vm12, %v2369_v57  ;;  %v4206_v50 = vld [vmem:[%s4473_s22 + $0x94] sm:$0xf]  ;;  %v2595_v23 = vshll.u32 %v4134_v13, 16 }
 0x230   : > { %v3159_v62 = vsel %vm4659_vm6, %v3157_v51, %v3158_v53 }
 0x232   : > { %3294 = vrot.lane.b32.xlu1 %v3212_v59, %s4423_s30  ;;  %v2675_v59 = vrot.slane %v2674_v49, 4  ;;  %v2885_v49 = vrot.slane %v2883_v40, 5 }
 0x233   : > { %2975 = vrot.lane.b32.xlu0 %v2872_v63, %s4422_s29  ;;  %2973 = vrot.lane.b32.xlu2 %v2862_v2, %s4422_s29  ;;  %v3156_v63 = vsel %vm4659_vm6, %v4224_v56, %v3155_v44  ;;  %v4190_v2 = vld [vmem:[%s4473_s22 + $0x54] sm:$0xe]  ;;  %v2887_v44 = vshrl.u32 %v4170_v28, 16  ;;  %v4133_v56 = vld [vmem:[%s4473_s22 + $0x30] sm:$0xf]  ;;  %v3246_v28 = vrot.slane %v4218_v14, 5 }
 0x234   : > { %v2361_v11 = vpop.permute.xlu1 %2360  ;;  %v2680_v0 = vsel %vm4484_vm2, %v2675_v59, %v2679_v60  ;;  %v4228_v8 = vrot.slane %v4190_v2, 9  ;;  %v3218_v60 = vrot.slane %v4206_v50, 5  ;;  %v2586_v55 = vshrl.u32 %v4133_v56, 16 }
 0x235   : > { %2457 = vst.msk [vmem:[#allocation2] sm:$0xf] %vm2456_vm12, %v2361_v11  ;;  %v2226_v16 = vpop.permute.xlu0 %2225  ;;  %v2375_v21 = vpop.permute.xlu2 %2374  ;;  %v4157_v11 = vld [vmem:[%s4473_s22 + $0x90] sm:$0xf]  ;;  %v2889_v59 = vrot.slane %v2887_v44, 4  ;;  %v3248_v40 = vrot.slane %v3246_v28, 4 }
 0x236   : > { %2291 = vst.msk [vmem:[#allocation2 + $0x7c] sm:$0xf] %vm2259_vm11, %v2226_v16  ;;  %v2787_v16 = vshll.u32 %v4158_v9, 16  ;;  %v3184_v19 = vsel %vm4659_vm6, %v4228_v8, %v3183_v52  ;;  %v2778_v20 = vshrl.u32 %v4157_v11, 16  ;;  %v4207_v52 = vld [vmem:[%s4473_s22 + $0x98] sm:$0x1] }
 0x237   : > { %2464 = vst.msk [vmem:[#allocation2 + $0x1c] sm:$0xf] %vm2456_vm12, %v2375_v21  ;;  %v2781_v21 = vshll.u32 %v4157_v11, 16  ;;  %v2890_v5 = vor.u32 %v2889_v59, %v2885_v49  ;;  %v3221_v8 = vrot.slane %v4207_v52, 5 }
 0x238   : > { %v2780_v36 = vrot.slane %v2778_v20, 4 }
 0x239   : > { %v2891_v17 = vrot.slane %v2890_v5, 4 }
 0x23a   : > { %3312 = vrot.lane.b32.xlu1 %v3243_v22, %s4423_s30  ;;  %v3513_v22 = vunpack.c.l.b16 %v3423_v18 }
 0x23b   : > { %3310 = vrot.lane.b32.xlu0 %v3240_v26, %s4423_s30  ;;  %3296 = vrot.lane.b32.xlu2 %v3215_v31, %s4423_s30  ;;  %v5624_v31 = vrot.slane %v2787_v16, 5 }
 0x23c   : > { %v2367_v33 = vpop.permute.xlu1 %2366  ;;  %v3516_v26 = vpack.c.b16 %v3513_v22, %v3513_v22 }
 0x23d   : > { %2460 = vst.msk [vmem:[#allocation2 + $0xc] sm:$0xf] %vm2456_vm12, %v2367_v33  ;;  %v2365_v38 = vpop.permute.xlu0 %2364  ;;  %v2381_v41 = vpop.permute.xlu2 %2380  ;;  %v2783_v33 = vrot.slane %v2781_v21, 5  ;;  %v2794_v42 = vor.u32 %v2793_v32, %v5624_v31  ;;  %v2599_v32 = vshrl.u32 %v4134_v13, 16 }
 0x23e   : > { %2459 = vst.msk [vmem:[#allocation2 + $0x8] sm:$0xf] %vm2456_vm12, %v2365_v38  ;;  %v3570_v37 = vsel %vm3568_vm13, %v3516_v26, 0  ;;  %v4124_v38 = vld [vmem:[%s4473_s22 + $0xc4] sm:$0xf] }
 0x23f   : > { %2467 = vst.msk [vmem:[#allocation2 + $0x28] sm:$0xf] %vm2456_vm12, %v2381_v41  ;;  %4349 = vmatpush.bf16.msra.mxu2 %v3570_v37  ;;  %4350 = vmatpush.bf16.msra.mxu3 %v3570_v37  ;;  %v4123_v41 = vld [vmem:[%s4473_s22 + $0xc0] sm:$0xf]  ;;  %v2784_v46 = vor.u32 %v2783_v33, %v2780_v36  ;;  %v2795_v53 = vrot.slane %v2794_v42, 4 }
 0x240   : > { %3577 = vmatpush.bf16.msra.mxu0 %v3570_v37  ;;  %4348 = vmatpush.bf16.msra.mxu1 %v3570_v37  ;;  %v4217_v33 = vld [vmem:[%s4473_s22 + $0xc0] sm:$0xe]  ;;  %v4147_v42 = vld [vmem:[%s4473_s22 + $0x68] sm:$0x1] }
 0x241   : > { %v2785_v58 = vrot.slane %v2784_v46, 4  ;;  %v4237_v46 = vrot.slane %v4217_v33, 9  ;;  %v4173_v33 = vld [vmem:[%s4473_s22 + $0xd0] sm:$0xf] }
 0x242   : > { %2941 = vrot.lane.b32.xlu1 %v2670_v43, %s4422_s29  ;;  %v2797_v43 = vshll.u32 %v4159_v29, 16 }
 0x243   : > { %2927 = vrot.lane.b32.xlu0 %v2584_v45, %s4422_s29  ;;  %2925 = vrot.lane.b32.xlu2 %v2574_v48, %s4422_s29  ;;  %v4116_v45 = vld [vmem:[%s4473_s22 + $0x94] sm:$0xf]  ;;  %v2881_v48 = vrot.slane %v2880_v39, 4  ;;  %v2790_v4 = vsel %vm4484_vm2, %v2785_v58, %v5624_v31 }
 0x244   : > { %v2373_v54 = vpop.permute.xlu1 %2372  ;;  %4352 = vmatpush.bf16.msra.mxu2 %v4347_v30  ;;  %4353 = vmatpush.bf16.msra.mxu3 %v4347_v30 }
 0x245   : > { %2463 = vst.msk [vmem:[#allocation2 + $0x18] sm:$0xf] %vm2456_vm12, %v2373_v54  ;;  %v2371_v57 = vpop.permute.xlu0 %2370  ;;  %v2387_v61 = vpop.permute.xlu2 %2386  ;;  %v2799_v54 = vrot.slane %v2797_v43, 5  ;;  %3578 = vmatpush.bf16.msra.mxu0 %v4347_v30  ;;  %4351 = vmatpush.bf16.msra.mxu1 %v4347_v30 }
 0x246   : > { %2462 = vst.msk [vmem:[#allocation2 + $0x14] sm:$0xf] %vm2456_vm12, %v2371_v57 }
 0x247   : > { %2470 = vst.msk [vmem:[#allocation2 + $0x34] sm:$0xf] %vm2456_vm12, %v2387_v61  ;;  %v2800_v2 = vsel %vm4484_vm2, %v2795_v53, %v2799_v54  ;;  %v2701_v53 = vshll.u32 %v4147_v42, 16 }
 0x248   : > { %4355 = vmatpush.bf16.msra.mxu2 %v4346_v47  ;;  %4356 = vmatpush.bf16.msra.mxu3 %v4346_v47 }
 0x249   : > { %3579 = vmatpush.bf16.msra.mxu0 %v4346_v47  ;;  %4354 = vmatpush.bf16.msra.mxu1 %v4346_v47  ;;  %v2601_v47 = vrot.slane %v2599_v32, 4 }
 0x24a   : > { %3264 = vrot.lane.b32.xlu1 %v3159_v62, %s4423_s30  ;;  %v4171_v62 = vld [vmem:[%s4473_s22 + $0xc8] sm:$0x1] }
 0x24b   : > { %3262 = vrot.lane.b32.xlu0 %v3156_v63, %s4423_s30  ;;  %2943 = vrot.lane.b32.xlu2 %v2680_v0, %s4422_s29  ;;  %v2886_v63 = vsel %vm4484_vm2, %v2881_v48, %v2885_v49  ;;  %v2589_v0 = vshll.u32 %v4133_v56, 16  ;;  %v2893_v6 = vshll.u32 %v4171_v62, 16  ;;  %v4135_v49 = vld [vmem:[%s4473_s22 + $0x38] sm:$0x1] }
 0x24c   : > { %v2379_v3 = vpop.permute.xlu1 %2378  ;;  %v2605_v59 = vshll.u32 %v4135_v49, 16 }
 0x24d   : > { %2466 = vst.msk [vmem:[#allocation2 + $0x24] sm:$0xf] %vm2456_vm12, %v2379_v3  ;;  %v2377_v7 = vpop.permute.xlu0 %2376  ;;  %v2409_v10 = vpop.permute.xlu2 %2408  ;;  %v4205_v3 = vld [vmem:[%s4473_s22 + $0x90] sm:$0xe]  ;;  %v2591_v11 = vrot.slane %v2589_v0, 5  ;;  %v2895_v18 = vrot.slane %v2893_v6, 5 }
 0x24e   : > { %2465 = vst.msk [vmem:[#allocation2 + $0x20] sm:$0xf] %vm2456_vm12, %v2377_v7  ;;  %v3220_v7 = vrot.slane %v3218_v60, 4  ;;  %v4233_v9 = vrot.slane %v4205_v3, 9  ;;  %v4193_v6 = vld [vmem:[%s4473_s22 + $0x60] sm:$0xe] }
 0x24f   : > { %2481 = vst.msk [vmem:[#allocation2 + $0x60] sm:$0xf] %vm2456_vm12, %v2409_v10  ;;  %v2588_v10 = vrot.slane %v2586_v55, 4  ;;  %v2896_v36 = vsel %vm4484_vm2, %v2891_v17, %v2895_v18  ;;  %v4182_v55 = vld [vmem:[%s4473_s22 + $0x34] sm:$0xf] }
 0x250   : > { %v3222_v20 = vsel %vm4659_vm6, %v3220_v7, %v3221_v8  ;;  %v4194_v7 = vld [vmem:[%s4473_s22 + $0x64] sm:$0xf]  ;;  %v3162_v8 = vrot.slane %v4182_v55, 5  ;;  %v4160_v18 = vld [vmem:[%s4473_s22 + $0x9c] sm:$0xf] }
 0x251   : > { %v2592_v22 = vor.u32 %v2591_v11, %v2588_v10  ;;  %v4181_v11 = vld [vmem:[%s4473_s22 + $0x30] sm:$0xe]  ;;  %v3190_v13 = vrot.slane %v4194_v7, 5 }
 0x252   : > { %2400 = vrot.lane.b32.xlu1 %v4115_v12, %s4421_s28 }
 0x253   : > { %3280 = vrot.lane.b32.xlu0 %v3187_v15, %s4423_s30  ;;  %3278 = vrot.lane.b32.xlu2 %v3184_v19, %s4423_s30  ;;  %v4146_v15 = vld [vmem:[%s4473_s22 + $0x64] sm:$0xf]  ;;  %v4145_v19 = vld [vmem:[%s4473_s22 + $0x60] sm:$0xf]  ;;  %v2593_v37 = vrot.slane %v2592_v22, 4 }
 0x254   : > { %v2385_v27 = vpop.permute.xlu1 %2384  ;;  %v2691_v24 = vshll.u32 %v4146_v15, 16  ;;  %v2695_v26 = vshrl.u32 %v4146_v15, 16  ;;  %v2682_v29 = vshrl.u32 %v4145_v19, 16  ;;  %v2685_v31 = vshll.u32 %v4145_v19, 16 }
 0x255   : > { %2469 = vst.msk [vmem:[#allocation2 + $0x30] sm:$0xf] %vm2456_vm12, %v2385_v27  ;;  %v2383_v34 = vpop.permute.xlu0 %2382  ;;  %v2956_v35 = vpop.permute.xlu2 %2955  ;;  %v3219_v27 = vsel %vm4659_vm6, %v4233_v9, %v3218_v60  ;;  %v4183_v9 = vld [vmem:[%s4473_s22 + $0x38] sm:$0x1] }
 0x256   : > { %2468 = vst.msk [vmem:[#allocation2 + $0x2c] sm:$0xf] %vm2456_vm12, %v2383_v34  ;;  %v4219_v34 = vld [vmem:[%s4473_s22 + $0xc8] sm:$0x1]  ;;  %v2693_v30 = vrot.slane %v2691_v24, 5  ;;  %v2684_v43 = vrot.slane %v2682_v29, 4 }
 0x257   : > { %v2687_v44 = vrot.slane %v2685_v31, 5  ;;  %v3165_v17 = vrot.slane %v4183_v9, 5  ;;  %v2802_v24 = vshrl.u32 %v4160_v18, 16  ;;  %v4195_v29 = vld [vmem:[%s4473_s22 + $0x68] sm:$0x1] }
 0x259   : > { %v2688_v56 = vor.u32 %v2687_v44, %v2684_v43  ;;  %v2804_v31 = vrot.slane %v2802_v24, 4  ;;  %v2907_v43 = vshll.u32 %v4173_v33, 16  ;;  %v2911_v44 = vshrl.u32 %v4173_v33, 16 }
 0x25a   : > { %2418 = vrot.lane.b32.xlu1 %v4124_v38, %s4421_s28  ;;  %v2697_v38 = vrot.slane %v2695_v26, 4  ;;  %v2805_v26 = vshll.u32 %v4160_v18, 16 }
 0x25b   : > { %2416 = vrot.lane.b32.xlu0 %v4123_v41, %s4421_s28  ;;  %2402 = vrot.lane.b32.xlu2 %v4116_v45, %s4421_s28  ;;  %v3249_v41 = vrot.slane %v4219_v34, 5 }
 0x25c   : > { %v2395_v51 = vpop.permute.xlu1 %2394  ;;  %v2807_v32 = vrot.slane %v2805_v26, 5  ;;  %v4208_v26 = vld [vmem:[%s4473_s22 + $0x9c] sm:$0xe] }
 0x25d   : > { %2474 = vst.msk [vmem:[#allocation2 + $0x44] sm:$0xf] %vm2456_vm12, %v2395_v51  ;;  %v2393_v57 = vpop.permute.xlu0 %2392  ;;  %v3291_v61 = vpop.permute.xlu2 %3290  ;;  %v2698_v51 = vor.u32 %v2697_v38, %v2693_v30  ;;  %v3250_v54 = vsel %vm4659_vm6, %v3248_v40, %v3249_v41  ;;  %v4172_v38 = vld [vmem:[%s4473_s22 + $0xcc] sm:$0xf]  ;;  %v4234_v33 = vrot.slane %v4208_v26, 9 }
 0x25e   : > { %2473 = vst.msk [vmem:[#allocation2 + $0x40] sm:$0xf] %vm2456_vm12, %v2393_v57  ;;  %v3247_v57 = vsel %vm4659_vm6, %v4237_v46, %v3246_v28  ;;  %v2808_v41 = vor.u32 %v2807_v32, %v2804_v31  ;;  %v2898_v46 = vshrl.u32 %v4172_v38, 16 }
 0x25f   : > { %3035 = vst.msk [vmem:[#allocation2 + $0x44] sm:$0xf] %vm3017_vm14, %v2956_v35  ;;  %v2597_v35 = vrot.slane %v2595_v23, 5  ;;  %v2699_v60 = vrot.slane %v2698_v51, 4 }
 0x261   : > { %v2598_v50 = vsel %vm4484_vm2, %v2593_v37, %v2597_v35  ;;  %v2602_v58 = vor.u32 %v2601_v47, %v2597_v35  ;;  %v3192_v35 = vrot.slane %v3190_v13, 4  ;;  %v2901_v47 = vshll.u32 %v4172_v38, 16 }
 0x262   : > { %2977 = vrot.lane.b32.xlu1 %v2886_v63, %s4422_s29  ;;  %v2689_v63 = vrot.slane %v2688_v56, 4 }
 0x263   : > { %2963 = vrot.lane.b32.xlu0 %v2800_v2, %s4422_s29  ;;  %2961 = vrot.lane.b32.xlu2 %v2790_v4, %s4422_s29  ;;  %v2603_v0 = vrot.slane %v2602_v58, 4  ;;  %v2607_v2 = vrot.slane %v2605_v59, 5  ;;  %v4174_v58 = vld [vmem:[%s4473_s22 + $0xd4] sm:$0x1]  ;;  %v2900_v59 = vrot.slane %v2898_v46, 4 }
 0x264   : > { %v2954_v12 = vpop.permute.xlu1 %2953  ;;  %v2694_v5 = vsel %vm4484_vm2, %v2689_v63, %v2693_v30  ;;  %v3193_v30 = vrot.slane %v4195_v29, 5 }
 0x265   : > { %3034 = vst.msk [vmem:[#allocation2 + $0x40] sm:$0xf] %vm3017_vm14, %v2954_v12  ;;  %v2411_v16 = vpop.permute.xlu0 %2410  ;;  %v3309_v21 = vpop.permute.xlu2 %3308  ;;  %v2608_v10 = vsel %vm4484_vm2, %v2603_v0, %v2607_v2  ;;  %v4229_v12 = vrot.slane %v4193_v6, 9  ;;  %v2917_v2 = vshll.u32 %v4174_v58, 16 }
 0x266   : > { %2482 = vst.msk [vmem:[#allocation2 + $0x64] sm:$0xf] %vm2456_vm12, %v2411_v16  ;;  %v3164_v16 = vrot.slane %v3162_v8, 4  ;;  %v3194_v49 = vsel %vm4659_vm6, %v3192_v35, %v3193_v30 }
 0x267   : > { %3371 = vst.msk [vmem:[#allocation2 + $0x40] sm:$0xf] %vm3354_vm15, %v3291_v61  ;;  %v2703_v61 = vrot.slane %v2701_v53, 5  ;;  %v3191_v23 = vsel %vm4659_vm6, %v4229_v12, %v3190_v13  ;;  %v2909_v53 = vrot.slane %v2907_v43, 5  ;;  %v2919_v9 = vrot.slane %v2917_v2, 5 }
 0x268   : > { %v4209_v12 = vld [vmem:[%s4473_s22 + $0xa0] sm:$0xf] }
 0x269   : > { %v2704_v4 = vsel %vm4484_vm2, %v2699_v60, %v2703_v61  ;;  %v2903_v60 = vrot.slane %v2901_v47, 5 }
 0x26a   : > { %3300 = vrot.lane.b32.xlu1 %v3222_v20, %s4423_s30 }
 0x26b   : > { %3298 = vrot.lane.b32.xlu0 %v3219_v27, %s4423_s30  ;;  %2979 = vrot.lane.b32.xlu2 %v2896_v36, %s4422_s29  ;;  %v3166_v27 = vsel %vm4659_vm6, %v3164_v16, %v3165_v17  ;;  %v4161_v36 = vld [vmem:[%s4473_s22 + $0xa0] sm:$0xf] }
 0x26c   : > { %v2972_v39 = vpop.permute.xlu1 %2971  ;;  %v2811_v42 = vshll.u32 %v4161_v36, 16 }
 0x26d   : > { %3043 = vst.msk [vmem:[#allocation2 + $0x64] sm:$0xf] %vm3017_vm14, %v2972_v39  ;;  %v2970_v45 = vpop.permute.xlu0 %2969  ;;  %v2938_v48 = vpop.permute.xlu2 %2937  ;;  %v4118_v39 = vld [vmem:[%s4473_s22 + $0xa0] sm:$0xf] }
 0x26e   : > { %3042 = vst.msk [vmem:[#allocation2 + $0x60] sm:$0xf] %vm3017_vm14, %v2970_v45  ;;  %v4117_v45 = vld [vmem:[%s4473_s22 + $0x9c] sm:$0xf]  ;;  %v2813_v51 = vrot.slane %v2811_v42, 5 }
 0x26f   : > { %3380 = vst.msk [vmem:[#allocation2 + $0x64] sm:$0xf] %vm3354_vm15, %v3309_v21  ;;  %v4225_v21 = vrot.slane %v4181_v11, 9 }
 0x270   : > { %3026 = vst.msk [vmem:[#allocation2 + $0x20] sm:$0xf] %vm3017_vm14, %v2938_v48  ;;  %v2815_v48 = vshrl.u32 %v4161_v36, 16 }
 0x271   : > { %v3163_v28 = vsel %vm4659_vm6, %v4225_v21, %v3162_v8  ;;  %v4221_v21 = vld [vmem:[%s4473_s22 + $0xd0] sm:$0xf] }
 0x272   : > { %2929 = vrot.lane.b32.xlu1 %v2598_v50, %s4422_s29  ;;  %v2809_v50 = vrot.slane %v2808_v41, 4 }
 0x273   : > { %3316 = vrot.lane.b32.xlu0 %v3250_v54, %s4423_s30  ;;  %3314 = vrot.lane.b32.xlu2 %v3247_v57, %s4423_s30  ;;  %v2913_v54 = vrot.slane %v2911_v44, 4  ;;  %v4136_v44 = vld [vmem:[%s4473_s22 + $0x3c] sm:$0xf] }
 0x274   : > { %v3307_v62 = vpop.permute.xlu1 %3306  ;;  %v2814_v55 = vsel %vm4484_vm2, %v2809_v50, %v2813_v51  ;;  %v2610_v46 = vshrl.u32 %v4136_v44, 16  ;;  %v2613_v47 = vshll.u32 %v4136_v44, 16 }
 0x275   : > { %3379 = vst.msk [vmem:[#allocation2 + $0x60] sm:$0xf] %vm3354_vm15, %v3307_v62  ;;  %v3293_v52 = vpop.permute.xlu0 %3292  ;;  %v3261_v3 = vpop.permute.xlu2 %3260  ;;  %v2817_v62 = vrot.slane %v2815_v48, 4  ;;  %v2914_v0 = vor.u32 %v2913_v54, %v2909_v53 }
 0x276   : > { %3372 = vst.msk [vmem:[#allocation2 + $0x44] sm:$0xf] %vm3354_vm15, %v3293_v52  ;;  %v4162_v52 = vld [vmem:[%s4473_s22 + $0xa4] sm:$0x1] }
 0x277   : > { %v2818_v6 = vor.u32 %v2817_v62, %v2813_v51  ;;  %v2821_v7 = vshll.u32 %v4162_v52, 16  ;;  %v2915_v8 = vrot.slane %v2914_v0, 4  ;;  %v4149_v51 = vld [vmem:[%s4473_s22 + $0x70] sm:$0xf]  ;;  %v4109_v0 = vld [vmem:[%s4473_s22 + $0x6c] sm:$0xf] }
 0x279   : > { %v2823_v16 = vrot.slane %v2821_v7, 5  ;;  %v2920_v18 = vsel %vm4484_vm2, %v2915_v8, %v2919_v9 }
 0x27a   : > { %2947 = vrot.lane.b32.xlu1 %v2704_v4, %s4422_s29  ;;  %v2904_v4 = vor.u32 %v2903_v60, %v2900_v59  ;;  %v2612_v60 = vrot.slane %v2610_v46, 4 }
 0x27b   : > { %2945 = vrot.lane.b32.xlu0 %v2694_v5, %s4422_s29  ;;  %2931 = vrot.lane.b32.xlu2 %v2608_v10, %s4422_s29  ;;  %v4125_v5 = vld [vmem:[%s4473_s22 + $0xcc] sm:$0xf] }
 0x27c   : > { %v2924_v14 = vpop.permute.xlu1 %2923  ;;  %v4342_v15 = vld [vmem:[#allocation2 + $0x60] sm:$0xff]  ;;  %v2905_v11 = vrot.slane %v2904_v4, 4  ;;  %v2719_v4 = vshrl.u32 %v4149_v51, 16 }
 0x27d   : > { %3019 = vst.msk [vmem:[#allocation2 + $0x4] sm:$0xf] %vm3017_vm14, %v2924_v14  ;;  %v2922_v19 = vpop.permute.xlu0 %2921  ;;  %v4338_v20 = vld [vmem:[#allocation2 + $0x40] sm:$0xff]  ;;  %4323 = vmatmul.msk.bf16.vlgmr.msra.gmra.mxu3 %vm3519_vm0, %v4342_v15  ;;  %v2397_v22 = vpop.permute.xlu2 %2396  ;;  %v2819_v15 = vrot.slane %v2818_v6, 4 }
 0x27e   : > { %3018 = vst.msk [vmem:[#allocation2] sm:$0xf] %vm3017_vm14, %v2922_v19  ;;  %4319 = vmatmul.msk.bf16.vlgmr.msra.gmra.mxu2 %vm3519_vm0, %v4338_v20  ;;  %v2910_v19 = vsel %vm4484_vm2, %v2905_v11, %v2909_v53  ;;  %v4220_v20 = vld [vmem:[%s4473_s22 + $0xcc] sm:$0xe]  ;;  %v4138_v53 = vld [vmem:[%s4473_s22 + $0x44] sm:$0x1] }
 0x27f   : > { %3356 = vst.msk [vmem:[#allocation2 + $0x4] sm:$0xf] %vm3354_vm15, %v3261_v3  ;;  %v4126_v3 = vld [vmem:[%s4473_s22 + $0xd0] sm:$0xf]  ;;  %v2824_v24 = vsel %vm4484_vm2, %v2819_v15, %v2823_v16  ;;  %v2721_v16 = vrot.slane %v2719_v4, 4 }
 0x280   : > { %2475 = vst.msk [vmem:[#allocation2 + $0x48] sm:$0xf] %vm2456_vm12, %v2397_v22  ;;  %v3225_v22 = vrot.slane %v4209_v12, 5 }
 0x282   : > { %3282 = vrot.lane.b32.xlu1 %v3191_v23, %s4423_s30  ;;  %v4210_v23 = vld [vmem:[%s4473_s22 + $0xa4] sm:$0x1]  ;;  %v3227_v31 = vrot.slane %v3225_v22, 4  ;;  %v3226_v43 = vsel %vm4659_vm6, %v4234_v33, %v3225_v22 }
 0x283   : > { %3268 = vrot.lane.b32.xlu0 %v3166_v27, %s4423_s30  ;;  %3266 = vrot.lane.b32.xlu2 %v3163_v28, %s4423_s30  ;;  %v4238_v27 = vrot.slane %v4220_v20, 9  ;;  %v3253_v28 = vrot.slane %v4221_v21, 5  ;;  %v3228_v32 = vrot.slane %v4210_v23, 5  ;;  %v4186_v22 = vld [vmem:[%s4473_s22 + $0x44] sm:$0x1] }
 0x284   : > { %v3259_v34 = vpop.permute.xlu1 %3258  ;;  %v4184_v23 = vld [vmem:[%s4473_s22 + $0x3c] sm:$0xe] }
 0x285   : > { %3355 = vst.msk [vmem:[#allocation2] sm:$0xf] %vm3354_vm15, %v3259_v34  ;;  %v2940_v37 = vpop.permute.xlu0 %2939  ;;  %v2415_v40 = vpop.permute.xlu2 %2414  ;;  %v4148_v34 = vld [vmem:[%s4473_s22 + $0x6c] sm:$0xf]  ;;  %v3254_v30 = vsel %vm4659_vm6, %v4238_v27, %v3253_v28  ;;  %v3255_v58 = vrot.slane %v3253_v28, 4 }
 0x286   : > { %3027 = vst.msk [vmem:[#allocation2 + $0x24] sm:$0xf] %vm3017_vm14, %v2940_v37  ;;  %v4137_v37 = vld [vmem:[%s4473_s22 + $0x40] sm:$0xf]  ;;  %v2706_v38 = vshrl.u32 %v4148_v34, 16 }
 0x287   : > { %2484 = vst.msk [vmem:[#allocation2 + $0x6c] sm:$0xf] %vm2456_vm12, %v2415_v40  ;;  %v3229_v40 = vsel %vm4659_vm6, %v3227_v31, %v3228_v32  ;;  %v2619_v41 = vshll.u32 %v4137_v37, 16  ;;  %v2623_v42 = vshrl.u32 %v4137_v37, 16  ;;  %v4226_v32 = vrot.slane %v4184_v23, 9 }
 0x288   : > { %v2708_v48 = vrot.slane %v2706_v38, 4 }
 0x289   : > { %v2621_v54 = vrot.slane %v2619_v41, 5  ;;  %v4198_v41 = vld [vmem:[%s4473_s22 + $0x74] sm:$0x1] }
 0x28a   : > { %2406 = vrot.lane.b32.xlu1 %v4118_v39, %s4421_s28  ;;  %v2709_v39 = vshll.u32 %v4148_v34, 16  ;;  %v4197_v34 = vld [vmem:[%s4473_s22 + $0x70] sm:$0xf]  ;;  %v3200_v46 = vrot.slane %v4198_v41, 5 }
 0x28b   : > { %2404 = vrot.lane.b32.xlu0 %v4117_v45, %s4421_s28  ;;  %3284 = vrot.lane.b32.xlu2 %v3194_v49, %s4423_s30  ;;  %v4222_v45 = vld [vmem:[%s4473_s22 + $0xd4] sm:$0x1] }
 0x28c   : > { %v3277_v56 = vpop.permute.xlu1 %3276  ;;  %v4330_v57 = vld [vmem:[#allocation2] sm:$0xff]  ;;  %v2711_v49 = vrot.slane %v2709_v39, 5  ;;  %v3256_v59 = vrot.slane %v4222_v45, 5 }
 0x28d   : > { %3364 = vst.msk [vmem:[#allocation2 + $0x24] sm:$0xf] %vm3354_vm15, %v3277_v56  ;;  %v3275_v61 = vpop.permute.xlu0 %3274  ;;  %4311 = vmatmul.msk.bf16.vlgmr.msra.gmra.mxu0 %vm3519_vm0, %v4330_v57  ;;  %v2974_v63 = vpop.permute.xlu2 %2973  ;;  %v2625_v56 = vrot.slane %v2623_v42, 4 }
 0x28e   : > { %3363 = vst.msk [vmem:[#allocation2 + $0x20] sm:$0xf] %vm3354_vm15, %v3275_v61  ;;  %v2615_v61 = vrot.slane %v2613_v47, 5  ;;  %v2712_v52 = vor.u32 %v2711_v49, %v2708_v48 }
 0x28f   : > { %v2626_v2 = vor.u32 %v2625_v56, %v2621_v54 }
 0x290   : > { %v2616_v6 = vor.u32 %v2615_v61, %v2612_v60  ;;  %v2713_v7 = vrot.slane %v2712_v52, 4 }
 0x291   : > { %v2627_v11 = vrot.slane %v2626_v2, 4 }
 0x292   : > { %2965 = vrot.lane.b32.xlu1 %v2814_v55, %s4422_s29  ;;  %v2715_v55 = vshll.u32 %v4149_v51, 16  ;;  %v2617_v15 = vrot.slane %v2616_v6, 4 }
 0x293   : > { %2422 = vrot.lane.b32.xlu0 %v4126_v3, %s4421_s28  ;;  %2420 = vrot.lane.b32.xlu2 %v4125_v5, %s4421_s28  ;;  %v2629_v3 = vshll.u32 %v4138_v53, 16  ;;  %v3257_v5 = vsel %vm4659_vm6, %v3255_v58, %v3256_v59 }
 0x294   : > { %v2413_v10 = vpop.permute.xlu1 %2412  ;;  %v2717_v8 = vrot.slane %v2715_v55, 5 }
 0x295   : > { %2483 = vst.msk [vmem:[#allocation2 + $0x68] sm:$0xf] %vm2456_vm12, %v2413_v10  ;;  %v2399_v13 = vpop.permute.xlu0 %2398  ;;  %v4334_v14 = vld [vmem:[#allocation2 + $0x20] sm:$0xff]  ;;  %v3297_v17 = vpop.permute.xlu2 %3296  ;;  %v2631_v12 = vrot.slane %v2629_v3, 5 }
 0x296   : > { %2476 = vst.msk [vmem:[#allocation2 + $0x4c] sm:$0xf] %vm2456_vm12, %v2399_v13  ;;  %4315 = vmatmul.msk.bf16.vlgmr.msra.gmra.mxu1 %vm3519_vm0, %v4334_v14  ;;  %v4185_v13 = vld [vmem:[%s4473_s22 + $0x40] sm:$0xf]  ;;  %v2722_v26 = vor.u32 %v2721_v16, %v2717_v8 }
 0x297   : > { %3044 = vst.msk [vmem:[#allocation2 + $0x68] sm:$0xf] %vm3017_vm14, %v2974_v63  ;;  %v4110_v63 = vld [vmem:[%s4473_s22 + $0x70] sm:$0xf]  ;;  %v3169_v20 = vrot.slane %v4185_v13, 5  ;;  %v2632_v21 = vsel %vm4484_vm2, %v2627_v11, %v2631_v12 }
 0x298   : > { %v2723_v37 = vrot.slane %v2722_v26, 4 }
 0x299   : > { %v3171_v28 = vrot.slane %v3169_v20, 4  ;;  %v3170_v39 = vsel %vm4659_vm6, %v4226_v32, %v3169_v20 }
 0x29a   : > { %2983 = vrot.lane.b32.xlu1 %v2920_v18, %s4422_s29  ;;  %v4150_v18 = vld [vmem:[%s4473_s22 + $0x74] sm:$0x1] }
 0x29b   : > { %2981 = vrot.lane.b32.xlu0 %v2910_v19, %s4422_s29  ;;  %2967 = vrot.lane.b32.xlu2 %v2824_v24, %s4422_s29  ;;  %v2718_v19 = vsel %vm4484_vm2, %v2713_v7, %v2717_v8  ;;  %v2622_v24 = vsel %vm4484_vm2, %v2617_v15, %v2621_v54  ;;  %v2725_v27 = vshll.u32 %v4150_v18, 16  ;;  %v5876_v18 = vld [vmem:[%s6046_s3] ss:$0 sm:$0xff] }
 0x29c   : > { %v2960_v29 = vpop.permute.xlu1 %2959 }
 0x29d   : > { %3037 = vst.msk [vmem:[#allocation2 + $0x4c] sm:$0xf] %vm3017_vm14, %v2960_v29  ;;  %v2958_v36 = vpop.permute.xlu0 %2957  ;;  %v2926_v35 = vpop.permute.xlu2 %2925  ;;  %v3172_v29 = vrot.slane %v4186_v22, 5 }
 0x29e   : > { %3036 = vst.msk [vmem:[#allocation2 + $0x48] sm:$0xf] %vm3017_vm14, %v2958_v36 }
 0x29f   : > { %3374 = vst.msk [vmem:[#allocation2 + $0x4c] sm:$0xf] %vm3354_vm15, %v3297_v17  ;;  %v3173_v38 = vsel %vm4659_vm6, %v3171_v28, %v3172_v29 }
 0x2a0   : > { %3020 = vst.msk [vmem:[#allocation2 + $0x8] sm:$0xf] %vm3017_vm14, %v2926_v35  ;;  %v2727_v35 = vrot.slane %v2725_v27, 5 }
 0x2a2   : > { %3318 = vrot.lane.b32.xlu1 %v3254_v30, %s4423_s30  ;;  %v2728_v42 = vsel %vm4484_vm2, %v2723_v37, %v2727_v35 }
 0x2a3   : > { %3304 = vrot.lane.b32.xlu0 %v3229_v40, %s4423_s30  ;;  %3302 = vrot.lane.b32.xlu2 %v3226_v43, %s4423_s30  ;;  %v3197_v40 = vrot.slane %v4197_v34, 5  ;;  %v4196_v43 = vld [vmem:[%s4473_s22 + $0x6c] sm:$0xe]  ;;  %s5889_s22 = scalar_lea.vmem %s6047_s4, %s4329_s19 }
 0x2a4   : > { %v3295_v50 = vpop.permute.xlu1 %3294  ;;  %v4230_v48 = vrot.slane %v4196_v43, 9 }
 0x2a5   : > { %3373 = vst.msk [vmem:[#allocation2 + $0x48] sm:$0xf] %vm3354_vm15, %v3295_v50  ;;  %v2976_v57 = vpop.permute.xlu0 %2975  ;;  %v2944_v62 = vpop.permute.xlu2 %2943  ;;  %v3199_v45 = vrot.slane %v3197_v40, 4 }
 0x2a6   : > { %3045 = vst.msk [vmem:[#allocation2 + $0x6c] sm:$0xf] %vm3017_vm14, %v2976_v57  ;;  %v3198_v50 = vsel %vm4659_vm6, %v4230_v48, %v3197_v40 }
 0x2a7   : > { %3029 = vst.msk [vmem:[#allocation2 + $0x2c] sm:$0xf] %vm3017_vm14, %v2944_v62  ;;  %v3201_v25 = vsel %vm4659_vm6, %v3199_v45, %v3200_v46 }
 0x2aa   : > { %2390 = vrot.lane.b32.xlu1 %v4110_v63, %s4421_s28 }
 0x2ab   : > { %2388 = vrot.lane.b32.xlu0 %v4109_v0, %s4421_s28  ;;  %3320 = vrot.lane.b32.xlu2 %v3257_v5, %s4423_s30 }
 0x2ac   : > { %v3313_v9 = vpop.permute.xlu1 %3312  ;;  %v4339_v10 = vld [vmem:[#allocation2 + $0x48] sm:$0xff] }
 0x2ad   : > { %3382 = vst.msk [vmem:[#allocation2 + $0x6c] sm:$0xf] %vm3354_vm15, %v3313_v9  ;;  %v3311_v14 = vpop.permute.xlu0 %3310  ;;  %4320 = vmatmul.msk.bf16.gmra.mxu2 %vm3519_vm0, %v4339_v10  ;;  %v3279_v17 = vpop.permute.xlu2 %3278 }
 0x2ae   : > { %3381 = vst.msk [vmem:[#allocation2 + $0x68] sm:$0xf] %vm3354_vm15, %v3311_v14 }
 0x2b2   : > { %2949 = vrot.lane.b32.xlu1 %v2718_v19, %s4422_s29 }
 0x2b3   : > { %2935 = vrot.lane.b32.xlu0 %v2632_v21, %s4422_s29  ;;  %2933 = vrot.lane.b32.xlu2 %v2622_v24, %s4422_s29 }
 0x2b4   : > { %v2942_v31 = vpop.permute.xlu1 %2941 }
 0x2b5   : > { %3028 = vst.msk [vmem:[#allocation2 + $0x28] sm:$0xf] %vm3017_vm14, %v2942_v31  ;;  %v2928_v36 = vpop.permute.xlu0 %2927  ;;  %v4343_v33 = vld [vmem:[#allocation2 + $0x68] sm:$0xff]  ;;  %v2403_v30 = vpop.permute.xlu2 %2402 }
 0x2b6   : > { %3021 = vst.msk [vmem:[#allocation2 + $0xc] sm:$0xf] %vm3017_vm14, %v2928_v36  ;;  %4324 = vmatmul.msk.bf16.gmra.mxu3 %vm3519_vm0, %v4343_v33 }
 0x2b7   : > { %3365 = vst.msk [vmem:[#allocation2 + $0x28] sm:$0xf] %vm3354_vm15, %v3279_v17  ;;  %v5870_v17 = vld [vmem:[%s6045_s2] ss:$0 sm:$0xff] }
 0x2b8   : > { %2478 = vst.msk [vmem:[#allocation2 + $0x54] sm:$0xf] %vm2456_vm12, %v2403_v30 }
 0x2ba   : > { %3272 = vrot.lane.b32.xlu1 %v3173_v38, %s4423_s30 }
 0x2bb   : > { %3270 = vrot.lane.b32.xlu0 %v3170_v39, %s4423_s30  ;;  %2951 = vrot.lane.b32.xlu2 %v2728_v42, %s4422_s29 }
 0x2bc   : > { %v3265_v44 = vpop.permute.xlu1 %3264 }
 0x2bd   : > { %3358 = vst.msk [vmem:[#allocation2 + $0xc] sm:$0xf] %vm3354_vm15, %v3265_v44  ;;  %v3263_v47 = vpop.permute.xlu0 %3262  ;;  %v2962_v49 = vpop.permute.xlu2 %2961 }
 0x2be   : > { %3357 = vst.msk [vmem:[#allocation2 + $0x8] sm:$0xf] %vm3354_vm15, %v3263_v47 }
 0x2c3   : > { %3288 = vrot.lane.b32.xlu0 %v3201_v25, %s4423_s30  ;;  %3286 = vrot.lane.b32.xlu2 %v3198_v50, %s4423_s30 }
 0x2c4   : > { %v2401_v51 = vpop.permute.xlu1 %2400 }
 0x2c5   : > { %2477 = vst.msk [vmem:[#allocation2 + $0x50] sm:$0xf] %vm2456_vm12, %v2401_v51  ;;  %v3281_v53 = vpop.permute.xlu0 %3280  ;;  %v4331_v54 = vld [vmem:[#allocation2 + $0x8] sm:$0xff]  ;;  %v2980_v56 = vpop.permute.xlu2 %2979 }
 0x2c6   : > { %3366 = vst.msk [vmem:[#allocation2 + $0x2c] sm:$0xf] %vm3354_vm15, %v3281_v53  ;;  %4312 = vmatmul.msk.bf16.gmra.mxu0 %vm3519_vm0, %v4331_v54 }
 0x2c7   : > { %3038 = vst.msk [vmem:[#allocation2 + $0x50] sm:$0xf] %vm3017_vm14, %v2962_v49 }
 0x2cc   : > { %v2419_v57 = vpop.permute.xlu1 %2418 }
 0x2cd   : > { %2486 = vst.msk [vmem:[#allocation2 + $0x74] sm:$0xf] %vm2456_vm12, %v2419_v57  ;;  %v2417_v1 = vpop.permute.xlu0 %2416  ;;  %v4335_v58 = vld [vmem:[#allocation2 + $0x28] sm:$0xff]  ;;  %v3315_v59 = vpop.permute.xlu2 %3314 }
 0x2ce   : > { %2485 = vst.msk [vmem:[#allocation2 + $0x70] sm:$0xf] %vm2456_vm12, %v2417_v1  ;;  %4316 = vmatmul.msk.bf16.gmra.mxu1 %vm3519_vm0, %v4335_v58 }
 0x2cf   : > { %3047 = vst.msk [vmem:[#allocation2 + $0x74] sm:$0xf] %vm3017_vm14, %v2980_v56 }
 0x2d4   : > { %v2978_v60 = vpop.permute.xlu1 %2977 }
 0x2d5   : > { %3046 = vst.msk [vmem:[#allocation2 + $0x70] sm:$0xf] %vm3017_vm14, %v2978_v60  ;;  %v2964_v61 = vpop.permute.xlu0 %2963  ;;  %v2932_v62 = vpop.permute.xlu2 %2931 }
 0x2d6   : > { %3039 = vst.msk [vmem:[#allocation2 + $0x54] sm:$0xf] %vm3017_vm14, %v2964_v61 }
 0x2d7   : > { %3383 = vst.msk [vmem:[#allocation2 + $0x70] sm:$0xf] %vm3354_vm15, %v3315_v59 }
 0x2d8   : > { %3023 = vst.msk [vmem:[#allocation2 + $0x14] sm:$0xf] %vm3017_vm14, %v2932_v62 }
 0x2dc   : > { %v3301_v63 = vpop.permute.xlu1 %3300 }
 0x2dd   : > { %3376 = vst.msk [vmem:[#allocation2 + $0x54] sm:$0xf] %vm3354_vm15, %v3301_v63  ;;  %v3299_v52 = vpop.permute.xlu0 %3298  ;;  %v3267_v55 = vpop.permute.xlu2 %3266 }
 0x2de   : > { %3375 = vst.msk [vmem:[#allocation2 + $0x50] sm:$0xf] %vm3354_vm15, %v3299_v52 }
 0x2e4   : > { %v2930_v0 = vpop.permute.xlu1 %2929 }
 0x2e5   : > { %3022 = vst.msk [vmem:[#allocation2 + $0x10] sm:$0xf] %vm3017_vm14, %v2930_v0  ;;  %v3317_v2 = vpop.permute.xlu0 %3316  ;;  %v4340_v3 = vld [vmem:[#allocation2 + $0x50] sm:$0xff]  ;;  %v3285_v4 = vpop.permute.xlu2 %3284 }
 0x2e6   : > { %3384 = vst.msk [vmem:[#allocation2 + $0x74] sm:$0xf] %vm3354_vm15, %v3317_v2  ;;  %4321 = vmatmul.msk.bf16.gmra.mxu2 %vm3519_vm0, %v4340_v3 }
 0x2e7   : > { %3359 = vst.msk [vmem:[#allocation2 + $0x10] sm:$0xf] %vm3354_vm15, %v3267_v55 }
 0x2ec   : > { %v2948_v5 = vpop.permute.xlu1 %2947 }
 0x2ed   : > { %3031 = vst.msk [vmem:[#allocation2 + $0x34] sm:$0xf] %vm3017_vm14, %v2948_v5  ;;  %v2946_v6 = vpop.permute.xlu0 %2945  ;;  %v4344_v7 = vld [vmem:[#allocation2 + $0x70] sm:$0xff]  ;;  %v2421_v8 = vpop.permute.xlu2 %2420 }
 0x2ee   : > { %3030 = vst.msk [vmem:[#allocation2 + $0x30] sm:$0xf] %vm3017_vm14, %v2946_v6  ;;  %4325 = vmatmul.msk.bf16.gmra.mxu3 %vm3519_vm0, %v4344_v7 }
 0x2ef   : > { %3368 = vst.msk [vmem:[#allocation2 + $0x34] sm:$0xf] %vm3354_vm15, %v3285_v4 }
 0x2f0   : > { %2487 = vst.msk [vmem:[#allocation2 + $0x78] sm:$0xf] %vm2456_vm12, %v2421_v8 }
 0x2f4   : > { %v3283_v9 = vpop.permute.xlu1 %3282 }
 0x2f5   : > { %3367 = vst.msk [vmem:[#allocation2 + $0x30] sm:$0xf] %vm3354_vm15, %v3283_v9  ;;  %v3269_v10 = vpop.permute.xlu0 %3268  ;;  %v2968_v11 = vpop.permute.xlu2 %2967 }
 0x2f6   : > { %3360 = vst.msk [vmem:[#allocation2 + $0x14] sm:$0xf] %vm3354_vm15, %v3269_v10 }
 0x2fc   : > { %v2407_v12 = vpop.permute.xlu1 %2406  ;;  %v4336_v13 = vld [vmem:[#allocation2 + $0x30] sm:$0xff] }
 0x2fd   : > { %2480 = vst.msk [vmem:[#allocation2 + $0x5c] sm:$0xf] %vm2456_vm12, %v2407_v12  ;;  %v2405_v14 = vpop.permute.xlu0 %2404  ;;  %v4332_v15 = vld [vmem:[#allocation2 + $0x10] sm:$0xff]  ;;  %4317 = vmatmul.msk.bf16.gmra.mxu1 %vm3519_vm0, %v4336_v13  ;;  %v3303_v16 = vpop.permute.xlu2 %3302 }
 0x2fe   : > { %2479 = vst.msk [vmem:[#allocation2 + $0x58] sm:$0xf] %vm2456_vm12, %v2405_v14  ;;  %4313 = vmatmul.msk.bf16.gmra.mxu0 %vm3519_vm0, %v4332_v15 }
 0x2ff   : > { %3041 = vst.msk [vmem:[#allocation2 + $0x5c] sm:$0xf] %vm3017_vm14, %v2968_v11 }
 0x300   : > { %v3641_v19 = vpop.f32.mrf.mxu3 }
 0x301   : > { %v3621_v20 = vpop.f32.mrf.mxu2  ;;  %v3689_v21 = vmul.f32 %v5870_v17, %v3641_v19 }
 0x302   : > { %v3681_v22 = vmul.f32 %v5870_v17, %v3621_v20 }
 0x303   : > { %v3725_v23 = vadd.f32 %v5876_v18, %v3689_v21 }
 0x304   : > { %v2966_v24 = vpop.permute.xlu1 %2965  ;;  %v3717_v26 = vadd.f32 %v5876_v18, %v3681_v22 }
 0x305   : > { %3040 = vst.msk [vmem:[#allocation2 + $0x58] sm:$0xf] %vm3017_vm14, %v2966_v24  ;;  %v2423_v27 = vpop.permute.xlu0 %2422  ;;  %v3757_v28 = vmax.f32 %v3725_v23, 0.0  ;;  %v3321_v29 = vpop.permute.xlu2 %3320 }
 0x306   : > { %2488 = vst.msk [vmem:[#allocation2 + $0x7c] sm:$0xf] %vm2456_vm12, %v2423_v27  ;;  %v3749_v31 = vmax.f32 %v3717_v26, 0.0 }
 0x307   : > { %3377 = vst.msk [vmem:[#allocation2 + $0x58] sm:$0xf] %vm3354_vm15, %v3303_v16  ;;  %v3789_v32 = vpack.c.bf16 %v3757_v28, %v3757_v28 }
 0x308   : > { %v3781_v34 = vpack.c.bf16 %v3749_v31, %v3749_v31  ;;  %v3643_v36 = vpop.f32.mrf.mxu3 }
 0x309   : > { %3822 = vst.msk [vmem:[%s5889_s22 + $0x60] sm:$0xf] %vm3797_vm1, %v3789_v32  ;;  %v3623_v33 = vpop.f32.mrf.mxu2  ;;  %v3690_v37 = vmul.f32 %v5870_v17, %v3643_v36 }
 0x30a   : > { %3814 = vst.msk [vmem:[%s5889_s22 + $0x40] sm:$0xf] %vm3797_vm1, %v3781_v34  ;;  %v3682_v35 = vmul.f32 %v5870_v17, %v3623_v33  ;;  %v3581_v30 = vpop.f32.mrf.mxu0 }
 0x30b   : > { %v3726_v38 = vadd.f32 %v5876_v18, %v3690_v37  ;;  %v3665_v40 = vmul.f32 %v5870_v17, %v3581_v30 }
 0x30c   : > { %v2984_v39 = vpop.permute.xlu1 %2983  ;;  %v3718_v41 = vadd.f32 %v5876_v18, %v3682_v35 }
 0x30d   : > { %3049 = vst.msk [vmem:[#allocation2 + $0x7c] sm:$0xf] %vm3017_vm14, %v2984_v39  ;;  %v2982_v42 = vpop.permute.xlu0 %2981  ;;  %v3758_v43 = vmax.f32 %v3726_v38, 0.0  ;;  %v3701_v44 = vadd.f32 %v5876_v18, %v3665_v40  ;;  %v2934_v45 = vpop.permute.xlu2 %2933 }
 0x30e   : > { %3048 = vst.msk [vmem:[#allocation2 + $0x78] sm:$0xf] %vm3017_vm14, %v2982_v42  ;;  %v3750_v46 = vmax.f32 %v3718_v41, 0.0 }
 0x30f   : > { %3386 = vst.msk [vmem:[#allocation2 + $0x7c] sm:$0xf] %vm3354_vm15, %v3321_v29  ;;  %v3790_v47 = vpack.c.bf16 %v3758_v43, %v3758_v43  ;;  %v3733_v48 = vmax.f32 %v3701_v44, 0.0 }
 0x310   : > { %3024 = vst.msk [vmem:[#allocation2 + $0x18] sm:$0xf] %vm3017_vm14, %v2934_v45  ;;  %v3782_v49 = vpack.c.bf16 %v3750_v46, %v3750_v46 }
 0x311   : > { %3823 = vst.msk [vmem:[%s5889_s22 + $0x64] sm:$0xf] %vm3797_vm1, %v3790_v47  ;;  %v3765_v25 = vpack.c.bf16 %v3733_v48, %v3733_v48 }
 0x312   : > { %3815 = vst.msk [vmem:[%s5889_s22 + $0x44] sm:$0xf] %vm3797_vm1, %v3782_v49  ;;  %v3583_v50 = vpop.f32.mrf.mxu0 }
 0x313   : > { %3798 = vst.msk [vmem:[%s5889_s22] sm:$0xf] %vm3797_vm1, %v3765_v25  ;;  %v3666_v53 = vmul.f32 %v5870_v17, %v3583_v50  ;;  %v3601_v54 = vpop.f32.mrf.mxu1 }
 0x314   : > { %v3319_v51 = vpop.permute.xlu1 %3318  ;;  %v3673_v57 = vmul.f32 %v5870_v17, %v3601_v54 }
 0x315   : > { %3385 = vst.msk [vmem:[#allocation2 + $0x78] sm:$0xf] %vm3354_vm15, %v3319_v51  ;;  %v3305_v56 = vpop.permute.xlu0 %3304  ;;  %v3702_v1 = vadd.f32 %v5876_v18, %v3666_v53  ;;  %v2952_v63 = vpop.permute.xlu2 %2951 }
 0x316   : > { %3378 = vst.msk [vmem:[#allocation2 + $0x5c] sm:$0xf] %vm3354_vm15, %v3305_v56  ;;  %v3709_v58 = vadd.f32 %v5876_v18, %v3673_v57 }
 0x317   : > { %v3734_v59 = vmax.f32 %v3702_v1, 0.0 }
 0x318   : > { %v3741_v60 = vmax.f32 %v3709_v58, 0.0 }
 0x319   : > { %v3766_v61 = vpack.c.bf16 %v3734_v59, %v3734_v59 }
 0x31a   : > { %v3773_v62 = vpack.c.bf16 %v3741_v60, %v3741_v60 }
 0x31b   : > { %3799 = vst.msk [vmem:[%s5889_s22 + $0x4] sm:$0xf] %vm3797_vm1, %v3766_v61  ;;  %v3603_v55 = vpop.f32.mrf.mxu1 }
 0x31c   : > { %v2391_v52 = vpop.permute.xlu1 %2390  ;;  %v4345_v0 = vld [vmem:[#allocation2 + $0x78] sm:$0xff]  ;;  %3806 = vst.msk [vmem:[%s5889_s22 + $0x20] sm:$0xf] %vm3797_vm1, %v3773_v62  ;;  %v3674_v3 = vmul.f32 %v5870_v17, %v3603_v55 }
 0x31d   : > { %v2389_v2 = vpop.permute.xlu0 %2388  ;;  %v4341_v4 = vld [vmem:[#allocation2 + $0x58] sm:$0xff]  ;;  %2472 = vst.msk [vmem:[#allocation2 + $0x3c] sm:$0xf] %vm2456_vm12, %v2391_v52  ;;  %4326 = vmatmul.msk.bf16.gmra.mxu3 %vm3519_vm0, %v4345_v0  ;;  %v3287_v10 = vpop.permute.xlu2 %3286 }
 0x31e   : > { %2471 = vst.msk [vmem:[#allocation2 + $0x38] sm:$0xf] %vm2456_vm12, %v2389_v2  ;;  %v3710_v5 = vadd.f32 %v5876_v18, %v3674_v3  ;;  %4322 = vmatmul.msk.bf16.gmra.mxu2 %vm3519_vm0, %v4341_v4 }
 0x31f   : > { %3033 = vst.msk [vmem:[#allocation2 + $0x3c] sm:$0xf] %vm3017_vm14, %v2952_v63 }
 0x320   : > { %v3742_v6 = vmax.f32 %v3710_v5, 0.0 }
 0x322   : > { %v3774_v7 = vpack.c.bf16 %v3742_v6, %v3742_v6 }
 0x324   : > { %v2950_v8 = vpop.permute.xlu1 %2949  ;;  %3807 = vst.msk [vmem:[%s5889_s22 + $0x24] sm:$0xf] %vm3797_vm1, %v3774_v7 }
 0x325   : > { %v2936_v9 = vpop.permute.xlu0 %2935  ;;  %3032 = vst.msk [vmem:[#allocation2 + $0x38] sm:$0xf] %vm3017_vm14, %v2950_v8 }
 0x326   : > { %3025 = vst.msk [vmem:[#allocation2 + $0x1c] sm:$0xf] %vm3017_vm14, %v2936_v9 }
 0x327   : > { %3369 = vst.msk [vmem:[#allocation2 + $0x38] sm:$0xf] %vm3354_vm15, %v3287_v10 }
 0x32c   : > { %v3273_v11 = vpop.permute.xlu1 %3272 }
 0x32d   : > { %3362 = vst.msk [vmem:[#allocation2 + $0x1c] sm:$0xf] %vm3354_vm15, %v3273_v11  ;;  %v3271_v12 = vpop.permute.xlu0 %3270 }
 0x32e   : > { %3361 = vst.msk [vmem:[#allocation2 + $0x18] sm:$0xf] %vm3354_vm15, %v3271_v12 }
 0x330   : > { %v3626_v13 = vpop.f32.mrf.mxu2 }
 0x331   : > { %v3683_v14 = vmul.f32 %v5870_v17, %v3626_v13 }
 0x333   : > { %v3719_v15 = vadd.f32 %v5876_v18, %v3683_v14 }
 0x335   : > { %v3289_v16 = vpop.permute.xlu0 %3288  ;;  %v4333_v19 = vld [vmem:[#allocation2 + $0x18] sm:$0xff]  ;;  %v3751_v20 = vmax.f32 %v3719_v15, 0.0 }
 0x336   : > { %3370 = vst.msk [vmem:[#allocation2 + $0x3c] sm:$0xf] %vm3354_vm15, %v3289_v16  ;;  %4314 = vmatmul.msk.bf16.gmra.mxu0 %vm3519_vm0, %v4333_v19 }
 0x337   : > { %v3783_v21 = vpack.c.bf16 %v3751_v20, %v3751_v20 }
 0x338   : > { %v3628_v22 = vpop.f32.mrf.mxu2 }
 0x339   : > { %3816 = vst.msk [vmem:[%s5889_s22 + $0x48] sm:$0xf] %vm3797_vm1, %v3783_v21  ;;  %v3684_v23 = vmul.f32 %v5870_v17, %v3628_v22  ;;  %v3646_v24 = vpop.f32.mrf.mxu3 }
 0x33a   : > { %v3691_v26 = vmul.f32 %v5870_v17, %v3646_v24 }
 0x33b   : > { %v3720_v27 = vadd.f32 %v5876_v18, %v3684_v23 }
 0x33c   : > { %v3727_v28 = vadd.f32 %v5876_v18, %v3691_v26 }
 0x33d   : > { %v4337_v29 = vld [vmem:[#allocation2 + $0x38] sm:$0xff]  ;;  %v3752_v31 = vmax.f32 %v3720_v27, 0.0 }
 0x33e   : > { %v3759_v32 = vmax.f32 %v3727_v28, 0.0  ;;  %4318 = vmatmul.msk.bf16.gmra.mxu1 %vm3519_vm0, %v4337_v29 }
 0x33f   : > { %v3784_v34 = vpack.c.bf16 %v3752_v31, %v3752_v31 }
 0x340   : > { %v3791_v36 = vpack.c.bf16 %v3759_v32, %v3759_v32 }
 0x341   : > { %3817 = vst.msk [vmem:[%s5889_s22 + $0x4c] sm:$0xf] %vm3797_vm1, %v3784_v34  ;;  %v3648_v33 = vpop.f32.mrf.mxu3 }
 0x342   : > { %3824 = vst.msk [vmem:[%s5889_s22 + $0x68] sm:$0xf] %vm3797_vm1, %v3791_v36  ;;  %v3692_v37 = vmul.f32 %v5870_v17, %v3648_v33 }
 0x343   : > { %v3586_v35 = vpop.f32.mrf.mxu0 }
 0x344   : > { %v3728_v30 = vadd.f32 %v5876_v18, %v3692_v37  ;;  %v3667_v38 = vmul.f32 %v5870_v17, %v3586_v35 }
 0x346   : > { %v3760_v39 = vmax.f32 %v3728_v30, 0.0  ;;  %v3703_v40 = vadd.f32 %v5876_v18, %v3667_v38 }
 0x348   : > { %v3792_v41 = vpack.c.bf16 %v3760_v39, %v3760_v39  ;;  %v3735_v42 = vmax.f32 %v3703_v40, 0.0 }
 0x34a   : > { %3825 = vst.msk [vmem:[%s5889_s22 + $0x6c] sm:$0xf] %vm3797_vm1, %v3792_v41  ;;  %v3767_v43 = vpack.c.bf16 %v3735_v42, %v3735_v42 }
 0x34b   : > { %v3588_v44 = vpop.f32.mrf.mxu0  ;;  %v3606_v45 = vpop.f32.mrf.mxu1 }
 0x34c   : > { %3800 = vst.msk [vmem:[%s5889_s22 + $0x8] sm:$0xf] %vm3797_vm1, %v3767_v43  ;;  %v3668_v46 = vmul.f32 %v5870_v17, %v3588_v44  ;;  %v3675_v47 = vmul.f32 %v5870_v17, %v3606_v45 }
 0x34e   : > { %v3704_v48 = vadd.f32 %v5876_v18, %v3668_v46  ;;  %v3711_v49 = vadd.f32 %v5876_v18, %v3675_v47 }
 0x350   : > { %v3736_v25 = vmax.f32 %v3704_v48, 0.0  ;;  %v3743_v50 = vmax.f32 %v3711_v49, 0.0 }
 0x352   : > { %v3768_v51 = vpack.c.bf16 %v3736_v25, %v3736_v25  ;;  %v3775_v53 = vpack.c.bf16 %v3743_v50, %v3743_v50 }
 0x353   : > { %v3608_v54 = vpop.f32.mrf.mxu1 }
 0x354   : > { %3801 = vst.msk [vmem:[%s5889_s22 + $0xc] sm:$0xf] %vm3797_vm1, %v3768_v51  ;;  %v3676_v56 = vmul.f32 %v5870_v17, %v3608_v54 }
 0x355   : > { %3808 = vst.msk [vmem:[%s5889_s22 + $0x28] sm:$0xf] %vm3797_vm1, %v3775_v53 }
 0x356   : > { %v3712_v57 = vadd.f32 %v5876_v18, %v3676_v56 }
 0x358   : > { %v3744_v1 = vmax.f32 %v3712_v57, 0.0 }
 0x35a   : > { %v3776_v58 = vpack.c.bf16 %v3744_v1, %v3744_v1 }
 0x35c   : > { %3809 = vst.msk [vmem:[%s5889_s22 + $0x2c] sm:$0xf] %vm3797_vm1, %v3776_v58 }
 0x369   : > { %v3631_v59 = vpop.f32.mrf.mxu2 }
 0x36a   : > { %v3685_v60 = vmul.f32 %v5870_v17, %v3631_v59 }
 0x36c   : > { %v3721_v61 = vadd.f32 %v5876_v18, %v3685_v60 }
 0x36e   : > { %v3753_v62 = vmax.f32 %v3721_v61, 0.0 }
 0x370   : > { %v3785_v63 = vpack.c.bf16 %v3753_v62, %v3753_v62 }
 0x371   : > { %v3633_v52 = vpop.f32.mrf.mxu2  ;;  %v3651_v55 = vpop.f32.mrf.mxu3 }
 0x372   : > { %3818 = vst.msk [vmem:[%s5889_s22 + $0x50] sm:$0xf] %vm3797_vm1, %v3785_v63  ;;  %v3686_v0 = vmul.f32 %v5870_v17, %v3633_v52  ;;  %v3693_v2 = vmul.f32 %v5870_v17, %v3651_v55 }
 0x374   : > { %v3722_v3 = vadd.f32 %v5876_v18, %v3686_v0  ;;  %v3729_v4 = vadd.f32 %v5876_v18, %v3693_v2 }
 0x376   : > { %v3754_v5 = vmax.f32 %v3722_v3, 0.0  ;;  %v3761_v6 = vmax.f32 %v3729_v4, 0.0 }
 0x378   : > { %v3786_v7 = vpack.c.bf16 %v3754_v5, %v3754_v5  ;;  %v3793_v8 = vpack.c.bf16 %v3761_v6, %v3761_v6 }
 0x379   : > { %v3653_v9 = vpop.f32.mrf.mxu3 }
 0x37a   : > { %3819 = vst.msk [vmem:[%s5889_s22 + $0x54] sm:$0xf] %vm3797_vm1, %v3786_v7  ;;  %v3694_v10 = vmul.f32 %v5870_v17, %v3653_v9  ;;  %v3611_v11 = vpop.f32.mrf.mxu1 }
 0x37b   : > { %3826 = vst.msk [vmem:[%s5889_s22 + $0x70] sm:$0xf] %vm3797_vm1, %v3793_v8  ;;  %v3591_v12 = vpop.f32.mrf.mxu0  ;;  %v3677_v13 = vmul.f32 %v5870_v17, %v3611_v11 }
 0x37c   : > { %v3730_v14 = vadd.f32 %v5876_v18, %v3694_v10  ;;  %v3669_v15 = vmul.f32 %v5870_v17, %v3591_v12 }
 0x37d   : > { %v3713_v16 = vadd.f32 %v5876_v18, %v3677_v13 }
 0x37e   : > { %v3762_v19 = vmax.f32 %v3730_v14, 0.0  ;;  %v3705_v20 = vadd.f32 %v5876_v18, %v3669_v15 }
 0x37f   : > { %v3745_v21 = vmax.f32 %v3713_v16, 0.0 }
 0x380   : > { %v3794_v22 = vpack.c.bf16 %v3762_v19, %v3762_v19  ;;  %v3737_v23 = vmax.f32 %v3705_v20, 0.0 }
 0x381   : > { %v3777_v24 = vpack.c.bf16 %v3745_v21, %v3745_v21 }
 0x382   : > { %3827 = vst.msk [vmem:[%s5889_s22 + $0x74] sm:$0xf] %vm3797_vm1, %v3794_v22  ;;  %v3769_v26 = vpack.c.bf16 %v3737_v23, %v3737_v23  ;;  %v3613_v27 = vpop.f32.mrf.mxu1 }
 0x383   : > { %3810 = vst.msk [vmem:[%s5889_s22 + $0x30] sm:$0xf] %vm3797_vm1, %v3777_v24  ;;  %v3593_v28 = vpop.f32.mrf.mxu0  ;;  %v3678_v29 = vmul.f32 %v5870_v17, %v3613_v27 }
 0x384   : > { %3802 = vst.msk [vmem:[%s5889_s22 + $0x10] sm:$0xf] %vm3797_vm1, %v3769_v26  ;;  %v3670_v31 = vmul.f32 %v5870_v17, %v3593_v28 }
 0x385   : > { %v3714_v32 = vadd.f32 %v5876_v18, %v3678_v29 }
 0x386   : > { %v3706_v34 = vadd.f32 %v5876_v18, %v3670_v31 }
 0x387   : > { %v3746_v36 = vmax.f32 %v3714_v32, 0.0 }
 0x388   : > { %v3738_v33 = vmax.f32 %v3706_v34, 0.0 }
 0x389   : > { %v3778_v37 = vpack.c.bf16 %v3746_v36, %v3746_v36 }
 0x38a   : > { %v3770_v35 = vpack.c.bf16 %v3738_v33, %v3738_v33 }
 0x38b   : > { %3811 = vst.msk [vmem:[%s5889_s22 + $0x34] sm:$0xf] %vm3797_vm1, %v3778_v37 }
 0x38c   : > { %3803 = vst.msk [vmem:[%s5889_s22 + $0x14] sm:$0xf] %vm3797_vm1, %v3770_v35 }
 0x3a0   : > { %v3656_v30 = vpop.f32.mrf.mxu3 }
 0x3a1   : > { %v3636_v38 = vpop.f32.mrf.mxu2  ;;  %v3695_v39 = vmul.f32 %v5870_v17, %v3656_v30 }
 0x3a2   : > { %v3687_v40 = vmul.f32 %v5870_v17, %v3636_v38 }
 0x3a3   : > { %v3731_v41 = vadd.f32 %v5876_v18, %v3695_v39 }
 0x3a4   : > { %v3723_v42 = vadd.f32 %v5876_v18, %v3687_v40 }
 0x3a5   : > { %v3763_v43 = vmax.f32 %v3731_v41, 0.0 }
 0x3a6   : > { %v3755_v44 = vmax.f32 %v3723_v42, 0.0 }
 0x3a7   : > { %v3795_v45 = vpack.c.bf16 %v3763_v43, %v3763_v43 }
 0x3a8   : > { %v3787_v46 = vpack.c.bf16 %v3755_v44, %v3755_v44  ;;  %v3658_v47 = vpop.f32.mrf.mxu3 }
 0x3a9   : > { %3828 = vst.msk [vmem:[%s5889_s22 + $0x78] sm:$0xf] %vm3797_vm1, %v3795_v45  ;;  %v3638_v48 = vpop.f32.mrf.mxu2  ;;  %v3696_v49 = vmul.f32 %v5870_v17, %v3658_v47 }
 0x3aa   : > { %3820 = vst.msk [vmem:[%s5889_s22 + $0x58] sm:$0xf] %vm3797_vm1, %v3787_v46  ;;  %v3688_v25 = vmul.f32 %v5870_v17, %v3638_v48 }
 0x3ab   : > { %v3732_v50 = vadd.f32 %v5876_v18, %v3696_v49 }
 0x3ac   : > { %v3724_v51 = vadd.f32 %v5876_v18, %v3688_v25 }
 0x3ad   : > { %v3764_v53 = vmax.f32 %v3732_v50, 0.0 }
 0x3ae   : > { %v3756_v54 = vmax.f32 %v3724_v51, 0.0 }
 0x3af   : > { %v3796_v56 = vpack.c.bf16 %v3764_v53, %v3764_v53 }
 0x3b0   : > { %v3788_v57 = vpack.c.bf16 %v3756_v54, %v3756_v54 }
 0x3b1   : > { %3829 = vst.msk [vmem:[%s5889_s22 + $0x7c] sm:$0xf] %vm3797_vm1, %v3796_v56 }
 0x3b2   : > { %3821 = vst.msk [vmem:[%s5889_s22 + $0x5c] sm:$0xf] %vm3797_vm1, %v3788_v57 }
 0x3b3   : > { %v3596_v1 = vpop.f32.mrf.mxu0 }
 0x3b4   : > { %v3671_v58 = vmul.f32 %v5870_v17, %v3596_v1 }
 0x3b6   : > { %v3707_v59 = vadd.f32 %v5876_v18, %v3671_v58 }
 0x3b8   : > { %v3739_v60 = vmax.f32 %v3707_v59, 0.0 }
 0x3ba   : > { %v3771_v61 = vpack.c.bf16 %v3739_v60, %v3739_v60 }
 0x3bb   : > { %v3598_v62 = vpop.f32.mrf.mxu0  ;;  %v3616_v63 = vpop.f32.mrf.mxu1 }
 0x3bc   : > { %3804 = vst.msk [vmem:[%s5889_s22 + $0x18] sm:$0xf] %vm3797_vm1, %v3771_v61  ;;  %v3672_v52 = vmul.f32 %v5870_v17, %v3598_v62  ;;  %v3679_v55 = vmul.f32 %v5870_v17, %v3616_v63 }
 0x3be   : > { %v3708_v0 = vadd.f32 %v5876_v18, %v3672_v52  ;;  %v3715_v2 = vadd.f32 %v5876_v18, %v3679_v55 }
 0x3c0   : > { %v3740_v3 = vmax.f32 %v3708_v0, 0.0  ;;  %v3747_v4 = vmax.f32 %v3715_v2, 0.0 }
 0x3c2   : > { %v3772_v5 = vpack.c.bf16 %v3740_v3, %v3740_v3  ;;  %v3779_v6 = vpack.c.bf16 %v3747_v4, %v3747_v4 }
 0x3c3   : > { %v3618_v7 = vpop.f32.mrf.mxu1 }
 0x3c4   : > { %3805 = vst.msk [vmem:[%s5889_s22 + $0x1c] sm:$0xf] %vm3797_vm1, %v3772_v5  ;;  %v3680_v8 = vmul.f32 %v5870_v17, %v3618_v7 }
 0x3c5   : > { %3812 = vst.msk [vmem:[%s5889_s22 + $0x38] sm:$0xf] %vm3797_vm1, %v3779_v6 }
 0x3c6   : > { %v3716_v9 = vadd.f32 %v5876_v18, %v3680_v8 }
 0x3c8   : > { %v3748_v10 = vmax.f32 %v3716_v9, 0.0 }
 0x3ca   : > { %v3780_v11 = vpack.c.bf16 %v3748_v10, %v3748_v10 }
 0x3cc   : > { %3813 = vst.msk [vmem:[%s5889_s22 + $0x3c] sm:$0xf] %vm3797_vm1, %v3780_v11 }
 0x3cd PF: > { %s14_s17 = sadd.s32 1, %s4414_s17   ;;  %s6052_s15 = smov %s4410_s16 }
 0x3ce   : > { %p11_p5 = scmp.ge.s32.totalorder %s14_s17, 4   ;;  %s6053_s16 = smov %s6055_s18 }
 0x3d0   :  { %13 = sbr.rel (!%p11_p5) target bundleno = 2 (0x2), region = 69 }

</bundles_post_ra>
